<compile_context>
chip_gen: v5e
topology: v5e:2x2
jax: 0.10.0
libtpu: 0.0.40
codegen_flags: <defaults>
</compile_context>

<pallas_src>
import jax
import jax.numpy as jnp
from jax.experimental import pallas as pl
from jax.experimental.pallas import tpu as pltpu

BN_EPS = 1e-5          # torch.nn.BatchNorm1d default
NEG_INF = -1e30        # bias for padded (fake) class lanes -> softmax prob ~ 0
TILE_M = 128           # MXU-height batch tile (small batches are zero-padded up)
TILE_K = 512           # K tile for streaming the big first-layer weights
LANE = 128             # lane-dense padded logit width per head


def _round_up(x, m):
    return (x + m - 1) // m * m


def triplet_kernel(
    # inputs
    x_ref, wb_ref, bb_ref, wf_ref, bf_ref,
    w1b_ref, w1f_ref, b1_ref, bn_scale_ref, bn_shift_ref,
    ws1_ref, bs1_ref, ws2_ref, bs2_ref,
    wa1_ref, ba1_ref, wa2_ref, ba2_ref,
    wg1_ref, bg1_ref, wg2_ref, bg2_ref,
    # outputs
    o_st_ref, o_age_ref, o_g_ref,
    # scratch
    accb_ref, accf_ref,
):
    k = pl.program_id(1)

    @pl.when(k == 0)
    def _init():
        accb_ref[...] = jnp.zeros_like(accb_ref)
        accf_ref[...] = jnp.zeros_like(accf_ref)

    # ---- base_model / feature_extractor stubs: K-tiled bf16 matmuls, f32 acc ----
    x_bf = x_ref[...].astype(jnp.bfloat16)
    accb_ref[...] += jnp.dot(x_bf, wb_ref[...], preferred_element_type=jnp.float32)
    accf_ref[...] += jnp.dot(x_bf, wf_ref[...], preferred_element_type=jnp.float32)

    @pl.when(k == pl.num_programs(1) - 1)
    def _epilogue():
        xb = accb_ref[...] + bb_ref[...]
        xf = accf_ref[...] + bf_ref[...]

        # torch.cat((xb, xf), -1) @ W1  ==  xb @ W1[:FB] + xf @ W1[FB:]
        # embedding_dropout(p=0.3): identity in eval mode.
        h = (jnp.dot(xb.astype(jnp.bfloat16), w1b_ref[...],
                     preferred_element_type=jnp.float32)
             + jnp.dot(xf.astype(jnp.bfloat16), w1f_ref[...],
                       preferred_element_type=jnp.float32)
             + b1_ref[...])
        h = jnp.maximum(h, 0.0)                                   # hidden ReLU

        # BatchNorm1d (eval), folded on host:
        #   scale = gamma * rsqrt(var + eps); shift = beta - mean * scale
        emb = h * bn_scale_ref[...] + bn_shift_ref[...]
        emb_bf = emb.astype(jnp.bfloat16)

        def head(w1, b1, w2, b2, out_ref):
            z = jnp.dot(emb_bf, w1[...], preferred_element_type=jnp.float32) + b1[...]
            z = jnp.maximum(z, 0.0)
            # head Dropout: identity in eval mode.
            logits = (jnp.dot(z.astype(jnp.bfloat16), w2[...],
                              preferred_element_type=jnp.float32) + b2[...])
            m = jnp.max(logits, axis=-1, keepdims=True)
            e = jnp.exp(logits - m)
            out_ref[...] = (e / jnp.sum(e, axis=-1, keepdims=True)).astype(out_ref.dtype)

        head(ws1_ref, bs1_ref, ws2_ref, bs2_ref, o_st_ref)
        head(wa1_ref, ba1_ref, wa2_ref, ba2_ref, o_age_ref)
        head(wg1_ref, bg1_ref, wg2_ref, bg2_ref, o_g_ref)


# --------------------------------------------------------------------------- #
# Host-side parameter construction / preparation                              #
# --------------------------------------------------------------------------- #
def make_raw_params(key, in_dim, fb=256, ff=256, hidden=128,
                    st_hidden=128, age_hidden=128, g_hidden=128,
                    n_st=10, n_age=4, n_g=2):
    """Deterministic synthetic params (torch-Linear-like uniform init), f32."""
    ks = iter(jax.random.split(key, 32))

    def lin(fan_in, fan_out):
        bound = 1.0 / (fan_in ** 0.5)
        w = jax.random.uniform(next(ks), (fan_in, fan_out), jnp.float32, -bound, bound)
        b = jax.random.uniform(next(ks), (fan_out,), jnp.float32, -bound, bound)
        return w, b

    p = {}
    p["wb"], p["bb"] = lin(in_dim, fb)          # base_model stub
    p["wf"], p["bf"] = lin(in_dim, ff)          # feature_extractor stub
    p["w1"], p["b1"] = lin(fb + ff, hidden)     # encoder hidden layer
    p["bn_gamma"] = 1.0 + 0.1 * jax.random.normal(next(ks), (hidden,), jnp.float32)
    p["bn_beta"] = 0.1 * jax.random.normal(next(ks), (hidden,), jnp.float32)
    p["bn_mean"] = 0.05 * jax.random.normal(next(ks), (hidden,), jnp.float32)
    p["bn_var"] = 1.0 + 0.1 * jax.random.uniform(next(ks), (hidden,), jnp.float32)
    p["ws1"], p["bs1"] = lin(hidden, st_hidden)     # st head
    p["ws2"], p["bs2"] = lin(st_hidden, n_st)
    p["wa1"], p["ba1"] = lin(hidden, age_hidden)    # age head
    p["wa2"], p["ba2"] = lin(age_hidden, n_age)
    p["wg1"], p["bg1"] = lin(hidden, g_hidden)      # gender head
    p["wg2"], p["bg2"] = lin(g_hidden, n_g)
    return p


def prepare_params(raw):
    """bf16 weights, split concat-matmul, folded BN, lane-padded class heads."""
    f32, bf16 = jnp.float32, jnp.bfloat16
    fb = raw["wb"].shape[1]
    in_dim = raw["wb"].shape[0]
    in_dim_p = _round_up(in_dim, TILE_K)

    def pad_k(w):                                    # pad K (rows) to TILE_K multiple
        out = jnp.zeros((in_dim_p, w.shape[1]), f32)
        return out.at[:in_dim].set(w)

    def pad_head(w2, b2):                            # pad classes to a full 128 lanes
        hd, nc = w2.shape
        w2p = jnp.zeros((hd, LANE), f32).at[:, :nc].set(w2)
        b2p = jnp.full((1, LANE), NEG_INF, f32).at[0, :nc].set(b2)
        return w2p.astype(bf16), b2p

    scale = raw["bn_gamma"] * jax.lax.rsqrt(raw["bn_var"] + BN_EPS)
    shift = raw["bn_beta"] - raw["bn_mean"] * scale

    prep = dict(
        wb=pad_k(raw["wb"]).astype(bf16), bb=raw["bb"].reshape(1, -1),
        wf=pad_k(raw["wf"]).astype(bf16), bf=raw["bf"].reshape(1, -1),
        w1b=raw["w1"][:fb].astype(bf16), w1f=raw["w1"][fb:].astype(bf16),
        b1=raw["b1"].reshape(1, -1),
        bn_scale=scale.reshape(1, -1), bn_shift=shift.reshape(1, -1),
        ws1=raw["ws1"].astype(bf16), bs1=raw["bs1"].reshape(1, -1),
        wa1=raw["wa1"].astype(bf16), ba1=raw["ba1"].reshape(1, -1),
        wg1=raw["wg1"].astype(bf16), bg1=raw["bg1"].reshape(1, -1),
    )
    prep["ws2"], prep["bs2"] = pad_head(raw["ws2"], raw["bs2"])
    prep["wa2"], prep["ba2"] = pad_head(raw["wa2"], raw["ba2"])
    prep["wg2"], prep["bg2"] = pad_head(raw["wg2"], raw["bg2"])
    prep["n_classes"] = (raw["ws2"].shape[1], raw["wa2"].shape[1], raw["wg2"].shape[1])
    prep["in_dim"] = in_dim
    return prep


# --------------------------------------------------------------------------- #
# Forward pass (Pallas) + plain-JAX reference                                  #
# --------------------------------------------------------------------------- #
def triplet_forward(x_nchw, prep):
    B = x_nchw.shape[0]
    x_flat = x_nchw.reshape(B, -1).astype(jnp.float32)
    in_dim_p = prep["wb"].shape[0]                    # K, already padded to TILE_K
    m_pad = _round_up(B, TILE_M)                      # fill the MXU height

    x_p = jnp.zeros((m_pad, in_dim_p), jnp.float32).at[:B, :x_flat.shape[1]].set(x_flat)

    fb, ff = prep["wb"].shape[1], prep["wf"].shape[1]
    h1 = prep["w1b"].shape[1]
    hd_st, hd_a, hd_g = prep["ws1"].shape[1], prep["wa1"].shape[1], prep["wg1"].shape[1]

    args = (x_p, prep["wb"], prep["bb"], prep["wf"], prep["bf"],
            prep["w1b"], prep["w1f"], prep["b1"], prep["bn_scale"], prep["bn_shift"],
            prep["ws1"], prep["bs1"], prep["ws2"], prep["bs2"],
            prep["wa1"], prep["ba1"], prep["wa2"], prep["ba2"],
            prep["wg1"], prep["bg1"], prep["wg2"], prep["bg2"])

    def full(a):                                       # small, fully-resident params
        return pl.BlockSpec(a.shape, lambda m, k: (0, 0))

    in_specs = [
        pl.BlockSpec((TILE_M, TILE_K), lambda m, k: (m, k)),   # x  (M, K tiles)
        pl.BlockSpec((TILE_K, fb), lambda m, k: (k, 0)),       # wb (K tiles streamed)
        full(prep["bb"]),
        pl.BlockSpec((TILE_K, ff), lambda m, k: (k, 0)),       # wf (K tiles streamed)
        full(prep["bf"]),
    ] + [full(a) for a in args[5:]]

    out_spec = pl.BlockSpec((TILE_M, LANE), lambda m, k: (m, 0))
    out_specs = (out_spec, out_spec, out_spec)
    out_shape = tuple(jax.ShapeDtypeStruct((m_pad, LANE), jnp.float32) for _ in range(3))

    grid = (m_pad // TILE_M, in_dim_p // TILE_K)

    head_flops = (h1 * hd_st + hd_st * LANE) + (h1 * hd_a + hd_a * LANE) + (h1 * hd_g + hd_g * LANE)
    flops = 2 * m_pad * (in_dim_p * (fb + ff) + (fb + ff) * h1 + head_flops)
    transcendentals = 3 * m_pad * LANE                      # softmax exp
    bytes_accessed = (sum(int(a.size) * a.dtype.itemsize for a in args)
                      + 3 * m_pad * LANE * 4)
    cost = pl.CostEstimate(flops=int(flops), transcendentals=int(transcendentals),
                           bytes_accessed=int(bytes_accessed))

    grid_spec = pltpu.PrefetchScalarGridSpec(
        num_scalar_prefetch=0,
        grid=grid,
        in_specs=in_specs,
        out_specs=out_specs,
        scratch_shapes=[pltpu.VMEM((TILE_M, fb), jnp.float32),
                        pltpu.VMEM((TILE_M, ff), jnp.float32)],
    )

    out_st, out_age, out_g = pl.pallas_call(
        triplet_kernel,
        out_shape=out_shape,
        grid_spec=grid_spec,
        compiler_params=pltpu.CompilerParams(
            # M tiles independent (v7x megacore); K is the reduction -> arbitrary, last.
            dimension_semantics=("parallel", "arbitrary"),
            # Sized for v7x's 64 MiB physical VMEM with headroom (fine on v5e/v6e).
            vmem_limit_bytes=48 << 20,
        ),
        cost_estimate=cost,
    )(*args)

    n_st, n_age, n_g = prep["n_classes"]
    return [out_st[:B, :n_st], out_age[:B, :n_age], out_g[:B, :n_g]]


def reference_forward(x_nchw, prep):
    """Plain-JAX mirror (same bf16 weights / casts) for correctness checking."""
    B = x_nchw.shape[0]
    x = x_nchw.reshape(B, -1).astype(jnp.float32)
    x_p = jnp.zeros((B, prep["wb"].shape[0]), jnp.float32).at[:, :x.shape[1]].set(x)

    def mm(a, w):
        return jnp.dot(a.astype(jnp.bfloat16), w, preferred_element_type=jnp.float32)

    xb = mm(x_p, prep["wb"]) + prep["bb"]
    xf = mm(x_p, prep["wf"]) + prep["bf"]
    h = jnp.maximum(mm(xb, prep["w1b"]) + mm(xf, prep["w1f"]) + prep["b1"], 0.0)
    emb = h * prep["bn_scale"] + prep["bn_shift"]

    def head(w1, b1, w2, b2, nc):
        z = jnp.maximum(mm(emb, w1) + b1, 0.0)
        logits = mm(z, w2) + b2
        return jax.nn.softmax(logits, axis=-1)[:, :nc]

    n_st, n_age, n_g = prep["n_classes"]
    return [head(prep["ws1"], prep["bs1"], prep["ws2"], prep["bs2"], n_st),
            head(prep["wa1"], prep["ba1"], prep["wa2"], prep["ba2"], n_age),
            head(prep["wg1"], prep["bg1"], prep["wg2"], prep["bg2"], n_g)]


if __name__ == "__main__":
    # Small shapes consistent with the module:
    #   image input [B, C, H, W] = [2, 4, 16, 16]  -> flattened in_dim = 1024
    #   base / extractor embedding dims = 256 each (concat 512)
    #   encoder hidden_dims = [128], head hidden dims = 128, classes = (10, 4, 2)
    B, C, H, W = 2, 4, 16, 16

    key = jax.random.PRNGKey(0)
    kx, kp = jax.random.split(key)
    x = jax.random.normal(kx, (B, C, H, W), jnp.float32)

    raw = make_raw_params(kp, in_dim=C * H * W)
    prep = prepare_params(raw)

    outs = triplet_forward(x, prep)
    outs = jax.block_until_ready(outs)
    refs = reference_forward(x, prep)

    for o, r, nc in zip(outs, refs, prep["n_classes"]):
        assert o.shape == (B, nc) and o.dtype == jnp.float32
        assert bool(jnp.all(jnp.isfinite(o)))
        assert bool(jnp.allclose(jnp.sum(o, axis=-1), 1.0, atol=1e-3))
        assert bool(jnp.allclose(o, r, atol=2e-3, rtol=2e-3))

    print("KERNEL_OK")
</pallas_src>

<mosaic_0001>
module attributes {stable_mosaic.version = 11 : i64} {
  func.func @triplet_kernel(%arg0: i32, %arg1: i32, %arg2: memref<128x512xf32, #tpu.memory_space<vmem>>, %arg3: memref<512x256xbf16, #tpu.memory_space<vmem>>, %arg4: memref<1x256xf32, #tpu.memory_space<vmem>>, %arg5: memref<512x256xbf16, #tpu.memory_space<vmem>>, %arg6: memref<1x256xf32, #tpu.memory_space<vmem>>, %arg7: memref<256x128xbf16, #tpu.memory_space<vmem>>, %arg8: memref<256x128xbf16, #tpu.memory_space<vmem>>, %arg9: memref<1x128xf32, #tpu.memory_space<vmem>>, %arg10: memref<1x128xf32, #tpu.memory_space<vmem>>, %arg11: memref<1x128xf32, #tpu.memory_space<vmem>>, %arg12: memref<128x128xbf16, #tpu.memory_space<vmem>>, %arg13: memref<1x128xf32, #tpu.memory_space<vmem>>, %arg14: memref<128x128xbf16, #tpu.memory_space<vmem>>, %arg15: memref<1x128xf32, #tpu.memory_space<vmem>>, %arg16: memref<128x128xbf16, #tpu.memory_space<vmem>>, %arg17: memref<1x128xf32, #tpu.memory_space<vmem>>, %arg18: memref<128x128xbf16, #tpu.memory_space<vmem>>, %arg19: memref<1x128xf32, #tpu.memory_space<vmem>>, %arg20: memref<128x128xbf16, #tpu.memory_space<vmem>>, %arg21: memref<1x128xf32, #tpu.memory_space<vmem>>, %arg22: memref<128x128xbf16, #tpu.memory_space<vmem>>, %arg23: memref<1x128xf32, #tpu.memory_space<vmem>>, %arg24: memref<128x128xf32, #tpu.memory_space<vmem>>, %arg25: memref<128x128xf32, #tpu.memory_space<vmem>>, %arg26: memref<128x128xf32, #tpu.memory_space<vmem>>, %arg27: memref<128x256xf32, #tpu.memory_space<vmem>>, %arg28: memref<128x256xf32, #tpu.memory_space<vmem>>) attributes {dimension_semantics = [#tpu.dimension_semantics<parallel>, #tpu.dimension_semantics<arbitrary>], iteration_bounds = array<i64: 1, 2>, scalar_prefetch = 0 : i64, scratch_operands = 2 : i64, tpu.core_type = #tpu.core_type<tc>, window_params = [{transform_indices = @transform_0, window_bounds = array<i64: 128, 512>}, {transform_indices = @transform_1, window_bounds = array<i64: 512, 256>}, {pipeline_mode = #tpu.pipeline_mode<synchronous>, transform_indices = @transform_2, window_bounds = array<i64: 1, 256>}, {transform_indices = @transform_3, window_bounds = array<i64: 512, 256>}, {pipeline_mode = #tpu.pipeline_mode<synchronous>, transform_indices = @transform_4, window_bounds = array<i64: 1, 256>}, {pipeline_mode = #tpu.pipeline_mode<synchronous>, transform_indices = @transform_5, window_bounds = array<i64: 256, 128>}, {pipeline_mode = #tpu.pipeline_mode<synchronous>, transform_indices = @transform_6, window_bounds = array<i64: 256, 128>}, {pipeline_mode = #tpu.pipeline_mode<synchronous>, transform_indices = @transform_7, window_bounds = array<i64: 1, 128>}, {pipeline_mode = #tpu.pipeline_mode<synchronous>, transform_indices = @transform_8, window_bounds = array<i64: 1, 128>}, {pipeline_mode = #tpu.pipeline_mode<synchronous>, transform_indices = @transform_9, window_bounds = array<i64: 1, 128>}, {pipeline_mode = #tpu.pipeline_mode<synchronous>, transform_indices = @transform_10, window_bounds = array<i64: 128, 128>}, {pipeline_mode = #tpu.pipeline_mode<synchronous>, transform_indices = @transform_11, window_bounds = array<i64: 1, 128>}, {pipeline_mode = #tpu.pipeline_mode<synchronous>, transform_indices = @transform_12, window_bounds = array<i64: 128, 128>}, {pipeline_mode = #tpu.pipeline_mode<synchronous>, transform_indices = @transform_13, window_bounds = array<i64: 1, 128>}, {pipeline_mode = #tpu.pipeline_mode<synchronous>, transform_indices = @transform_14, window_bounds = array<i64: 128, 128>}, {pipeline_mode = #tpu.pipeline_mode<synchronous>, transform_indices = @transform_15, window_bounds = array<i64: 1, 128>}, {pipeline_mode = #tpu.pipeline_mode<synchronous>, transform_indices = @transform_16, window_bounds = array<i64: 128, 128>}, {pipeline_mode = #tpu.pipeline_mode<synchronous>, transform_indices = @transform_17, window_bounds = array<i64: 1, 128>}, {pipeline_mode = #tpu.pipeline_mode<synchronous>, transform_indices = @transform_18, window_bounds = array<i64: 128, 128>}, {pipeline_mode = #tpu.pipeline_mode<synchronous>, transform_indices = @transform_19, window_bounds = array<i64: 1, 128>}, {pipeline_mode = #tpu.pipeline_mode<synchronous>, transform_indices = @transform_20, window_bounds = array<i64: 128, 128>}, {pipeline_mode = #tpu.pipeline_mode<synchronous>, transform_indices = @transform_21, window_bounds = array<i64: 1, 128>}, {transform_indices = @transform_22, window_bounds = array<i64: 128, 128>}, {transform_indices = @transform_23, window_bounds = array<i64: 128, 128>}, {transform_indices = @transform_24, window_bounds = array<i64: 128, 128>}]} {
    %c0_i32 = arith.constant 0 : i32
    %0 = arith.cmpi eq, %arg1, %c0_i32 : i32
    %1 = arith.extui %0 : i1 to i32
    %c0_i32_0 = arith.constant 0 : i32
    %2 = arith.cmpi ne, %1, %c0_i32_0 : i32
    scf.if %2 {
      %cst_16 = arith.constant 0.000000e+00 : f32
      %18 = vector.broadcast %cst_16 : f32 to vector<128x256xf32>
      %c0_17 = arith.constant 0 : index
      %c0_18 = arith.constant 0 : index
      %19 = vector.load %arg27[%c0_17, %c0_18] : memref<128x256xf32, #tpu.memory_space<vmem>>, vector<128x256xf32>
      tpu.vector_store %arg27[%c0_17, %c0_18], %18 {strides = array<i32>} : memref<128x256xf32, #tpu.memory_space<vmem>>, vector<128x256xf32>,
      %cst_19 = arith.constant 0.000000e+00 : f32
      %20 = vector.broadcast %cst_19 : f32 to vector<128x256xf32>
      %c0_20 = arith.constant 0 : index
      %c0_21 = arith.constant 0 : index
      %21 = vector.load %arg28[%c0_20, %c0_21] : memref<128x256xf32, #tpu.memory_space<vmem>>, vector<128x256xf32>
      tpu.vector_store %arg28[%c0_20, %c0_21], %20 {strides = array<i32>} : memref<128x256xf32, #tpu.memory_space<vmem>>, vector<128x256xf32>,
    } else {
    }
    %c0 = arith.constant 0 : index
    %c0_1 = arith.constant 0 : index
    %3 = vector.load %arg2[%c0, %c0_1] : memref<128x512xf32, #tpu.memory_space<vmem>>, vector<128x512xf32>
    %4 = arith.truncf %3 : vector<128x512xf32> to vector<128x512xbf16>
    %c0_2 = arith.constant 0 : index
    %c0_3 = arith.constant 0 : index
    %5 = vector.load %arg27[%c0_2, %c0_3] : memref<128x256xf32, #tpu.memory_space<vmem>>, vector<128x256xf32>
    %c0_4 = arith.constant 0 : index
    %c0_5 = arith.constant 0 : index
    %6 = vector.load %arg3[%c0_4, %c0_5] : memref<512x256xbf16, #tpu.memory_space<vmem>>, vector<512x256xbf16>
    %cst = arith.constant dense<0.000000e+00> : vector<128x256xf32>
    %7 = tpu.matmul %4, %6, %cst {dimension_numbers = #tpu.dot_dimension_numbers<[1], [0], [0], [1], [0, 0, 1, 1], [], []>} : vector<128x512xbf16>, vector<512x256xbf16>, vector<128x256xf32> -> vector<128x256xf32>
    %8 = arith.addf %5, %7 : vector<128x256xf32>
    %c0_6 = arith.constant 0 : index
    %c0_7 = arith.constant 0 : index
    %9 = vector.load %arg27[%c0_6, %c0_7] : memref<128x256xf32, #tpu.memory_space<vmem>>, vector<128x256xf32>
    tpu.vector_store %arg27[%c0_6, %c0_7], %8 {strides = array<i32>} : memref<128x256xf32, #tpu.memory_space<vmem>>, vector<128x256xf32>,
    %c0_8 = arith.constant 0 : index
    %c0_9 = arith.constant 0 : index
    %10 = vector.load %arg28[%c0_8, %c0_9] : memref<128x256xf32, #tpu.memory_space<vmem>>, vector<128x256xf32>
    %c0_10 = arith.constant 0 : index
    %c0_11 = arith.constant 0 : index
    %11 = vector.load %arg5[%c0_10, %c0_11] : memref<512x256xbf16, #tpu.memory_space<vmem>>, vector<512x256xbf16>
    %cst_12 = arith.constant dense<0.000000e+00> : vector<128x256xf32>
    %12 = tpu.matmul %4, %11, %cst_12 {dimension_numbers = #tpu.dot_dimension_numbers<[1], [0], [0], [1], [0, 0, 1, 1], [], []>} : vector<128x512xbf16>, vector<512x256xbf16>, vector<128x256xf32> -> vector<128x256xf32>
    %13 = arith.addf %10, %12 : vector<128x256xf32>
    %c0_13 = arith.constant 0 : index
    %c0_14 = arith.constant 0 : index
    %14 = vector.load %arg28[%c0_13, %c0_14] : memref<128x256xf32, #tpu.memory_space<vmem>>, vector<128x256xf32>
    tpu.vector_store %arg28[%c0_13, %c0_14], %13 {strides = array<i32>} : memref<128x256xf32, #tpu.memory_space<vmem>>, vector<128x256xf32>,
    %c1_i32 = arith.constant 1 : i32
    %15 = arith.cmpi eq, %arg1, %c1_i32 : i32
    %16 = arith.extui %15 : i1 to i32
    %c0_i32_15 = arith.constant 0 : i32
    %17 = arith.cmpi ne, %16, %c0_i32_15 : i32
    scf.if %17 {
      %c0_16 = arith.constant 0 : index
      %c0_17 = arith.constant 0 : index
      %18 = vector.load %arg27[%c0_16, %c0_17] : memref<128x256xf32, #tpu.memory_space<vmem>>, vector<128x256xf32>
      %c0_18 = arith.constant 0 : index
      %c0_19 = arith.constant 0 : index
      %19 = vector.load %arg4[%c0_18, %c0_19] : memref<1x256xf32, #tpu.memory_space<vmem>>, vector<1x256xf32>
      %20 = vector.broadcast %19 : vector<1x256xf32> to vector<128x256xf32>
      %21 = arith.addf %18, %20 : vector<128x256xf32>
      %c0_20 = arith.constant 0 : index
      %c0_21 = arith.constant 0 : index
      %22 = vector.load %arg28[%c0_20, %c0_21] : memref<128x256xf32, #tpu.memory_space<vmem>>, vector<128x256xf32>
      %c0_22 = arith.constant 0 : index
      %c0_23 = arith.constant 0 : index
      %23 = vector.load %arg6[%c0_22, %c0_23] : memref<1x256xf32, #tpu.memory_space<vmem>>, vector<1x256xf32>
      %24 = vector.broadcast %23 : vector<1x256xf32> to vector<128x256xf32>
      %25 = arith.addf %22, %24 : vector<128x256xf32>
      %26 = arith.truncf %21 : vector<128x256xf32> to vector<128x256xbf16>
      %c0_24 = arith.constant 0 : index
      %c0_25 = arith.constant 0 : index
      %27 = vector.load %arg7[%c0_24, %c0_25] : memref<256x128xbf16, #tpu.memory_space<vmem>>, vector<256x128xbf16>
      %cst_26 = arith.constant dense<0.000000e+00> : vector<128x128xf32>
      %28 = tpu.matmul %26, %27, %cst_26 {dimension_numbers = #tpu.dot_dimension_numbers<[1], [0], [0], [1], [0, 0, 1, 1], [], []>} : vector<128x256xbf16>, vector<256x128xbf16>, vector<128x128xf32> -> vector<128x128xf32>
      %29 = arith.truncf %25 : vector<128x256xf32> to vector<128x256xbf16>
      %c0_27 = arith.constant 0 : index
      %c0_28 = arith.constant 0 : index
      %30 = vector.load %arg8[%c0_27, %c0_28] : memref<256x128xbf16, #tpu.memory_space<vmem>>, vector<256x128xbf16>
      %cst_29 = arith.constant dense<0.000000e+00> : vector<128x128xf32>
      %31 = tpu.matmul %29, %30, %cst_29 {dimension_numbers = #tpu.dot_dimension_numbers<[1], [0], [0], [1], [0, 0, 1, 1], [], []>} : vector<128x256xbf16>, vector<256x128xbf16>, vector<128x128xf32> -> vector<128x128xf32>
      %32 = arith.addf %28, %31 : vector<128x128xf32>
      %c0_30 = arith.constant 0 : index
      %c0_31 = arith.constant 0 : index
      %33 = vector.load %arg9[%c0_30, %c0_31] : memref<1x128xf32, #tpu.memory_space<vmem>>, vector<1x128xf32>
      %34 = vector.broadcast %33 : vector<1x128xf32> to vector<128x128xf32>
      %35 = arith.addf %32, %34 : vector<128x128xf32>
      %cst_32 = arith.constant 0.000000e+00 : f32
      %36 = vector.broadcast %cst_32 : f32 to vector<128x128xf32>
      %37 = arith.maximumf %35, %36 : vector<128x128xf32>
      %c0_33 = arith.constant 0 : index
      %c0_34 = arith.constant 0 : index
      %38 = vector.load %arg10[%c0_33, %c0_34] : memref<1x128xf32, #tpu.memory_space<vmem>>, vector<1x128xf32>
      %39 = vector.broadcast %38 : vector<1x128xf32> to vector<128x128xf32>
      %40 = arith.mulf %37, %39 : vector<128x128xf32>
      %c0_35 = arith.constant 0 : index
      %c0_36 = arith.constant 0 : index
      %41 = vector.load %arg11[%c0_35, %c0_36] : memref<1x128xf32, #tpu.memory_space<vmem>>, vector<1x128xf32>
      %42 = vector.broadcast %41 : vector<1x128xf32> to vector<128x128xf32>
      %43 = arith.addf %40, %42 : vector<128x128xf32>
      %44 = arith.truncf %43 : vector<128x128xf32> to vector<128x128xbf16>
      %c0_37 = arith.constant 0 : index
      %c0_38 = arith.constant 0 : index
      %45 = vector.load %arg12[%c0_37, %c0_38] : memref<128x128xbf16, #tpu.memory_space<vmem>>, vector<128x128xbf16>
      %cst_39 = arith.constant dense<0.000000e+00> : vector<128x128xf32>
      %46 = tpu.matmul %44, %45, %cst_39 {dimension_numbers = #tpu.dot_dimension_numbers<[1], [0], [0], [1], [0, 0, 1, 1], [], []>} : vector<128x128xbf16>, vector<128x128xbf16>, vector<128x128xf32> -> vector<128x128xf32>
      %c0_40 = arith.constant 0 : index
      %c0_41 = arith.constant 0 : index
      %47 = vector.load %arg13[%c0_40, %c0_41] : memref<1x128xf32, #tpu.memory_space<vmem>>, vector<1x128xf32>
      %48 = vector.broadcast %47 : vector<1x128xf32> to vector<128x128xf32>
      %49 = arith.addf %46, %48 : vector<128x128xf32>
      %cst_42 = arith.constant 0.000000e+00 : f32
      %50 = vector.broadcast %cst_42 : f32 to vector<128x128xf32>
      %51 = arith.maximumf %49, %50 : vector<128x128xf32>
      %52 = arith.truncf %51 : vector<128x128xf32> to vector<128x128xbf16>
      %c0_43 = arith.constant 0 : index
      %c0_44 = arith.constant 0 : index
      %53 = vector.load %arg14[%c0_43, %c0_44] : memref<128x128xbf16, #tpu.memory_space<vmem>>, vector<128x128xbf16>
      %cst_45 = arith.constant dense<0.000000e+00> : vector<128x128xf32>
      %54 = tpu.matmul %52, %53, %cst_45 {dimension_numbers = #tpu.dot_dimension_numbers<[1], [0], [0], [1], [0, 0, 1, 1], [], []>} : vector<128x128xbf16>, vector<128x128xbf16>, vector<128x128xf32> -> vector<128x128xf32>
      %c0_46 = arith.constant 0 : index
      %c0_47 = arith.constant 0 : index
      %55 = vector.load %arg15[%c0_46, %c0_47] : memref<1x128xf32, #tpu.memory_space<vmem>>, vector<1x128xf32>
      %56 = vector.broadcast %55 : vector<1x128xf32> to vector<128x128xf32>
      %57 = arith.addf %54, %56 : vector<128x128xf32>
      %cst_48 = arith.constant dense<0xFF800000> : vector<128xf32>
      %58 = vector.multi_reduction <maximumf>, %57, %cst_48 [1] : vector<128x128xf32> to vector<128xf32>
      %59 = vector.shape_cast %58 : vector<128xf32> to vector<128x1xf32>
      %60 = vector.broadcast %59 : vector<128x1xf32> to vector<128x128xf32>
      %61 = arith.subf %57, %60 : vector<128x128xf32>
      %62 = math.exp %61 : vector<128x128xf32>
      %cst_49 = arith.constant dense<0.000000e+00> : vector<128xf32>
      %63 = vector.multi_reduction <add>, %62, %cst_49 [1] : vector<128x128xf32> to vector<128xf32>
      %64 = vector.shape_cast %63 : vector<128xf32> to vector<128x1xf32>
      %65 = vector.broadcast %64 : vector<128x1xf32> to vector<128x128xf32>
      %66 = arith.divf %62, %65 : vector<128x128xf32>
      %c0_50 = arith.constant 0 : index
      %c0_51 = arith.constant 0 : index
      %67 = vector.load %arg24[%c0_50, %c0_51] : memref<128x128xf32, #tpu.memory_space<vmem>>, vector<128x128xf32>
      tpu.vector_store %arg24[%c0_50, %c0_51], %66 {strides = array<i32>} : memref<128x128xf32, #tpu.memory_space<vmem>>, vector<128x128xf32>,
      %c0_52 = arith.constant 0 : index
      %c0_53 = arith.constant 0 : index
      %68 = vector.load %arg16[%c0_52, %c0_53] : memref<128x128xbf16, #tpu.memory_space<vmem>>, vector<128x128xbf16>
      %cst_54 = arith.constant dense<0.000000e+00> : vector<128x128xf32>
      %69 = tpu.matmul %44, %68, %cst_54 {dimension_numbers = #tpu.dot_dimension_numbers<[1], [0], [0], [1], [0, 0, 1, 1], [], []>} : vector<128x128xbf16>, vector<128x128xbf16>, vector<128x128xf32> -> vector<128x128xf32>
      %c0_55 = arith.constant 0 : index
      %c0_56 = arith.constant 0 : index
      %70 = vector.load %arg17[%c0_55, %c0_56] : memref<1x128xf32, #tpu.memory_space<vmem>>, vector<1x128xf32>
      %71 = vector.broadcast %70 : vector<1x128xf32> to vector<128x128xf32>
      %72 = arith.addf %69, %71 : vector<128x128xf32>
      %cst_57 = arith.constant 0.000000e+00 : f32
      %73 = vector.broadcast %cst_57 : f32 to vector<128x128xf32>
      %74 = arith.maximumf %72, %73 : vector<128x128xf32>
      %75 = arith.truncf %74 : vector<128x128xf32> to vector<128x128xbf16>
      %c0_58 = arith.constant 0 : index
      %c0_59 = arith.constant 0 : index
      %76 = vector.load %arg18[%c0_58, %c0_59] : memref<128x128xbf16, #tpu.memory_space<vmem>>, vector<128x128xbf16>
      %cst_60 = arith.constant dense<0.000000e+00> : vector<128x128xf32>
      %77 = tpu.matmul %75, %76, %cst_60 {dimension_numbers = #tpu.dot_dimension_numbers<[1], [0], [0], [1], [0, 0, 1, 1], [], []>} : vector<128x128xbf16>, vector<128x128xbf16>, vector<128x128xf32> -> vector<128x128xf32>
      %c0_61 = arith.constant 0 : index
      %c0_62 = arith.constant 0 : index
      %78 = vector.load %arg19[%c0_61, %c0_62] : memref<1x128xf32, #tpu.memory_space<vmem>>, vector<1x128xf32>
      %79 = vector.broadcast %78 : vector<1x128xf32> to vector<128x128xf32>
      %80 = arith.addf %77, %79 : vector<128x128xf32>
      %cst_63 = arith.constant dense<0xFF800000> : vector<128xf32>
      %81 = vector.multi_reduction <maximumf>, %80, %cst_63 [1] : vector<128x128xf32> to vector<128xf32>
      %82 = vector.shape_cast %81 : vector<128xf32> to vector<128x1xf32>
      %83 = vector.broadcast %82 : vector<128x1xf32> to vector<128x128xf32>
      %84 = arith.subf %80, %83 : vector<128x128xf32>
      %85 = math.exp %84 : vector<128x128xf32>
      %cst_64 = arith.constant dense<0.000000e+00> : vector<128xf32>
      %86 = vector.multi_reduction <add>, %85, %cst_64 [1] : vector<128x128xf32> to vector<128xf32>
      %87 = vector.shape_cast %86 : vector<128xf32> to vector<128x1xf32>
      %88 = vector.broadcast %87 : vector<128x1xf32> to vector<128x128xf32>
      %89 = arith.divf %85, %88 : vector<128x128xf32>
      %c0_65 = arith.constant 0 : index
      %c0_66 = arith.constant 0 : index
      %90 = vector.load %arg25[%c0_65, %c0_66] : memref<128x128xf32, #tpu.memory_space<vmem>>, vector<128x128xf32>
      tpu.vector_store %arg25[%c0_65, %c0_66], %89 {strides = array<i32>} : memref<128x128xf32, #tpu.memory_space<vmem>>, vector<128x128xf32>,
      %c0_67 = arith.constant 0 : index
      %c0_68 = arith.constant 0 : index
      %91 = vector.load %arg20[%c0_67, %c0_68] : memref<128x128xbf16, #tpu.memory_space<vmem>>, vector<128x128xbf16>
      %cst_69 = arith.constant dense<0.000000e+00> : vector<128x128xf32>
      %92 = tpu.matmul %44, %91, %cst_69 {dimension_numbers = #tpu.dot_dimension_numbers<[1], [0], [0], [1], [0, 0, 1, 1], [], []>} : vector<128x128xbf16>, vector<128x128xbf16>, vector<128x128xf32> -> vector<128x128xf32>
      %c0_70 = arith.constant 0 : index
      %c0_71 = arith.constant 0 : index
      %93 = vector.load %arg21[%c0_70, %c0_71] : memref<1x128xf32, #tpu.memory_space<vmem>>, vector<1x128xf32>
      %94 = vector.broadcast %93 : vector<1x128xf32> to vector<128x128xf32>
      %95 = arith.addf %92, %94 : vector<128x128xf32>
      %cst_72 = arith.constant 0.000000e+00 : f32
      %96 = vector.broadcast %cst_72 : f32 to vector<128x128xf32>
      %97 = arith.maximumf %95, %96 : vector<128x128xf32>
      %98 = arith.truncf %97 : vector<128x128xf32> to vector<128x128xbf16>
      %c0_73 = arith.constant 0 : index
      %c0_74 = arith.constant 0 : index
      %99 = vector.load %arg22[%c0_73, %c0_74] : memref<128x128xbf16, #tpu.memory_space<vmem>>, vector<128x128xbf16>
      %cst_75 = arith.constant dense<0.000000e+00> : vector<128x128xf32>
      %100 = tpu.matmul %98, %99, %cst_75 {dimension_numbers = #tpu.dot_dimension_numbers<[1], [0], [0], [1], [0, 0, 1, 1], [], []>} : vector<128x128xbf16>, vector<128x128xbf16>, vector<128x128xf32> -> vector<128x128xf32>
      %c0_76 = arith.constant 0 : index
      %c0_77 = arith.constant 0 : index
      %101 = vector.load %arg23[%c0_76, %c0_77] : memref<1x128xf32, #tpu.memory_space<vmem>>, vector<1x128xf32>
      %102 = vector.broadcast %101 : vector<1x128xf32> to vector<128x128xf32>
      %103 = arith.addf %100, %102 : vector<128x128xf32>
      %cst_78 = arith.constant dense<0xFF800000> : vector<128xf32>
      %104 = vector.multi_reduction <maximumf>, %103, %cst_78 [1] : vector<128x128xf32> to vector<128xf32>
      %105 = vector.shape_cast %104 : vector<128xf32> to vector<128x1xf32>
      %106 = vector.broadcast %105 : vector<128x1xf32> to vector<128x128xf32>
      %107 = arith.subf %103, %106 : vector<128x128xf32>
      %108 = math.exp %107 : vector<128x128xf32>
      %cst_79 = arith.constant dense<0.000000e+00> : vector<128xf32>
      %109 = vector.multi_reduction <add>, %108, %cst_79 [1] : vector<128x128xf32> to vector<128xf32>
      %110 = vector.shape_cast %109 : vector<128xf32> to vector<128x1xf32>
      %111 = vector.broadcast %110 : vector<128x1xf32> to vector<128x128xf32>
      %112 = arith.divf %108, %111 : vector<128x128xf32>
      %c0_80 = arith.constant 0 : index
      %c0_81 = arith.constant 0 : index
      %113 = vector.load %arg26[%c0_80, %c0_81] : memref<128x128xf32, #tpu.memory_space<vmem>>, vector<128x128xf32>
      tpu.vector_store %arg26[%c0_80, %c0_81], %112 {strides = array<i32>} : memref<128x128xf32, #tpu.memory_space<vmem>>, vector<128x128xf32>,
    } else {
    }
    return
  }
  func.func @transform_0(%arg0: i32, %arg1: i32) -> (i32, i32) {
    %c0_i32 = arith.constant 0 : i32
    return %arg0, %arg1 : i32, i32
  }
  func.func @transform_1(%arg0: i32, %arg1: i32) -> (i32, i32) {
    %c0_i32 = arith.constant 0 : i32
    %c0_i32_0 = arith.constant 0 : i32
    return %arg1, %c0_i32 : i32, i32
  }
  func.func @transform_2(%arg0: i32, %arg1: i32) -> (i32, i32) {
    %c0_i32 = arith.constant 0 : i32
    %c0_i32_0 = arith.constant 0 : i32
    %c0_i32_1 = arith.constant 0 : i32
    return %c0_i32, %c0_i32_0 : i32, i32
  }
  func.func @transform_3(%arg0: i32, %arg1: i32) -> (i32, i32) {
    %c0_i32 = arith.constant 0 : i32
    %c0_i32_0 = arith.constant 0 : i32
    return %arg1, %c0_i32 : i32, i32
  }
  func.func @transform_4(%arg0: i32, %arg1: i32) -> (i32, i32) {
    %c0_i32 = arith.constant 0 : i32
    %c0_i32_0 = arith.constant 0 : i32
    %c0_i32_1 = arith.constant 0 : i32
    return %c0_i32, %c0_i32_0 : i32, i32
  }
  func.func @transform_5(%arg0: i32, %arg1: i32) -> (i32, i32) {
    %c0_i32 = arith.constant 0 : i32
    %c0_i32_0 = arith.constant 0 : i32
    %c0_i32_1 = arith.constant 0 : i32
    return %c0_i32, %c0_i32_0 : i32, i32
  }
  func.func @transform_6(%arg0: i32, %arg1: i32) -> (i32, i32) {
    %c0_i32 = arith.constant 0 : i32
    %c0_i32_0 = arith.constant 0 : i32
    %c0_i32_1 = arith.constant 0 : i32
    return %c0_i32, %c0_i32_0 : i32, i32
  }
  func.func @transform_7(%arg0: i32, %arg1: i32) -> (i32, i32) {
    %c0_i32 = arith.constant 0 : i32
    %c0_i32_0 = arith.constant 0 : i32
    %c0_i32_1 = arith.constant 0 : i32
    return %c0_i32, %c0_i32_0 : i32, i32
  }
  func.func @transform_8(%arg0: i32, %arg1: i32) -> (i32, i32) {
    %c0_i32 = arith.constant 0 : i32
    %c0_i32_0 = arith.constant 0 : i32
    %c0_i32_1 = arith.constant 0 : i32
    return %c0_i32, %c0_i32_0 : i32, i32
  }
  func.func @transform_9(%arg0: i32, %arg1: i32) -> (i32, i32) {
    %c0_i32 = arith.constant 0 : i32
    %c0_i32_0 = arith.constant 0 : i32
    %c0_i32_1 = arith.constant 0 : i32
    return %c0_i32, %c0_i32_0 : i32, i32
  }
  func.func @transform_10(%arg0: i32, %arg1: i32) -> (i32, i32) {
    %c0_i32 = arith.constant 0 : i32
    %c0_i32_0 = arith.constant 0 : i32
    %c0_i32_1 = arith.constant 0 : i32
    return %c0_i32, %c0_i32_0 : i32, i32
  }
  func.func @transform_11(%arg0: i32, %arg1: i32) -> (i32, i32) {
    %c0_i32 = arith.constant 0 : i32
    %c0_i32_0 = arith.constant 0 : i32
    %c0_i32_1 = arith.constant 0 : i32
    return %c0_i32, %c0_i32_0 : i32, i32
  }
  func.func @transform_12(%arg0: i32, %arg1: i32) -> (i32, i32) {
    %c0_i32 = arith.constant 0 : i32
    %c0_i32_0 = arith.constant 0 : i32
    %c0_i32_1 = arith.constant 0 : i32
    return %c0_i32, %c0_i32_0 : i32, i32
  }
  func.func @transform_13(%arg0: i32, %arg1: i32) -> (i32, i32) {
    %c0_i32 = arith.constant 0 : i32
    %c0_i32_0 = arith.constant 0 : i32
    %c0_i32_1 = arith.constant 0 : i32
    return %c0_i32, %c0_i32_0 : i32, i32
  }
  func.func @transform_14(%arg0: i32, %arg1: i32) -> (i32, i32) {
    %c0_i32 = arith.constant 0 : i32
    %c0_i32_0 = arith.constant 0 : i32
    %c0_i32_1 = arith.constant 0 : i32
    return %c0_i32, %c0_i32_0 : i32, i32
  }
  func.func @transform_15(%arg0: i32, %arg1: i32) -> (i32, i32) {
    %c0_i32 = arith.constant 0 : i32
    %c0_i32_0 = arith.constant 0 : i32
    %c0_i32_1 = arith.constant 0 : i32
    return %c0_i32, %c0_i32_0 : i32, i32
  }
  func.func @transform_16(%arg0: i32, %arg1: i32) -> (i32, i32) {
    %c0_i32 = arith.constant 0 : i32
    %c0_i32_0 = arith.constant 0 : i32
    %c0_i32_1 = arith.constant 0 : i32
    return %c0_i32, %c0_i32_0 : i32, i32
  }
  func.func @transform_17(%arg0: i32, %arg1: i32) -> (i32, i32) {
    %c0_i32 = arith.constant 0 : i32
    %c0_i32_0 = arith.constant 0 : i32
    %c0_i32_1 = arith.constant 0 : i32
    return %c0_i32, %c0_i32_0 : i32, i32
  }
  func.func @transform_18(%arg0: i32, %arg1: i32) -> (i32, i32) {
    %c0_i32 = arith.constant 0 : i32
    %c0_i32_0 = arith.constant 0 : i32
    %c0_i32_1 = arith.constant 0 : i32
    return %c0_i32, %c0_i32_0 : i32, i32
  }
  func.func @transform_19(%arg0: i32, %arg1: i32) -> (i32, i32) {
    %c0_i32 = arith.constant 0 : i32
    %c0_i32_0 = arith.constant 0 : i32
    %c0_i32_1 = arith.constant 0 : i32
    return %c0_i32, %c0_i32_0 : i32, i32
  }
  func.func @transform_20(%arg0: i32, %arg1: i32) -> (i32, i32) {
    %c0_i32 = arith.constant 0 : i32
    %c0_i32_0 = arith.constant 0 : i32
    %c0_i32_1 = arith.constant 0 : i32
    return %c0_i32, %c0_i32_0 : i32, i32
  }
  func.func @transform_21(%arg0: i32, %arg1: i32) -> (i32, i32) {
    %c0_i32 = arith.constant 0 : i32
    %c0_i32_0 = arith.constant 0 : i32
    %c0_i32_1 = arith.constant 0 : i32
    return %c0_i32, %c0_i32_0 : i32, i32
  }
  func.func @transform_22(%arg0: i32, %arg1: i32) -> (i32, i32) {
    %c0_i32 = arith.constant 0 : i32
    %c0_i32_0 = arith.constant 0 : i32
    return %arg0, %c0_i32 : i32, i32
  }
  func.func @transform_23(%arg0: i32, %arg1: i32) -> (i32, i32) {
    %c0_i32 = arith.constant 0 : i32
    %c0_i32_0 = arith.constant 0 : i32
    return %arg0, %c0_i32 : i32, i32
  }
  func.func @transform_24(%arg0: i32, %arg1: i32) -> (i32, i32) {
    %c0_i32 = arith.constant 0 : i32
    %c0_i32_0 = arith.constant 0 : i32
    return %arg0, %c0_i32 : i32, i32
  }
}

</mosaic_0001>

<bundles_post_ra>
// kernel: tpu_custom_call.1
= control target key start
LH: loop header
LB: loop body
LE: loop exit
PB: predicated region body
PF: predicated region fallthrough
CT: control target
= control target key end

     0   :  { %s9881_s0 = inlined_call_operand.hbm [shape: f32[128,1024], index: 0, kind: input, shape index: {}]   ;;  %s9882_s1 = inlined_call_operand.hbm [shape: bf16[1024,256], index: 1, kind: input, shape index: {}]   ;;  %s9883_s2 = inlined_call_operand.hbm [shape: f32[1,256], index: 2, kind: input, shape index: {}]   ;;  %s9884_s3 = inlined_call_operand.hbm [shape: bf16[1024,256], index: 3, kind: input, shape index: {}]   ;;  %s9885_s4 = inlined_call_operand.vmem [shape: f32[1,256], index: 4, kind: input, shape index: {}]   ;;  %s9886_s5 = inlined_call_operand.hbm [shape: bf16[256,128], index: 5, kind: input, shape index: {}]   ;;  %s9887_s6 = inlined_call_operand.hbm [shape: bf16[256,128], index: 6, kind: input, shape index: {}]   ;;  %s9888_s7 = inlined_call_operand.vmem [shape: f32[1,128], index: 7, kind: input, shape index: {}]   ;;  %s9889_s8 = inlined_call_operand.vmem [shape: f32[1,128], index: 8, kind: input, shape index: {}]   ;;  %s9890_s9 = inlined_call_operand.vmem [shape: f32[1,128], index: 9, kind: input, shape index: {}]   ;;  %s9891_s10 = inlined_call_operand.hbm [shape: bf16[128,128], index: 10, kind: input, shape index: {}]   ;;  %s9892_s11 = inlined_call_operand.vmem [shape: f32[1,128], index: 11, kind: input, shape index: {}]   ;;  %s9893_s12 = inlined_call_operand.hbm [shape: bf16[128,128], index: 12, kind: input, shape index: {}]   ;;  %s9894_s13 = inlined_call_operand.vmem [shape: f32[1,128], index: 13, kind: input, shape index: {}]   ;;  %s9895_s14 = inlined_call_operand.hbm [shape: bf16[128,128], index: 14, kind: input, shape index: {}]   ;;  %s9896_s15 = inlined_call_operand.vmem [shape: f32[1,128], index: 15, kind: input, shape index: {}]   ;;  %s9897_s16 = inlined_call_operand.hbm [shape: bf16[128,128], index: 16, kind: input, shape index: {}]   ;;  %s9898_s17 = inlined_call_operand.vmem [shape: f32[1,128], index: 17, kind: input, shape index: {}]   ;;  %s9899_s18 = inlined_call_operand.hbm [shape: bf16[128,128], index: 18, kind: input, shape index: {}]   ;;  %s9900_s19 = inlined_call_operand.vmem [shape: f32[1,128], index: 19, kind: input, shape index: {}]   ;;  %s9901_s20 = inlined_call_operand.hbm [shape: bf16[128,128], index: 20, kind: input, shape index: {}]   ;;  %s9902_s21 = inlined_call_operand.vmem [shape: f32[1,128], index: 21, kind: input, shape index: {}]   ;;  %s9903_s22 = inlined_call_operand.hbm [shape: f32[128,128], index: 22, kind: output, shape index: {0}]   ;;  %s9904_s23 = inlined_call_operand.hbm [shape: f32[128,128], index: 23, kind: output, shape index: {1}]   ;;  %s9905_s24 = inlined_call_operand.hbm [shape: f32[128,128], index: 24, kind: output, shape index: {2}]  }
   0x1   :  { %9914 = sst [smem:[#allocation48_spill]] %s9881_s0 }
   0x2   :  { %9915 = sst [smem:[#allocation49_spill]] %s9882_s1 }
   0x3   :  { %9916 = sst [smem:[#allocation50_spill]] %s9883_s2 }
   0x4   :  { %9917 = sst [smem:[#allocation51_spill]] %s9884_s3 }
   0x5   :  { %9918 = sst [smem:[#allocation52_spill]] %s9885_s4 }
   0x6   :  { %9919 = sst [smem:[#allocation53_spill]] %s9886_s5 }
   0x7   :  { %9920 = sst [smem:[#allocation54_spill]] %s9887_s6 }
   0x8   :  { %9921 = sst [smem:[#allocation55_spill]] %s9888_s7 }
   0x9   :  { %9922 = sst [smem:[#allocation56_spill]] %s9889_s8 }
   0xa   :  { %9923 = sst [smem:[#allocation57_spill]] %s9891_s10 }
   0xb   :  { %9924 = sst [smem:[#allocation58_spill]] %s9893_s12 }
   0xc   :  { %9925 = sst [smem:[#allocation59_spill]] %s9894_s13 }
   0xd   :  { %9926 = sst [smem:[#allocation60_spill]] %s9895_s14 }
   0xe   :  { %9927 = sst [smem:[#allocation61_spill]] %s9896_s15 }
   0xf   :  { %9928 = sst [smem:[#allocation62_spill]] %s9897_s16 }
  0x10   :  { %9929 = sst [smem:[#allocation63_spill]] %s9898_s17 }
  0x11   :  { %9930 = sst [smem:[#allocation64_spill]] %s9899_s18 }
  0x12   :  { %9931 = sst [smem:[#allocation65_spill]] %s9900_s19 }
  0x13   :  { %9932 = sst [smem:[#allocation66_spill]] %s9901_s20 }
  0x14   :  { %9933 = sst [smem:[#allocation67_spill]] %s9902_s21 }
  0x15   :  { %9934 = sst [smem:[#allocation68_spill]] %s9903_s22 }
  0x16   :  { %9935 = sst [smem:[#allocation69_spill]] %s9904_s23 }
  0x17   :  { %9936 = sst [smem:[#allocation70_spill]] %s9905_s24 }
  0x18   :  { %30 = vsyncpa [#allocation5], 0 }
  0x19   :  { %32 = vsyncpa [#allocation5 + $0x1], 0 }
  0x1a   :  { %33 = vsyncpa [#allocation8], 0 }
  0x1b   :  { %35 = vsyncpa [#allocation8 + $0x1], 0 }
  0x1c   :  { %36 = vsyncpa [#allocation11], 0 }
  0x1d   :  { %38 = vsyncpa [#allocation11 + $0x1], 0 }
  0x1e   :  { %39 = vsyncpa [#allocation14], 0 }
  0x1f   :  { %40 = vsyncpa [#allocation17], 0 }
  0x20   :  { %41 = vsyncpa [#allocation20], 0 }
  0x21   :  { %42 = vsyncpa [#allocation23], 0 }
  0x22   :  { %43 = vsyncpa [#allocation6], 0 }
  0x23   :  { %44 = vsyncpa [#allocation26], 0  ;;  %s7959_s5 = smov 0   ;;  %s7961_s26 = smov 0  }
  0x24   :  { %s7963_s27 = smov 0   ;;  %s7965_s28 = smov 0  }
  0x25   :  { %s7967_s6 = smov 0   ;;  %s7969_s2 = smov 0  }
  0x26 LB: > { %9937 = sst [smem:[#allocation39_spill]] %s7798_s27  ;;  %s7990_s29 = sadd.s32 4294967295, %s7810_s2   ;;  %s7810_s2 = sphi %s7969_s2, %s50_s2   ;;  %s7806_s6 = sphi %s7967_s6, %s10016_s6   ;;  %s7802_s28 = sphi %s7965_s28, %s10015_s28   ;;  %s7798_s27 = sphi %s7963_s27, %s10011_s27   ;;  %s7794_s26 = sphi %s7961_s26, %s10014_s26   ;;  %s7790_s5 = sphi %s7959_s5, %s10013_s5  }
  0x27   : > { %9938 = sst [smem:[#allocation40_spill]] %s7810_s2  ;;  %p5782_p0 = scmp.ge.s32.totalorder %s7810_s2, 1 }
  0x28   : > { %p85_p1 = scmp.eq.s32.totalorder %s7990_s29, 0  ;;  %p624_p2 = scmp.lt.s32.totalorder %s7810_s2, 3 }
  0x29   : > { %s9939_s30 = sld [smem:[#allocation50_spill]]  ;;  %s7812_s8 = smov [#allocation9]  }
  0x2a   : > { %p7998_p3 = pnand %p5782_p0, %p624_p2  ;;  %s638_s4 = sshll.u32 %s7812_s8, 4  ;;  %s639_s4 = int_to_ptr.vmem [resolvable:$true] %s638_s4 }
  0x2b   : > { %s9941_s22 = sld [smem:[#allocation53_spill]]  ;;  %s7813_s0 = smov [#allocation12]  }
  0x2c   : > { %p6942_p4 = pneg %p7998_p3  ;;  %s652_s7 = sshll.u32 %s7813_s0, 4  ;;  %s653_s7 = int_to_ptr.vmem [resolvable:$true] %s652_s7 }
  0x2d   : > { %s7815_s8 = smov 4   ;;  %s9943_s1 = sld [smem:[#allocation54_spill]] }
  0x2e   : > { %p8009_p5 = pnand %p6942_p4, %p85_p1  ;;  %s7816_s13 = smov [#allocation13]  }
  0x2f   : > { %s636_s3 = sshll.u32 %s9939_s30, 4  ;;  %s7814_s30 = smov 64   ;;  %s637_s3 = int_to_ptr.hbm [resolvable:$true] %s636_s3 }
  0x30   : > { %6945 = dma.hbm_to_vmem [thread:$0]  (!%p8009_p5), %s637_s3, 32, %s639_s4, [#allocation8]  }
  0x31   : > { %s650_s23 = sshll.u32 %s9941_s22, 4  ;;  %s666_s19 = sshll.u32 %s7816_s13, 4  ;;  %s651_s23 = int_to_ptr.hbm [resolvable:$true] %s650_s23  ;;  %s667_s19 = int_to_ptr.vmem [resolvable:$true] %s666_s19 }
  0x32   : > { %6948 = dma.hbm_to_vmem [thread:$0]  (!%p8009_p5), %s651_s23, 2048, %s653_s7, [#allocation11], %s7814_s30, %s7814_s30, %s7815_s8  }
  0x33   : > { %s664_s17 = sshll.u32 %s9943_s1, 4  ;;  %s9944_s12 = sld [smem:[#allocation58_spill]]  ;;  %s665_s17 = int_to_ptr.hbm [resolvable:$true] %s664_s17 }
  0x34   : > { %6951 = dma.hbm_to_vmem [thread:$0]  (!%p8009_p5), %s665_s17, 2048, %s667_s19, [#allocation14], %s7814_s30, %s7814_s30, %s7815_s8  }
  0x35   : > { %s7817_s23 = smov [#allocation16]   ;;  %s9945_s16 = sld [smem:[#allocation62_spill]] }
  0x36   : > { %s706_s7 = sshll.u32 %s7817_s23, 4  ;;  %s9946_s10 = sld [smem:[#allocation57_spill]]  ;;  %s707_s7 = int_to_ptr.vmem [resolvable:$true] %s706_s7 }
  0x37   : > { %s7818_s17 = smov [#allocation19]   ;;  %s7819_s15 = smov [#allocation15]  }
  0x38   : > { %s740_s19 = sshll.u32 %s7818_s17, 4  ;;  %s689_s3 = sshll.u32 %s7819_s15, 4  ;;  %s741_s19 = int_to_ptr.vmem [resolvable:$true] %s740_s19  ;;  %s690_s3 = int_to_ptr.vmem [resolvable:$true] %s689_s3 }
  0x39   : > { %s704_s4 = sshll.u32 %s9944_s12, 4  ;;  %s9947_s14 = sld [smem:[#allocation60_spill]]  ;;  %s705_s4 = int_to_ptr.hbm [resolvable:$true] %s704_s4 }
  0x3a   : > { %6957 = dma.hbm_to_vmem [thread:$0]  (!%p8009_p5), %s705_s4, 1024, %s707_s7, [#allocation17], %s7814_s30, %s7814_s30, %s7815_s8  }
  0x3b   : > { %s738_s24 = sshll.u32 %s9945_s16, 4  ;;  %s9948_s18 = sld [smem:[#allocation64_spill]]  ;;  %s739_s24 = int_to_ptr.hbm [resolvable:$true] %s738_s24 }
  0x3c   : > { %s687_s0 = sshll.u32 %s9946_s10, 4  ;;  %s9949_s20 = sld [smem:[#allocation66_spill]]  ;;  %s688_s0 = int_to_ptr.hbm [resolvable:$true] %s687_s0 }
  0x3d   : > { %6963 = dma.hbm_to_vmem [thread:$0]  (!%p8009_p5), %s739_s24, 1024, %s741_s19, [#allocation20], %s7814_s30, %s7814_s30, %s7815_s8  }
  0x3e   : > { %6954 = dma.hbm_to_vmem [thread:$0]  (!%p8009_p5), %s688_s0, 1024, %s690_s3, [#allocation14], %s7814_s30, %s7814_s30, %s7815_s8  }
  0x3f   : > { %s721_s4 = sshll.u32 %s9947_s14, 4  ;;  %s7820_s24 = smov [#allocation18]   ;;  %s722_s4 = int_to_ptr.hbm [resolvable:$true] %s721_s4 }
  0x40   : > { %s723_s17 = sshll.u32 %s7820_s24, 4  ;;  %s7821_s0 = smov [#allocation21]   ;;  %s724_s17 = int_to_ptr.vmem [resolvable:$true] %s723_s17 }
  0x41   : > { %s755_s1 = sshll.u32 %s9948_s18, 4  ;;  %s757_s19 = sshll.u32 %s7821_s0, 4  ;;  %s756_s1 = int_to_ptr.hbm [resolvable:$true] %s755_s1  ;;  %s758_s19 = int_to_ptr.vmem [resolvable:$true] %s757_s19 }
  0x42   : > { %6960 = dma.hbm_to_vmem [thread:$0]  (!%p8009_p5), %s722_s4, 1024, %s724_s17, [#allocation17], %s7814_s30, %s7814_s30, %s7815_s8  }
  0x43   : > { %s772_s23 = sshll.u32 %s9949_s20, 4  ;;  %s7822_s22 = smov [#allocation22]   ;;  %s773_s23 = int_to_ptr.hbm [resolvable:$true] %s772_s23 }
  0x44   : > { %6966 = dma.hbm_to_vmem [thread:$0]  (!%p8009_p5), %s756_s1, 1024, %s758_s19, [#allocation20], %s7814_s30, %s7814_s30, %s7815_s8  }
  0x45   : > { %s774_s4 = sshll.u32 %s7822_s22, 4  ;;  %s59_s7 = sadd.s32 1, %s7806_s6  ;;  %s775_s4 = int_to_ptr.vmem [resolvable:$true] %s774_s4 }
  0x46   : > { %6969 = dma.hbm_to_vmem [thread:$0]  (!%p8009_p5), %s773_s23, 1024, %s775_s4, [#allocation23], %s7814_s30, %s7814_s30, %s7815_s8  }
  0x47   : > { %p60_p6 = scmp.ge.s32.totalorder %s59_s7, 2  ;;  %s71_s13 = sadd.s32 1, %s7798_s27 }
  0x48   : > { %p78_p7 = scmp.ne.s32.totalorder %s7798_s27, %s7794_s26  ;;  %p79_p8 = scmp.eq.s32.totalorder %s7810_s2, 0 }
  0x49   : > { %s10018_s7 = smov (%p60_p6, %s59_s7), 0  ;;  %p84_p10 = scmp.ne.s32.totalorder %s7794_s26, %s7790_s5 }
  0x4a   : > { %9950 = sst [smem:[#allocation41_spill]] %s10018_s7  ;;  %p8083_p9 = por %p79_p8, %p78_p7 }
  0x4b   : > { %s67_s21 = ssub.s32 %s7806_s6, %s10018_s7  ;;  %p6989_p11 = scmp.lt.s32.totalorder %s7810_s2, 2 }
  0x4c   : > { %p69_p12 = scmp.eq.s32.totalorder %s67_s21, 0  ;;  %p8094_p13 = por %p85_p1, %p84_p10 }
  0x4d   : > { %s791_s8 = sand.u32 1, %s7798_s27   ;;  %s6659_s24 = sshll.u32 %s7806_s6, 5 }
  0x4e   : > { %s8101_s17 = scalar_select %p69_p12, %s7798_s27, %s71_s13  }
  0x4f   : > { %s8103_s0 = sshll.u32 %s791_s8, 9  ;;  %s9954_s3 = sld [smem:[#allocation48_spill]] }
  0x50   : > { %9953 = sst [smem:[#allocation42_spill]] %s8101_s17  ;;  %s795_s22 = scalar_lea.vmem [#allocation4], %s8103_s0 }
  0x51   : > { %s806_s4 = sshll.u32 %s795_s22, 4  ;;  %p8113_p0 = pnand %p6989_p11, %p8083_p9  ;;  %s807_s4 = int_to_ptr.vmem [resolvable:$true] %s806_s4 }
  0x52   : > { %s816_s13 = sand.u32 1, %s7810_s2   ;;  %s792_s10 = scalar_lea.sflag [#allocation5], %s791_s8 }
  0x53   : > { %s7823_s12 = smov 1024   ;;  %s7824_s19 = smov 512  }
  0x54   : > { %s7825_s15 = smov 32   ;;  %s9956_s14 = sld [smem:[#allocation49_spill]] }
  0x55   : > { %s803_s5 = scalar_lea.hbm %s9954_s3, %s6659_s24  ;;  %s6661_s24 = sshll.u32 %s7806_s6, 9 }
  0x56   : > { %s804_s23 = sshll.u32 %s803_s5, 4  ;;  %s820_s3 = scalar_lea.vmem [#allocation7], %s8103_s0  ;;  %s805_s23 = int_to_ptr.hbm [resolvable:$true] %s804_s23 }
  0x57   : > { %6973 = dma.hbm_to_vmem [thread:$0]  (!%p8113_p0), %s805_s23, 8192, %s807_s4, %s792_s10, %s7823_s12, %s7824_s19, %s7825_s15  }
  0x58   : > { %s829_s5 = sshll.u32 %s820_s3, 4  ;;  %s817_s20 = scalar_lea.sflag [#allocation8], %s816_s13  ;;  %s830_s5 = int_to_ptr.vmem [resolvable:$true] %s829_s5 }
  0x59   : > { %s7826_s7 = smov 128   ;;  %s7827_s8 = smov 8  }
  0x5a   : > { %s826_s16 = scalar_lea.hbm %s9956_s14, %s6661_s24  ;;  %s9957_s2 = sld [smem:[#allocation51_spill]] }
  0x5b   : > { %s827_s18 = sshll.u32 %s826_s16, 4  ;;  %s843_s12 = scalar_lea.vmem [#allocation10], %s8103_s0  ;;  %s828_s18 = int_to_ptr.hbm [resolvable:$true] %s827_s18 }
  0x5c   : > { %6976 = dma.hbm_to_vmem [thread:$0]  (!%p8113_p0), %s828_s18, 8192, %s830_s5, %s817_s20, %s7826_s7, %s7826_s7, %s7827_s8  }
  0x5d   : > { %s852_s23 = sshll.u32 %s843_s12, 4  ;;  %s840_s19 = scalar_lea.sflag [#allocation11], %s816_s13  ;;  %s853_s23 = int_to_ptr.vmem [resolvable:$true] %s852_s23 }
  0x5e   : > { %864 = sbr.rel (%p7998_p3) target bundleno = 1917 (0x77d), region = 108  ;;  %s866_s14 = sand.u32 (!%p7998_p3), 1, %s7794_s26  }
  0x5f   : > { %s5805_s16 = sshll.u32 (!%p7998_p3), %s866_s14, 9  ;;  %s867_s18 = scalar_lea.sflag (!%p7998_p3), [#allocation5], %s866_s14 }
  0x60   : > { %s849_s10 = scalar_lea.hbm %s9957_s2, %s6661_s24  ;;  %s8136_s20 = scalar_lea.vmem (!%p7998_p3), [#allocation4], %s5805_s16 }
  0x61   : > { %s850_s4 = sshll.u32 %s849_s10, 4  ;;  %s851_s4 = int_to_ptr.hbm [resolvable:$true] %s850_s4 }
  0x62   : > { %6979 = dma.hbm_to_vmem [thread:$0]  (!%p8113_p0), %s851_s4, 8192, %s853_s23, %s840_s19, %s7826_s7, %s7826_s7, %s7827_s8  }
  0x63   : > { %7745 = dma.done.wait (%p8094_p13), %s867_s18, 8192  }
  0x64   : > { %7747 = vsyncadd (%p8094_p13), %s867_s18, 4294959104  ;;  %s876_s27 = sand.u32 1, %s7990_s29   ;;  %s8143_s7 = scalar_lea.vmem [#allocation7], %s5805_s16 }
  0x65   : > { %s877_s2 = scalar_lea.sflag [#allocation8], %s876_s27 }
  0x66   : > { %7749 = dma.done.wait (%p8094_p13), %s877_s2, 8192  }
  0x67   : > { %7751 = vsyncadd (%p8094_p13), %s877_s2, 4294959104 }
  0x68   : > { %7753 = dma.done.wait (%p85_p1), [#allocation8], 32  }
  0x69   : > { %7755 = vsyncadd (%p85_p1), [#allocation8], 4294967264  ;;  %s892_s25 = scalar_lea.sflag [#allocation11], %s876_s27  ;;  %s8153_s17 = scalar_lea.vmem [#allocation10], %s5805_s16 }
  0x6a   : > { %7757 = dma.done.wait (%p8094_p13), %s892_s25, 8192  }
  0x6b   : > { %7759 = vsyncadd (%p8094_p13), %s892_s25, 4294959104 }
  0x6c   : > { %7761 = dma.done.wait (%p85_p1), [#allocation11], 2048  }
  0x6d   : > { %7763 = vsyncadd (%p85_p1), [#allocation11], 4294965248 }
  0x6e   : > { %7765 = dma.done.wait (%p85_p1), [#allocation14], 3072  }
  0x6f   : > { %7767 = vsyncadd (%p85_p1), [#allocation14], 4294964224 }
  0x70   : > { %7769 = dma.done.wait (%p85_p1), [#allocation17], 2048  }
  0x71   : > { %7771 = vsyncadd (%p85_p1), [#allocation17], 4294965248 }
  0x72   : > { %7773 = dma.done.wait (%p85_p1), [#allocation20], 2048  }
  0x73   : > { %7775 = vsyncadd (%p85_p1), [#allocation20], 4294965248 }
  0x74   : > { %7777 = dma.done.wait (%p85_p1), [#allocation23], 1024  }
  0x75   : > { %7779 = vsyncadd (%p85_p1), [#allocation23], 4294966272  ;;  %p5817_p2 = scmp.ne.s32.totalorder %s7802_s28, 0 }
  0x77   : > { %1016 = sbr.rel (%p5817_p2) target bundleno = 189 (0xbd), region = 160 }
  0x7c   : > { %v7828_v0 = vmov 0.0  }
  0x7d   : > { %1017 = vst [vmem:[#allocation2 + $0xb0] sm:$0xff] %v7828_v0 }
  0x7e   : > { %1018 = vst [vmem:[#allocation2] sm:$0xff] %v7828_v0 }
  0x7f   : > { %1019 = vst [vmem:[#allocation2 + $0xd8] sm:$0xff] %v7828_v0 }
  0x80   : > { %1020 = vst [vmem:[#allocation2 + $0x18] sm:$0xff] %v7828_v0 }
  0x81   : > { %1021 = vst [vmem:[#allocation2 + $0x50] sm:$0xff] %v7828_v0 }
  0x82   : > { %1022 = vst [vmem:[#allocation2 + $0x68] sm:$0xff] %v7828_v0 }
  0x83   : > { %1023 = vst [vmem:[#allocation2 + $0x30] sm:$0xff] %v7828_v0 }
  0x84   : > { %1024 = vst [vmem:[#allocation2 + $0x48] sm:$0xff] %v7828_v0 }
  0x85   : > { %1025 = vst [vmem:[#allocation2 + $0x80] sm:$0xff] %v7828_v0 }
  0x86   : > { %1026 = vst [vmem:[#allocation2 + $0x88] sm:$0xff] %v7828_v0 }
  0x87   : > { %1027 = vst [vmem:[#allocation2 + $0xe8] sm:$0xff] %v7828_v0 }
  0x88   : > { %1028 = vst [vmem:[#allocation2 + $0xb8] sm:$0xff] %v7828_v0 }
  0x89   : > { %1029 = vst [vmem:[#allocation2 + $0x60] sm:$0xff] %v7828_v0 }
  0x8a   : > { %1030 = vst [vmem:[#allocation2 + $0xf0] sm:$0xff] %v7828_v0 }
  0x8b   : > { %1031 = vst [vmem:[#allocation2 + $0x8] sm:$0xff] %v7828_v0 }
  0x8c   : > { %1032 = vst [vmem:[#allocation2 + $0x78] sm:$0xff] %v7828_v0 }
  0x8d   : > { %1033 = vst [vmem:[#allocation2 + $0x38] sm:$0xff] %v7828_v0 }
  0x8e   : > { %1034 = vst [vmem:[#allocation2 + $0x58] sm:$0xff] %v7828_v0 }
  0x8f   : > { %1035 = vst [vmem:[#allocation2 + $0x40] sm:$0xff] %v7828_v0 }
  0x90   : > { %1036 = vst [vmem:[#allocation2 + $0xc8] sm:$0xff] %v7828_v0 }
  0x91   : > { %1037 = vst [vmem:[#allocation2 + $0xe0] sm:$0xff] %v7828_v0 }
  0x92   : > { %1038 = vst [vmem:[#allocation2 + $0x90] sm:$0xff] %v7828_v0 }
  0x93   : > { %1039 = vst [vmem:[#allocation2 + $0x70] sm:$0xff] %v7828_v0 }
  0x94   : > { %1040 = vst [vmem:[#allocation2 + $0xc0] sm:$0xff] %v7828_v0 }
  0x95   : > { %1041 = vst [vmem:[#allocation2 + $0xa8] sm:$0xff] %v7828_v0 }
  0x96   : > { %1042 = vst [vmem:[#allocation2 + $0xd0] sm:$0xff] %v7828_v0 }
  0x97   : > { %1043 = vst [vmem:[#allocation2 + $0x10] sm:$0xff] %v7828_v0 }
  0x98   : > { %1044 = vst [vmem:[#allocation2 + $0x28] sm:$0xff] %v7828_v0 }
  0x99   : > { %1045 = vst [vmem:[#allocation2 + $0xa0] sm:$0xff] %v7828_v0 }
  0x9a   : > { %1046 = vst [vmem:[#allocation2 + $0xf8] sm:$0xff] %v7828_v0 }
  0x9b   : > { %1047 = vst [vmem:[#allocation2 + $0x20] sm:$0xff] %v7828_v0 }
  0x9c   : > { %1048 = vst [vmem:[#allocation2 + $0x98] sm:$0xff] %v7828_v0 }
  0x9d   : > { %1049 = vst [vmem:[#allocation3 + $0x80] sm:$0xff] %v7828_v0 }
  0x9e   : > { %1050 = vst [vmem:[#allocation3 + $0xc8] sm:$0xff] %v7828_v0 }
  0x9f   : > { %1051 = vst [vmem:[#allocation3 + $0xe8] sm:$0xff] %v7828_v0 }
  0xa0   : > { %1052 = vst [vmem:[#allocation3 + $0x78] sm:$0xff] %v7828_v0 }
  0xa1   : > { %1053 = vst [vmem:[#allocation3 + $0x8] sm:$0xff] %v7828_v0 }
  0xa2   : > { %1054 = vst [vmem:[#allocation3 + $0x90] sm:$0xff] %v7828_v0 }
  0xa3   : > { %1055 = vst [vmem:[#allocation3 + $0x58] sm:$0xff] %v7828_v0 }
  0xa4   : > { %1056 = vst [vmem:[#allocation3 + $0xa8] sm:$0xff] %v7828_v0 }
  0xa5   : > { %1057 = vst [vmem:[#allocation3 + $0xd0] sm:$0xff] %v7828_v0 }
  0xa6   : > { %1058 = vst [vmem:[#allocation3 + $0xb0] sm:$0xff] %v7828_v0 }
  0xa7   : > { %1059 = vst [vmem:[#allocation3 + $0x38] sm:$0xff] %v7828_v0 }
  0xa8   : > { %1060 = vst [vmem:[#allocation3 + $0x40] sm:$0xff] %v7828_v0 }
  0xa9   : > { %1061 = vst [vmem:[#allocation3 + $0xe0] sm:$0xff] %v7828_v0 }
  0xaa   : > { %1062 = vst [vmem:[#allocation3 + $0x60] sm:$0xff] %v7828_v0 }
  0xab   : > { %1063 = vst [vmem:[#allocation3 + $0x18] sm:$0xff] %v7828_v0 }
  0xac   : > { %1064 = vst [vmem:[#allocation3 + $0x68] sm:$0xff] %v7828_v0 }
  0xad   : > { %1065 = vst [vmem:[#allocation3 + $0x10] sm:$0xff] %v7828_v0 }
  0xae   : > { %1066 = vst [vmem:[#allocation3 + $0x70] sm:$0xff] %v7828_v0 }
  0xaf   : > { %1067 = vst [vmem:[#allocation3 + $0x50] sm:$0xff] %v7828_v0 }
  0xb0   : > { %1068 = vst [vmem:[#allocation3 + $0xa0] sm:$0xff] %v7828_v0 }
  0xb1   : > { %1069 = vst [vmem:[#allocation3 + $0xd8] sm:$0xff] %v7828_v0 }
  0xb2   : > { %1070 = vst [vmem:[#allocation3 + $0x30] sm:$0xff] %v7828_v0 }
  0xb3   : > { %1071 = vst [vmem:[#allocation3 + $0x20] sm:$0xff] %v7828_v0 }
  0xb4   : > { %1072 = vst [vmem:[#allocation3 + $0xf0] sm:$0xff] %v7828_v0 }
  0xb5   : > { %1073 = vst [vmem:[#allocation3 + $0x88] sm:$0xff] %v7828_v0 }
  0xb6   : > { %1074 = vst [vmem:[#allocation3 + $0x48] sm:$0xff] %v7828_v0 }
  0xb7   : > { %1075 = vst [vmem:[#allocation3 + $0xf8] sm:$0xff] %v7828_v0 }
  0xb8   : > { %1076 = vst [vmem:[#allocation3 + $0xc0] sm:$0xff] %v7828_v0 }
  0xb9   : > { %1077 = vst [vmem:[#allocation3 + $0xb8] sm:$0xff] %v7828_v0 }
  0xba   : > { %1078 = vst [vmem:[#allocation3] sm:$0xff] %v7828_v0 }
  0xbb   : > { %1079 = vst [vmem:[#allocation3 + $0x28] sm:$0xff] %v7828_v0 }
  0xbc   : > { %1080 = vst [vmem:[#allocation3 + $0x98] sm:$0xff] %v7828_v0 }
  0xbd PF: > { %v5876_v1 = vld [vmem:[%s8143_s7 + $0x70] sm:$0xf]  ;;  %v6679_v2 = vld [vmem:[%s8143_s7 + $0x74] sm:$0xf0]  ;;  %v5868_v12 = vld [vmem:[%s8143_s7 + $0x60] sm:$0xf] }
  0xbe   : > { %v5940_v3 = vld [vmem:[%s8143_s7 + $0xf0] sm:$0xf]  ;;  %v5877_v4 = vor.u32 %v6679_v2, %v5876_v1  ;;  %v6695_v5 = vld [vmem:[%s8143_s7 + $0xf4] sm:$0xf0]  ;;  %v6677_v14 = vld [vmem:[%s8143_s7 + $0x64] sm:$0xf0] }
  0xbf   : > { %v6004_v6 = vld [vmem:[%s8143_s7 + $0x170] sm:$0xf]  ;;  %v6711_v7 = vld [vmem:[%s8143_s7 + $0x174] sm:$0xf0]  ;;  %v5941_v8 = vor.u32 %v6695_v5, %v5940_v3  ;;  %v5932_v15 = vld [vmem:[%s8143_s7 + $0xe0] sm:$0xf]  ;;  %v5869_v17 = vor.u32 %v6677_v14, %v5868_v12 }
  0xc0   : > { %v6005_v9 = vor.u32 %v6711_v7, %v6004_v6  ;;  %v6068_v10 = vld [vmem:[%s8143_s7 + $0x1f0] sm:$0xf]  ;;  %v6727_v11 = vld [vmem:[%s8143_s7 + $0x1f4] sm:$0xf0]  ;;  %1593 = vmatpush.bf16.msra.mxu0 %v5877_v4  ;;  %v6693_v16 = vld [vmem:[%s8143_s7 + $0xe4] sm:$0xf0] }
  0xc1   : > { %v6069_v13 = vor.u32 %v6727_v11, %v6068_v10  ;;  %1642 = vmatpush.bf16.msra.mxu1 %v5941_v8  ;;  %v5933_v18 = vor.u32 %v6693_v16, %v5932_v15  ;;  %v5996_v19 = vld [vmem:[%s8143_s7 + $0x160] sm:$0xf]  ;;  %v6709_v20 = vld [vmem:[%s8143_s7 + $0x164] sm:$0xf0]  ;;  %v5860_v24 = vld [vmem:[%s8143_s7 + $0x50] sm:$0xf] }
  0xc2   : > { %1691 = vmatpush.bf16.msra.mxu2 %v6005_v9  ;;  %v6060_v21 = vld [vmem:[%s8143_s7 + $0x1e0] sm:$0xf]  ;;  %v5997_v22 = vor.u32 %v6709_v20, %v5996_v19  ;;  %v6725_v23 = vld [vmem:[%s8143_s7 + $0x1e4] sm:$0xf0]  ;;  %v6675_v25 = vld [vmem:[%s8143_s7 + $0x54] sm:$0xf0] }
  0xc3   : > { %1740 = vmatpush.bf16.msra.mxu3 %v6069_v13  ;;  %v6061_v26 = vor.u32 %v6725_v23, %v6060_v21  ;;  %v5924_v27 = vld [vmem:[%s8143_s7 + $0xd0] sm:$0xf]  ;;  %v6691_v28 = vld [vmem:[%s8143_s7 + $0xd4] sm:$0xf0]  ;;  %v5861_v30 = vor.u32 %v6675_v25, %v5860_v24  ;;  %v5852_v36 = vld [vmem:[%s8143_s7 + $0x40] sm:$0xf] }
  0xc4   : > { %v5988_v29 = vld [vmem:[%s8143_s7 + $0x150] sm:$0xf]  ;;  %1594 = vmatpush.bf16.msra.mxu0 %v5869_v17  ;;  %v6707_v31 = vld [vmem:[%s8143_s7 + $0x154] sm:$0xf0]  ;;  %v5925_v34 = vor.u32 %v6691_v28, %v5924_v27  ;;  %v6673_v37 = vld [vmem:[%s8143_s7 + $0x44] sm:$0xf0] }
  0xc5   : > { %v6052_v32 = vld [vmem:[%s8143_s7 + $0x1d0] sm:$0xf]  ;;  %v6723_v33 = vld [vmem:[%s8143_s7 + $0x1d4] sm:$0xf0]  ;;  %1643 = vmatpush.bf16.msra.mxu1 %v5933_v18  ;;  %v5989_v35 = vor.u32 %v6707_v31, %v5988_v29  ;;  %v5916_v38 = vld [vmem:[%s8143_s7 + $0xc0] sm:$0xf]  ;;  %v5853_v45 = vor.u32 %v6673_v37, %v5852_v36 }
  0xc6   : > { %1692 = vmatpush.bf16.msra.mxu2 %v5997_v22  ;;  %v6053_v39 = vor.u32 %v6723_v33, %v6052_v32  ;;  %v6689_v40 = vld [vmem:[%s8143_s7 + $0xc4] sm:$0xf0]  ;;  %v5980_v41 = vld [vmem:[%s8143_s7 + $0x140] sm:$0xf]  ;;  %v5844_v48 = vld [vmem:[%s8143_s7 + $0x30] sm:$0xf] }
  0xc7   : > { %1741 = vmatpush.bf16.msra.mxu3 %v6061_v26  ;;  %v6705_v42 = vld [vmem:[%s8143_s7 + $0x144] sm:$0xf0]  ;;  %v6044_v43 = vld [vmem:[%s8143_s7 + $0x1c0] sm:$0xf]  ;;  %v5917_v46 = vor.u32 %v6689_v40, %v5916_v38  ;;  %v6671_v49 = vld [vmem:[%s8143_s7 + $0x34] sm:$0xf0] }
  0xc8   : > { %v6721_v44 = vld [vmem:[%s8143_s7 + $0x1c4] sm:$0xf0]  ;;  %1595 = vmatpush.bf16.msra.mxu0 %v5861_v30  ;;  %v5981_v47 = vor.u32 %v6705_v42, %v5980_v41  ;;  %v5908_v50 = vld [vmem:[%s8143_s7 + $0xb0] sm:$0xf]  ;;  %v6687_v52 = vld [vmem:[%s8143_s7 + $0xb4] sm:$0xf0]  ;;  %v5845_v57 = vor.u32 %v6671_v49, %v5844_v48 }
  0xc9   : > { %1644 = vmatpush.bf16.msra.mxu1 %v5925_v34  ;;  %v6045_v51 = vor.u32 %v6721_v44, %v6044_v43  ;;  %v5972_v53 = vld [vmem:[%s8143_s7 + $0x130] sm:$0xf]  ;;  %v6703_v54 = vld [vmem:[%s8143_s7 + $0x134] sm:$0xf0]  ;;  %v5909_v58 = vor.u32 %v6687_v52, %v5908_v50  ;;  %v5836_v60 = vld [vmem:[%s8143_s7 + $0x20] sm:$0xf] }
  0xca   : > { %1693 = vmatpush.bf16.msra.mxu2 %v5989_v35  ;;  %v6036_v55 = vld [vmem:[%s8143_s7 + $0x1b0] sm:$0xf]  ;;  %v6719_v56 = vld [vmem:[%s8143_s7 + $0x1b4] sm:$0xf0]  ;;  %v5973_v59 = vor.u32 %v6703_v54, %v5972_v53  ;;  %v6669_v61 = vld [vmem:[%s8143_s7 + $0x24] sm:$0xf0] }
  0xcb   : > { %1742 = vmatpush.bf16.msra.mxu3 %v6053_v39  ;;  %v5900_v62 = vld [vmem:[%s8143_s7 + $0xa0] sm:$0xf]  ;;  %v6037_v63 = vor.u32 %v6719_v56, %v6036_v55  ;;  %v6685_v0 = vld [vmem:[%s8143_s7 + $0xa4] sm:$0xf0]  ;;  %v5837_v5 = vor.u32 %v6669_v61, %v5836_v60  ;;  %v5828_v8 = vld [vmem:[%s8143_s7 + $0x10] sm:$0xf] }
  0xcc   : > { %1596 = vmatpush.bf16.msra.mxu0 %v5853_v45  ;;  %v5964_v1 = vld [vmem:[%s8143_s7 + $0x120] sm:$0xf]  ;;  %v6701_v2 = vld [vmem:[%s8143_s7 + $0x124] sm:$0xf0]  ;;  %v5901_v6 = vor.u32 %v6685_v0, %v5900_v62  ;;  %v6667_v9 = vld [vmem:[%s8143_s7 + $0x14] sm:$0xf0] }
  0xcd   : > { %1645 = vmatpush.bf16.msra.mxu1 %v5917_v46  ;;  %v6028_v3 = vld [vmem:[%s8143_s7 + $0x1a0] sm:$0xf]  ;;  %v6717_v4 = vld [vmem:[%s8143_s7 + $0x1a4] sm:$0xf0]  ;;  %v5965_v7 = vor.u32 %v6701_v2, %v5964_v1  ;;  %v5892_v10 = vld [vmem:[%s8143_s7 + $0x90] sm:$0xf]  ;;  %v5829_v18 = vor.u32 %v6667_v9, %v5828_v8 }
  0xce   : > { %1694 = vmatpush.bf16.msra.mxu2 %v5981_v47  ;;  %v6029_v11 = vor.u32 %v6717_v4, %v6028_v3  ;;  %v6683_v12 = vld [vmem:[%s8143_s7 + $0x94] sm:$0xf0]  ;;  %v5956_v13 = vld [vmem:[%s8143_s7 + $0x110] sm:$0xf]  ;;  %v5820_v17 = vld [vmem:[%s8143_s7] sm:$0xf] }
  0xcf   : > { %1743 = vmatpush.bf16.msra.mxu3 %v6045_v51  ;;  %v6699_v14 = vld [vmem:[%s8143_s7 + $0x114] sm:$0xf0]  ;;  %v6020_v15 = vld [vmem:[%s8143_s7 + $0x190] sm:$0xf]  ;;  %v6665_v19 = vld [vmem:[%s8143_s7 + $0x4] sm:$0xf0]  ;;  %v5893_v22 = vor.u32 %v6683_v12, %v5892_v10 }
  0xd0   : > { %1597 = vmatpush.bf16.msra.mxu0 %v5845_v57  ;;  %v6715_v16 = vld [vmem:[%s8143_s7 + $0x194] sm:$0xf0]  ;;  %v5884_v20 = vld [vmem:[%s8143_s7 + $0x80] sm:$0xf]  ;;  %v6681_v21 = vld [vmem:[%s8143_s7 + $0x84] sm:$0xf0]  ;;  %v5957_v23 = vor.u32 %v6699_v14, %v5956_v13  ;;  %v5821_v35 = vor.u32 %v6665_v19, %v5820_v17 }
  0xd1   : > { %1646 = vmatpush.bf16.msra.mxu1 %v5909_v58  ;;  %v5948_v24 = vld [vmem:[%s8143_s7 + $0x100] sm:$0xf]  ;;  %v6697_v25 = vld [vmem:[%s8143_s7 + $0x104] sm:$0xf0]  ;;  %v6021_v27 = vor.u32 %v6715_v16, %v6020_v15  ;;  %v6710_v33 = vld [vmem:[%s8143_s7 + $0x174] sm:$0xf]  ;;  %v5885_v39 = vor.u32 %v6681_v21, %v5884_v20 }
  0xd2   : > { %1695 = vmatpush.bf16.msra.mxu2 %v5973_v59  ;;  %v6012_v26 = vld [vmem:[%s8143_s7 + $0x180] sm:$0xf]  ;;  %v6713_v28 = vld [vmem:[%s8143_s7 + $0x184] sm:$0xf0]  ;;  %v6006_v34 = vld [vmem:[%s8143_s7 + $0x178] sm:$0xf0]  ;;  %v5949_v40 = vor.u32 %v6697_v25, %v5948_v24 }
  0xd3   : > { %1744 = vmatpush.bf16.msra.mxu3 %v6037_v63  ;;  %v1081_v29 = vld [vmem:[%s8136_s20] sm:$0xff]  ;;  %v1082_v31 = vld [vmem:[%s8136_s20 + $0x8] sm:$0xff]  ;;  %v1083_v36 = vld [vmem:[%s8136_s20 + $0x10] sm:$0xff]  ;;  %v6013_v44 = vor.u32 %v6713_v28, %v6012_v26  ;;  %v6009_v45 = vor.u32 %v6710_v33, %v6006_v34  ;;  %p6330_p1 = scmp.ne.s32.totalorder %s7802_s28, 1 }
  0xd4   : > { %1598 = vmatpush.bf16.msra.mxu0 %v5837_v5  ;;  %v1085_v30 = vld [vmem:[%s8136_s20 + $0x20] sm:$0xff]  ;;  %v1086_v32 = vld [vmem:[%s8136_s20 + $0x28] sm:$0xff]  ;;  %v6726_v37 = vld [vmem:[%s8143_s7 + $0x1f4] sm:$0xf] }
  0xd5   : > { %1647 = vmatpush.bf16.msra.mxu1 %v5901_v6  ;;  %v6070_v38 = vld [vmem:[%s8143_s7 + $0x1f8] sm:$0xf0]  ;;  %v1087_v41 = vld [vmem:[%s8136_s20 + $0x30] sm:$0xff]  ;;  %v8323_v49 = vpack.c.bf16 %v1085_v30, %v1081_v29  ;;  %v6708_v52 = vld [vmem:[%s8143_s7 + $0x164] sm:$0xf]  ;;  %v8328_v54 = vpack.c.bf16 %v1086_v32, %v1082_v31 }
  0xd6   : > { %1696 = vmatpush.bf16.msra.mxu2 %v5965_v7  ;;  %v1084_v42 = vld [vmem:[%s8136_s20 + $0x18] sm:$0xff]  ;;  %v6678_v46 = vld [vmem:[%s8143_s7 + $0x74] sm:$0xf]  ;;  %v6073_v50 = vor.u32 %v6726_v37, %v6070_v38  ;;  %v5998_v53 = vld [vmem:[%s8143_s7 + $0x168] sm:$0xf0]  ;;  %v8330_v55 = vpack.c.bf16 %v1087_v41, %v1083_v36 }
  0xd7   : > { %1745 = vmatpush.bf16.msra.mxu3 %v6029_v11  ;;  %v1088_v43 = vld [vmem:[%s8136_s20 + $0x38] sm:$0xff]  ;;  %v6694_v48 = vld [vmem:[%s8143_s7 + $0xf4] sm:$0xf]  ;;  %v6724_v56 = vld [vmem:[%s8143_s7 + $0x1e4] sm:$0xf]  ;;  %v6001_v61 = vor.u32 %v6708_v52, %v5998_v53 }
  0xd8   : > { %1599 = vmatpush.bf16.msra.mxu0 %v5829_v18  ;;  %v5878_v47 = vld [vmem:[%s8143_s7 + $0x78] sm:$0xf0]  ;;  %v6062_v57 = vld [vmem:[%s8143_s7 + $0x1e8] sm:$0xf0]  ;;  %v8334_v58 = vpack.c.bf16 %v1088_v43, %v1084_v42  ;;  %v6676_v62 = vld [vmem:[%s8143_s7 + $0x64] sm:$0xf] }
  0xd9   : > { %1648 = vmatpush.bf16.msra.mxu1 %v5893_v22  ;;  %v5942_v51 = vld [vmem:[%s8143_s7 + $0xf8] sm:$0xf0]  ;;  %v5881_v59 = vor.u32 %v6678_v46, %v5878_v47  ;;  %v5870_v63 = vld [vmem:[%s8143_s7 + $0x68] sm:$0xf0]  ;;  %v6065_v0 = vor.u32 %v6724_v56, %v6062_v57  ;;  %v6692_v1 = vld [vmem:[%s8143_s7 + $0xe4] sm:$0xf] }
  0xda   : > { %1697 = vmatpush.bf16.msra.mxu2 %v5957_v23  ;;  %v5945_v60 = vor.u32 %v6694_v48, %v5942_v51  ;;  %v5934_v2 = vld [vmem:[%s8143_s7 + $0xe8] sm:$0xf0]  ;;  %v5873_v3 = vor.u32 %v6676_v62, %v5870_v63  ;;  %v6706_v4 = vld [vmem:[%s8143_s7 + $0x154] sm:$0xf]  ;;  %v5990_v5 = vld [vmem:[%s8143_s7 + $0x158] sm:$0xf0] }
  0xdb   : > { %1746 = vmatpush.bf16.msra.mxu3 %v6021_v27  ;;  %v6722_v6 = vld [vmem:[%s8143_s7 + $0x1d4] sm:$0xf]  ;;  %v5937_v7 = vor.u32 %v6692_v1, %v5934_v2  ;;  %v5993_v8 = vor.u32 %v6706_v4, %v5990_v5  ;;  %v6054_v9 = vld [vmem:[%s8143_s7 + $0x1d8] sm:$0xf0]  ;;  %v1089_v17 = vld [vmem:[%s8136_s20 + $0x40] sm:$0xff] }
  0xdc   : > { %1600 = vmatpush.bf16.msra.mxu0 %v5821_v35  ;;  %v6674_v10 = vld [vmem:[%s8143_s7 + $0x54] sm:$0xf]  ;;  %v5862_v11 = vld [vmem:[%s8143_s7 + $0x58] sm:$0xf0]  ;;  %v6057_v12 = vor.u32 %v6722_v6, %v6054_v9  ;;  %v1093_v18 = vld [vmem:[%s8136_s20 + $0x60] sm:$0xff] }
  0xdd   : > { %1649 = vmatpush.bf16.msra.mxu1 %v5885_v39  ;;  %v6690_v13 = vld [vmem:[%s8143_s7 + $0xd4] sm:$0xf]  ;;  %v5926_v14 = vld [vmem:[%s8143_s7 + $0xd8] sm:$0xf0]  ;;  %v5865_v15 = vor.u32 %v6674_v10, %v5862_v11  ;;  %v1090_v19 = vld [vmem:[%s8136_s20 + $0x48] sm:$0xff]  ;;  %v8360_v25 = vpack.c.bf16 %v1093_v18, %v1089_v17 }
  0xde   : > { %1698 = vmatpush.bf16.msra.mxu2 %v5949_v40  ;;  %v5929_v16 = vor.u32 %v6690_v13, %v5926_v14  ;;  %v1094_v20 = vld [vmem:[%s8136_s20 + $0x68] sm:$0xff]  ;;  %v1091_v21 = vld [vmem:[%s8136_s20 + $0x50] sm:$0xff]  ;;  %v1092_v23 = vld [vmem:[%s8136_s20 + $0x58] sm:$0xff] }
  0xdf   : > { %1747 = vmatpush.bf16.msra.mxu3 %v6013_v44  ;;  %1601 = vmatmul.bf16.vlgmr.msra.gmra.mxu0 %v8323_v49  ;;  %v1095_v22 = vld [vmem:[%s8136_s20 + $0x70] sm:$0xff]  ;;  %v1096_v24 = vld [vmem:[%s8136_s20 + $0x78] sm:$0xff]  ;;  %v8362_v26 = vpack.c.bf16 %v1094_v20, %v1090_v19  ;;  %v6704_v29 = vld [vmem:[%s8143_s7 + $0x144] sm:$0xf] }
  0xe0   : > { %1650 = vmatmul.bf16.vlgmr.msra.gmra.mxu1 %v8328_v54  ;;  %1789 = vmatpush.bf16.msrb.mxu0 %v5881_v59  ;;  %v8364_v27 = vpack.c.bf16 %v1095_v22, %v1091_v21  ;;  %v8366_v28 = vpack.c.bf16 %v1096_v24, %v1092_v23  ;;  %v5982_v30 = vld [vmem:[%s8143_s7 + $0x148] sm:$0xf0]  ;;  %v6720_v31 = vld [vmem:[%s8143_s7 + $0x1c4] sm:$0xf]  ;;  %v1103_v46 = vld [vmem:[%s8136_s20 + $0xb0] sm:$0xff] }
  0xe1   : > { %1699 = vmatmul.bf16.vlgmr.msra.gmra.mxu2 %v8330_v55  ;;  %1838 = vmatpush.bf16.msrb.mxu1 %v5945_v60  ;;  %v5985_v32 = vor.u32 %v6704_v29, %v5982_v30  ;;  %v6046_v33 = vld [vmem:[%s8143_s7 + $0x1c8] sm:$0xf0]  ;;  %v6672_v34 = vld [vmem:[%s8143_s7 + $0x44] sm:$0xf]  ;;  %v1100_v47 = vld [vmem:[%s8136_s20 + $0x98] sm:$0xff] }
  0xe2   : > { %1887 = vmatpush.bf16.msrb.mxu2 %v6009_v45  ;;  %1748 = vmatmul.bf16.vlgmr.msra.gmra.mxu3 %v8334_v58  ;;  %v5854_v35 = vld [vmem:[%s8143_s7 + $0x48] sm:$0xf0]  ;;  %v6049_v36 = vor.u32 %v6720_v31, %v6046_v33  ;;  %v6688_v38 = vld [vmem:[%s8143_s7 + $0xc4] sm:$0xf]  ;;  %v1099_v45 = vld [vmem:[%s8136_s20 + $0x90] sm:$0xff] }
  0xe3   : > { %1936 = vmatpush.bf16.msrb.mxu3 %v6073_v50  ;;  %v5857_v37 = vor.u32 %v6672_v34, %v5854_v35  ;;  %v5918_v39 = vld [vmem:[%s8143_s7 + $0xc8] sm:$0xf0]  ;;  %v1097_v41 = vld [vmem:[%s8136_s20 + $0x80] sm:$0xff]  ;;  %v1104_v48 = vld [vmem:[%s8136_s20 + $0xb8] sm:$0xff]  ;;  %v8392_v52 = vpack.c.bf16 %v1103_v46, %v1099_v45 }
  0xe4   : > { %1790 = vmatpush.bf16.msrb.mxu0 %v5873_v3  ;;  %v5921_v40 = vor.u32 %v6688_v38, %v5918_v39  ;;  %v1101_v42 = vld [vmem:[%s8136_s20 + $0xa0] sm:$0xff]  ;;  %v1098_v43 = vld [vmem:[%s8136_s20 + $0x88] sm:$0xff]  ;;  %v8394_v53 = vpack.c.bf16 %v1104_v48, %v1100_v47  ;;  %v6702_v56 = vld [vmem:[%s8143_s7 + $0x134] sm:$0xf] }
  0xe5   : > { %1839 = vmatpush.bf16.msrb.mxu1 %v5937_v7  ;;  %v1102_v44 = vld [vmem:[%s8136_s20 + $0xa8] sm:$0xff]  ;;  %v8388_v50 = vpack.c.bf16 %v1101_v42, %v1097_v41  ;;  %v5974_v57 = vld [vmem:[%s8143_s7 + $0x138] sm:$0xf0]  ;;  %v6718_v59 = vld [vmem:[%s8143_s7 + $0x1b4] sm:$0xf] }
  0xe6   : > { %1888 = vmatpush.bf16.msrb.mxu2 %v6001_v61  ;;  %v8390_v51 = vpack.c.bf16 %v1102_v44, %v1098_v43  ;;  %v5977_v60 = vor.u32 %v6702_v56, %v5974_v57  ;;  %v6038_v61 = vld [vmem:[%s8143_s7 + $0x1b8] sm:$0xf0]  ;;  %v6670_v62 = vld [vmem:[%s8143_s7 + $0x34] sm:$0xf]  ;;  %v1105_v5 = vld [vmem:[%s8136_s20 + $0xc0] sm:$0xff] }
  0xe7   : > { %1937 = vmatpush.bf16.msrb.mxu3 %v6065_v0  ;;  %v5846_v63 = vld [vmem:[%s8143_s7 + $0x38] sm:$0xf0]  ;;  %v6041_v0 = vor.u32 %v6718_v59, %v6038_v61  ;;  %v6686_v2 = vld [vmem:[%s8143_s7 + $0xb4] sm:$0xf]  ;;  %v1109_v6 = vld [vmem:[%s8136_s20 + $0xe0] sm:$0xff] }
  0xe8   : > { %1791 = vmatpush.bf16.msrb.mxu0 %v5865_v15  ;;  %v5849_v1 = vor.u32 %v6670_v62, %v5846_v63  ;;  %v5910_v3 = vld [vmem:[%s8143_s7 + $0xb8] sm:$0xf0]  ;;  %v1106_v7 = vld [vmem:[%s8136_s20 + $0xc8] sm:$0xff]  ;;  %v1107_v9 = vld [vmem:[%s8136_s20 + $0xd0] sm:$0xff]  ;;  %v8416_v13 = vpack.c.bf16 %v1109_v6, %v1105_v5 }
  0xe9   : > { %1840 = vmatpush.bf16.msrb.mxu1 %v5929_v16  ;;  %v5913_v4 = vor.u32 %v6686_v2, %v5910_v3  ;;  %v1111_v10 = vld [vmem:[%s8136_s20 + $0xf0] sm:$0xff]  ;;  %v1108_v11 = vld [vmem:[%s8136_s20 + $0xd8] sm:$0xff]  ;;  %v6700_v17 = vld [vmem:[%s8143_s7 + $0x124] sm:$0xf] }
  0xea   : > { %1889 = vmatpush.bf16.msrb.mxu2 %v5993_v8  ;;  %v1110_v8 = vld [vmem:[%s8136_s20 + $0xe8] sm:$0xff]  ;;  %v8420_v15 = vpack.c.bf16 %v1111_v10, %v1107_v9  ;;  %v6716_v19 = vld [vmem:[%s8143_s7 + $0x1a4] sm:$0xf]  ;;  %v1119_v38 = vld [vmem:[%s8136_s20 + $0x130] sm:$0xff] }
  0xeb   : > { %1938 = vmatpush.bf16.msrb.mxu3 %v6057_v12  ;;  %v1112_v12 = vld [vmem:[%s8136_s20 + $0xf8] sm:$0xff]  ;;  %v8418_v14 = vpack.c.bf16 %v1110_v8, %v1106_v7  ;;  %v5966_v18 = vld [vmem:[%s8143_s7 + $0x128] sm:$0xf0]  ;;  %v6668_v22 = vld [vmem:[%s8143_s7 + $0x24] sm:$0xf] }
  0xec   : > { %1792 = vmatpush.bf16.msrb.mxu0 %v5857_v37  ;;  %v8422_v16 = vpack.c.bf16 %v1112_v12, %v1108_v11  ;;  %v5969_v20 = vor.u32 %v6700_v17, %v5966_v18  ;;  %v6030_v21 = vld [vmem:[%s8143_s7 + $0x1a8] sm:$0xf0]  ;;  %v6684_v30 = vld [vmem:[%s8143_s7 + $0xa4] sm:$0xf]  ;;  %v1115_v37 = vld [vmem:[%s8136_s20 + $0x110] sm:$0xff] }
  0xed   : > { %1841 = vmatpush.bf16.msrb.mxu1 %v5921_v40  ;;  %v5838_v23 = vld [vmem:[%s8143_s7 + $0x28] sm:$0xf0]  ;;  %v6033_v24 = vor.u32 %v6716_v19, %v6030_v21  ;;  %v1113_v33 = vld [vmem:[%s8136_s20 + $0x100] sm:$0xff]  ;;  %v1116_v39 = vld [vmem:[%s8136_s20 + $0x118] sm:$0xff]  ;;  %v8448_v43 = vpack.c.bf16 %v1119_v38, %v1115_v37 }
  0xee   : > { %1890 = vmatpush.bf16.msrb.mxu2 %v5985_v32  ;;  %v5841_v29 = vor.u32 %v6668_v22, %v5838_v23  ;;  %v5902_v31 = vld [vmem:[%s8143_s7 + $0xa8] sm:$0xf0]  ;;  %v1117_v34 = vld [vmem:[%s8136_s20 + $0x120] sm:$0xff]  ;;  %v1120_v40 = vld [vmem:[%s8136_s20 + $0x138] sm:$0xff] }
  0xef   : > { %1606 = vmatmul.bf16.gmra.mxu0 %v8360_v25  ;;  %1939 = vmatpush.bf16.msrb.mxu3 %v6049_v36  ;;  %v5905_v32 = vor.u32 %v6684_v30, %v5902_v31  ;;  %v1114_v35 = vld [vmem:[%s8136_s20 + $0x108] sm:$0xff]  ;;  %v8444_v41 = vpack.c.bf16 %v1117_v34, %v1113_v33  ;;  %v8450_v44 = vpack.c.bf16 %v1120_v40, %v1116_v39  ;;  %v6698_v45 = vld [vmem:[%s8143_s7 + $0x114] sm:$0xf]  ;;  %v5958_v46 = vld [vmem:[%s8143_s7 + $0x118] sm:$0xf0] }
  0xf0   : > { %1655 = vmatmul.bf16.gmra.mxu1 %v8362_v26  ;;  %1793 = vmatpush.bf16.msrb.mxu0 %v5849_v1  ;;  %v1118_v36 = vld [vmem:[%s8136_s20 + $0x128] sm:$0xff]  ;;  %v6714_v47 = vld [vmem:[%s8143_s7 + $0x194] sm:$0xf]  ;;  %v5961_v48 = vor.u32 %v6698_v45, %v5958_v46  ;;  %v6022_v56 = vld [vmem:[%s8143_s7 + $0x198] sm:$0xf0] }
  0xf1   : > { %1704 = vmatmul.bf16.gmra.mxu2 %v8364_v27  ;;  %1842 = vmatpush.bf16.msrb.mxu1 %v5913_v4  ;;  %v8446_v42 = vpack.c.bf16 %v1118_v36, %v1114_v35  ;;  %v6666_v57 = vld [vmem:[%s8143_s7 + $0x14] sm:$0xf]  ;;  %v5830_v59 = vld [vmem:[%s8143_s7 + $0x18] sm:$0xf0]  ;;  %v1121_v1 = vld [vmem:[%s8136_s20 + $0x140] sm:$0xff] }
  0xf2   : > { %1753 = vmatmul.bf16.gmra.mxu3 %v8366_v28  ;;  %1891 = vmatpush.bf16.msrb.mxu2 %v5977_v60  ;;  %v6025_v60 = vor.u32 %v6714_v47, %v6022_v56  ;;  %v5833_v61 = vor.u32 %v6666_v57, %v5830_v59  ;;  %v6682_v62 = vld [vmem:[%s8143_s7 + $0x94] sm:$0xf]  ;;  %v5894_v63 = vld [vmem:[%s8143_s7 + $0x98] sm:$0xf0]  ;;  %v1125_v2 = vld [vmem:[%s8136_s20 + $0x160] sm:$0xff] }
  0xf3   : > { %1940 = vmatpush.bf16.msrb.mxu3 %v6041_v0  ;;  %v5897_v0 = vor.u32 %v6682_v62, %v5894_v63  ;;  %v1122_v3 = vld [vmem:[%s8136_s20 + $0x148] sm:$0xff]  ;;  %v1123_v5 = vld [vmem:[%s8136_s20 + $0x150] sm:$0xff]  ;;  %v1124_v7 = vld [vmem:[%s8136_s20 + $0x158] sm:$0xff]  ;;  %v8472_v9 = vpack.c.bf16 %v1125_v2, %v1121_v1 }
  0xf4   : > { %1794 = vmatpush.bf16.msrb.mxu0 %v5841_v29  ;;  %v1126_v4 = vld [vmem:[%s8136_s20 + $0x168] sm:$0xff]  ;;  %v1127_v6 = vld [vmem:[%s8136_s20 + $0x170] sm:$0xff]  ;;  %v1128_v8 = vld [vmem:[%s8136_s20 + $0x178] sm:$0xff] }
  0xf5   : > { %1843 = vmatpush.bf16.msrb.mxu1 %v5905_v32  ;;  %v8474_v10 = vpack.c.bf16 %v1126_v4, %v1122_v3  ;;  %v8476_v11 = vpack.c.bf16 %v1127_v6, %v1123_v5  ;;  %v8478_v12 = vpack.c.bf16 %v1128_v8, %v1124_v7  ;;  %v6696_v17 = vld [vmem:[%s8143_s7 + $0x104] sm:$0xf]  ;;  %v5950_v18 = vld [vmem:[%s8143_s7 + $0x108] sm:$0xf0]  ;;  %v1131_v37 = vld [vmem:[%s8136_s20 + $0x190] sm:$0xff] }
  0xf6   : > { %1892 = vmatpush.bf16.msrb.mxu2 %v5969_v20  ;;  %v6712_v19 = vld [vmem:[%s8143_s7 + $0x184] sm:$0xf]  ;;  %v5953_v20 = vor.u32 %v6696_v17, %v5950_v18  ;;  %v6014_v21 = vld [vmem:[%s8143_s7 + $0x188] sm:$0xf0]  ;;  %v1135_v38 = vld [vmem:[%s8136_s20 + $0x1b0] sm:$0xff] }
  0xf7   : > { %1941 = vmatpush.bf16.msrb.mxu3 %v6033_v24  ;;  %v6664_v22 = vld [vmem:[%s8143_s7 + $0x4] sm:$0xf]  ;;  %v5822_v23 = vld [vmem:[%s8143_s7 + $0x8] sm:$0xf0]  ;;  %v6017_v24 = vor.u32 %v6712_v19, %v6014_v21  ;;  %v1132_v39 = vld [vmem:[%s8136_s20 + $0x198] sm:$0xff]  ;;  %v8504_v47 = vpack.c.bf16 %v1135_v38, %v1131_v37 }
  0xf8   : > { %1795 = vmatpush.bf16.msrb.mxu0 %v5833_v61  ;;  %v5825_v29 = vor.u32 %v6664_v22, %v5822_v23  ;;  %v6680_v30 = vld [vmem:[%s8143_s7 + $0x84] sm:$0xf]  ;;  %v5886_v31 = vld [vmem:[%s8143_s7 + $0x88] sm:$0xf0]  ;;  %v1136_v40 = vld [vmem:[%s8136_s20 + $0x1b8] sm:$0xff] }
  0xf9   : > { %1844 = vmatpush.bf16.msrb.mxu1 %v5897_v0  ;;  %v5889_v32 = vor.u32 %v6680_v30, %v5886_v31  ;;  %v1129_v33 = vld [vmem:[%s8136_s20 + $0x180] sm:$0xff]  ;;  %v1130_v35 = vld [vmem:[%s8136_s20 + $0x188] sm:$0xff]  ;;  %v6260_v56 = vld [vmem:[%s8153_s17 + $0x170] sm:$0xf] }
  0xfa   : > { %1893 = vmatpush.bf16.msrb.mxu2 %v5961_v48  ;;  %v1133_v34 = vld [vmem:[%s8136_s20 + $0x1a0] sm:$0xff]  ;;  %v1134_v36 = vld [vmem:[%s8136_s20 + $0x1a8] sm:$0xff]  ;;  %v8506_v48 = vpack.c.bf16 %v1136_v40, %v1132_v39  ;;  %v6775_v57 = vld [vmem:[%s8153_s17 + $0x174] sm:$0xf0] }
  0xfb   : > { %1942 = vmatpush.bf16.msrb.mxu3 %v6025_v60  ;;  %v8500_v45 = vpack.c.bf16 %v1133_v34, %v1129_v33  ;;  %v8502_v46 = vpack.c.bf16 %v1134_v36, %v1130_v35  ;;  %v6324_v59 = vld [vmem:[%s8153_s17 + $0x1f0] sm:$0xf]  ;;  %v6261_v60 = vor.u32 %v6775_v57, %v6260_v56  ;;  %v6791_v61 = vld [vmem:[%s8153_s17 + $0x1f4] sm:$0xf0]  ;;  %v1137_v63 = vld [vmem:[%s8136_s20 + $0x1c0] sm:$0xff] }
  0xfc   : > { %1796 = vmatpush.bf16.msrb.mxu0 %v5825_v29  ;;  %v6325_v62 = vor.u32 %v6791_v61, %v6324_v59  ;;  %v1141_v0 = vld [vmem:[%s8136_s20 + $0x1e0] sm:$0xff]  ;;  %v1138_v1 = vld [vmem:[%s8136_s20 + $0x1c8] sm:$0xff]  ;;  %v1139_v3 = vld [vmem:[%s8136_s20 + $0x1d0] sm:$0xff] }
  0xfd   : > { %1845 = vmatpush.bf16.msrb.mxu1 %v5889_v32  ;;  %v1142_v2 = vld [vmem:[%s8136_s20 + $0x1e8] sm:$0xff]  ;;  %v1143_v4 = vld [vmem:[%s8136_s20 + $0x1f0] sm:$0xff]  ;;  %v1140_v5 = vld [vmem:[%s8136_s20 + $0x1d8] sm:$0xff]  ;;  %v8527_v18 = vpack.c.bf16 %v1141_v0, %v1137_v63 }
  0xfe   : > { %1894 = vmatpush.bf16.msrb.mxu2 %v5953_v20  ;;  %v1144_v6 = vld [vmem:[%s8136_s20 + $0x1f8] sm:$0xff]  ;;  %v6132_v7 = vld [vmem:[%s8153_s17 + $0x70] sm:$0xf]  ;;  %v8530_v21 = vpack.c.bf16 %v1142_v2, %v1138_v1  ;;  %v8532_v22 = vpack.c.bf16 %v1143_v4, %v1139_v3  ;;  %v6252_v29 = vld [vmem:[%s8153_s17 + $0x160] sm:$0xf] }
  0xff   : > { %1611 = vmatmul.bf16.gmra.mxu0 %v8388_v50  ;;  %1943 = vmatpush.bf16.msrb.mxu3 %v6017_v24  ;;  %v6743_v8 = vld [vmem:[%s8153_s17 + $0x74] sm:$0xf0]  ;;  %v6196_v17 = vld [vmem:[%s8153_s17 + $0xf0] sm:$0xf]  ;;  %v8534_v24 = vpack.c.bf16 %v1144_v6, %v1140_v5  ;;  %v6773_v30 = vld [vmem:[%s8153_s17 + $0x164] sm:$0xf0] }
 0x100   : > { %1660 = vmatmul.bf16.gmra.mxu1 %v8390_v51  ;;  %v6133_v19 = vor.u32 %v6743_v8, %v6132_v7  ;;  %v6759_v20 = vld [vmem:[%s8153_s17 + $0xf4] sm:$0xf0]  ;;  %v6316_v31 = vld [vmem:[%s8153_s17 + $0x1e0] sm:$0xf]  ;;  %v6253_v32 = vor.u32 %v6773_v30, %v6252_v29  ;;  %v6789_v33 = vld [vmem:[%s8153_s17 + $0x1e4] sm:$0xf0] }
 0x101   : > { %1709 = vmatmul.bf16.gmra.mxu2 %v8392_v52  ;;  %v6197_v23 = vor.u32 %v6759_v20, %v6196_v17  ;;  %v6317_v34 = vor.u32 %v6789_v33, %v6316_v31  ;;  %v6124_v35 = vld [vmem:[%s8153_s17 + $0x60] sm:$0xf]  ;;  %v6741_v36 = vld [vmem:[%s8153_s17 + $0x64] sm:$0xf0]  ;;  %v6771_v61 = vld [vmem:[%s8153_s17 + $0x154] sm:$0xf0] }
 0x102   : > { %1758 = vmatmul.bf16.gmra.mxu3 %v8394_v53  ;;  %2563 = vmatpush.bf16.msra.mxu2 %v6261_v60  ;;  %v6188_v37 = vld [vmem:[%s8153_s17 + $0xe0] sm:$0xf]  ;;  %v6125_v38 = vor.u32 %v6741_v36, %v6124_v35  ;;  %v6757_v39 = vld [vmem:[%s8153_s17 + $0xe4] sm:$0xf0]  ;;  %v6244_v60 = vld [vmem:[%s8153_s17 + $0x150] sm:$0xf] }
 0x103   : > { %2612 = vmatpush.bf16.msra.mxu3 %v6325_v62  ;;  %2465 = vmatpush.bf16.msra.mxu0 %v6133_v19  ;;  %v6189_v56 = vor.u32 %v6757_v39, %v6188_v37  ;;  %v6308_v62 = vld [vmem:[%s8153_s17 + $0x1d0] sm:$0xf]  ;;  %v6245_v0 = vor.u32 %v6771_v61, %v6244_v60  ;;  %v6787_v1 = vld [vmem:[%s8153_s17 + $0x1d4] sm:$0xf0] }
 0x104   : > { %2514 = vmatpush.bf16.msra.mxu1 %v6197_v23  ;;  %v6309_v5 = vor.u32 %v6787_v1, %v6308_v62  ;;  %v1177_v6 = vld [vmem:[#allocation2 + $0xb0] sm:$0xff]  ;;  %v6739_v23 = vld [vmem:[%s8153_s17 + $0x54] sm:$0xf0]  ;;  %v6300_v62 = vld [vmem:[%s8153_s17 + $0x1c0] sm:$0xf] }
 0x105   : > { %v6116_v20 = vld [vmem:[%s8153_s17 + $0x50] sm:$0xf]  ;;  %v1179_v37 = vld [vmem:[#allocation2 + $0xd8] sm:$0xff] }
 0x106   : > { %2564 = vmatpush.bf16.msra.mxu2 %v6253_v32  ;;  %v6117_v30 = vor.u32 %v6739_v23, %v6116_v20  ;;  %v6180_v31 = vld [vmem:[%s8153_s17 + $0xd0] sm:$0xf]  ;;  %v6755_v32 = vld [vmem:[%s8153_s17 + $0xd4] sm:$0xf0] }
 0x107   : > { %2613 = vmatpush.bf16.msra.mxu3 %v6317_v34  ;;  %2466 = vmatpush.bf16.msra.mxu0 %v6125_v38  ;;  %v6181_v36 = vor.u32 %v6755_v32, %v6180_v31 }
 0x108   : > { %2515 = vmatpush.bf16.msra.mxu1 %v6189_v56 }
 0x10a   : > { %2565 = vmatpush.bf16.msra.mxu2 %v6245_v0 }
 0x10b   : > { %2614 = vmatpush.bf16.msra.mxu3 %v6309_v5  ;;  %2467 = vmatpush.bf16.msra.mxu0 %v6117_v30  ;;  %v6753_v30 = vld [vmem:[%s8153_s17 + $0xc4] sm:$0xf0] }
 0x10c   : > { %2516 = vmatpush.bf16.msra.mxu1 %v6181_v36 }
 0x10f   : > { %1616 = vmatmul.bf16.gmra.mxu0 %v8416_v13 }
 0x110   : > { %1665 = vmatmul.bf16.gmra.mxu1 %v8418_v14 }
 0x111   : > { %1714 = vmatmul.bf16.gmra.mxu2 %v8420_v15 }
 0x112   : > { %1763 = vmatmul.bf16.gmra.mxu3 %v8422_v16 }
 0x11f   : > { %1621 = vmatmul.bf16.gmra.mxu0 %v8444_v41 }
 0x120   : > { %1670 = vmatmul.bf16.gmra.mxu1 %v8446_v42 }
 0x121   : > { %1719 = vmatmul.bf16.gmra.mxu2 %v8448_v43 }
 0x122   : > { %1768 = vmatmul.bf16.gmra.mxu3 %v8450_v44 }
 0x12f   : > { %1626 = vmatmul.bf16.gmra.mxu0 %v8472_v9 }
 0x130   : > { %1675 = vmatmul.bf16.gmra.mxu1 %v8474_v10 }
 0x131   : > { %1724 = vmatmul.bf16.gmra.mxu2 %v8476_v11 }
 0x132   : > { %1773 = vmatmul.bf16.gmra.mxu3 %v8478_v12 }
 0x13f   : > { %1631 = vmatmul.bf16.gmra.mxu0 %v8500_v45 }
 0x140   : > { %1680 = vmatmul.bf16.gmra.mxu1 %v8502_v46 }
 0x141   : > { %1729 = vmatmul.bf16.gmra.mxu2 %v8504_v47 }
 0x142   : > { %1778 = vmatmul.bf16.gmra.mxu3 %v8506_v48 }
 0x14f   : > { %1636 = vmatmul.bf16.gmra.mxu0 %v8527_v18 }
 0x150   : > { %1685 = vmatmul.bf16.gmra.mxu1 %v8530_v21 }
 0x151   : > { %1734 = vmatmul.bf16.gmra.mxu2 %v8532_v22 }
 0x152   : > { %1783 = vmatmul.bf16.gmra.mxu3 %v8534_v24 }
 0x15c   : > { %v1602_v40 = vpop.f32.mrf.mxu0 }
 0x15d   : > { %v1651_v57 = vpop.f32.mrf.mxu1 }
 0x15e   : > { %v1652_v59 = vadd.f32 %v1651_v57, %v1602_v40  ;;  %v6236_v57 = vld [vmem:[%s8153_s17 + $0x140] sm:$0xf] }
 0x15f   : > { %1797 = vmatmul.bf16.vlgmr.msrb.gmra.mxu0 %v8323_v49 }
 0x160   : > { %1846 = vmatmul.bf16.vlgmr.msrb.gmra.mxu1 %v8328_v54 }
 0x161   : > { %1895 = vmatmul.bf16.vlgmr.msrb.gmra.mxu2 %v8330_v55 }
 0x162   : > { %1944 = vmatmul.bf16.vlgmr.msrb.gmra.mxu3 %v8334_v58 }
 0x164   : > { %v1700_v63 = vpop.f32.mrf.mxu2  ;;  %v1604_v4 = vpop.f32.mrf.mxu0 }
 0x165   : > { %v1701_v2 = vadd.f32 %v1700_v63, %v1652_v59  ;;  %v1749_v3 = vpop.f32.mrf.mxu3  ;;  %v1653_v7 = vpop.f32.mrf.mxu1  ;;  %v6769_v59 = vld [vmem:[%s8153_s17 + $0x144] sm:$0xf0] }
 0x166   : > { %v1654_v19 = vadd.f32 %v1653_v7, %v1604_v4  ;;  %v6237_v61 = vor.u32 %v6769_v59, %v6236_v57  ;;  %v6785_v63 = vld [vmem:[%s8153_s17 + $0x1c4] sm:$0xf0]  ;;  %v1181_v4 = vld [vmem:[#allocation2 + $0x50] sm:$0xff] }
 0x167   : > { %v1750_v8 = vadd.f32 %v1749_v3, %v1701_v2  ;;  %v6301_v3 = vor.u32 %v6785_v63, %v6300_v62 }
 0x168   : > { %2566 = vmatpush.bf16.msra.mxu2 %v6237_v61  ;;  %v6783_v61 = vld [vmem:[%s8153_s17 + $0x1b4] sm:$0xf0] }
 0x169   : > { %v1985_v17 = vadd.f32 %v1750_v8, %v1177_v6  ;;  %2615 = vmatpush.bf16.msra.mxu3 %v6301_v3 }
 0x16b   : > { %2017 = vst [vmem:[#allocation2 + $0xb0] sm:$0xff] %v1985_v17  ;;  %v6108_v17 = vld [vmem:[%s8153_s17 + $0x40] sm:$0xf] }
 0x16c   : > { %v1702_v29 = vpop.f32.mrf.mxu2  ;;  %v1607_v35 = vpop.f32.mrf.mxu0 }
 0x16d   : > { %v1703_v33 = vadd.f32 %v1702_v29, %v1654_v19  ;;  %v1751_v34 = vpop.f32.mrf.mxu3  ;;  %v1656_v38 = vpop.f32.mrf.mxu1  ;;  %v6737_v19 = vld [vmem:[%s8153_s17 + $0x44] sm:$0xf0]  ;;  %v6172_v29 = vld [vmem:[%s8153_s17 + $0xc0] sm:$0xf] }
 0x16e   : > { %v1657_v56 = vadd.f32 %v1656_v38, %v1607_v35  ;;  %v6109_v23 = vor.u32 %v6737_v19, %v6108_v17  ;;  %v1183_v35 = vld [vmem:[#allocation2 + $0x30] sm:$0xff] }
 0x16f   : > { %v1752_v39 = vadd.f32 %v1751_v34, %v1703_v33  ;;  %1802 = vmatmul.bf16.gmra.mxu0 %v8360_v25  ;;  %v6173_v34 = vor.u32 %v6753_v30, %v6172_v29 }
 0x170   : > { %1851 = vmatmul.bf16.gmra.mxu1 %v8362_v26  ;;  %2468 = vmatpush.bf16.msra.mxu0 %v6109_v23  ;;  %v6751_v23 = vld [vmem:[%s8153_s17 + $0xb4] sm:$0xf0] }
 0x171   : > { %v1987_v40 = vadd.f32 %v1752_v39, %v1179_v37  ;;  %1900 = vmatmul.bf16.gmra.mxu2 %v8364_v27  ;;  %2517 = vmatpush.bf16.msra.mxu1 %v6173_v34 }
 0x172   : > { %1949 = vmatmul.bf16.gmra.mxu3 %v8366_v28 }
 0x173   : > { %2019 = vst [vmem:[#allocation2 + $0xd8] sm:$0xff] %v1987_v40  ;;  %v6228_v40 = vld [vmem:[%s8153_s17 + $0x130] sm:$0xf] }
 0x174   : > { %v1705_v60 = vpop.f32.mrf.mxu2  ;;  %v1609_v2 = vpop.f32.mrf.mxu0 }
 0x175   : > { %v1706_v0 = vadd.f32 %v1705_v60, %v1657_v56  ;;  %v1754_v1 = vpop.f32.mrf.mxu3  ;;  %v1658_v5 = vpop.f32.mrf.mxu1  ;;  %v6767_v56 = vld [vmem:[%s8153_s17 + $0x134] sm:$0xf0]  ;;  %v6292_v60 = vld [vmem:[%s8153_s17 + $0x1b0] sm:$0xf] }
 0x176   : > { %v1659_v8 = vadd.f32 %v1658_v5, %v1609_v2  ;;  %v6229_v59 = vor.u32 %v6767_v56, %v6228_v40  ;;  %v1185_v2 = vld [vmem:[#allocation2 + $0x80] sm:$0xff] }
 0x177   : > { %v1755_v6 = vadd.f32 %v1754_v1, %v1706_v0  ;;  %v6293_v1 = vor.u32 %v6783_v61, %v6292_v60 }
 0x178   : > { %2567 = vmatpush.bf16.msra.mxu2 %v6229_v59  ;;  %v6781_v59 = vld [vmem:[%s8153_s17 + $0x1a4] sm:$0xf0] }
 0x179   : > { %v1989_v7 = vadd.f32 %v1755_v6, %v1181_v4  ;;  %2616 = vmatpush.bf16.msra.mxu3 %v6293_v1 }
 0x17b   : > { %2021 = vst [vmem:[#allocation2 + $0x50] sm:$0xff] %v1989_v7  ;;  %v6100_v7 = vld [vmem:[%s8153_s17 + $0x30] sm:$0xf] }
 0x17c   : > { %v1707_v20 = vpop.f32.mrf.mxu2  ;;  %v1612_v33 = vpop.f32.mrf.mxu0 }
 0x17d   : > { %v1708_v31 = vadd.f32 %v1707_v20, %v1659_v8  ;;  %v1756_v32 = vpop.f32.mrf.mxu3  ;;  %v1661_v36 = vpop.f32.mrf.mxu1  ;;  %v6735_v8 = vld [vmem:[%s8153_s17 + $0x34] sm:$0xf0]  ;;  %v6164_v20 = vld [vmem:[%s8153_s17 + $0xb0] sm:$0xf] }
 0x17e   : > { %v1662_v39 = vadd.f32 %v1661_v36, %v1612_v33  ;;  %v6101_v19 = vor.u32 %v6735_v8, %v6100_v7  ;;  %v1187_v33 = vld [vmem:[#allocation2 + $0xe8] sm:$0xff] }
 0x17f   : > { %v1757_v37 = vadd.f32 %v1756_v32, %v1708_v31  ;;  %1807 = vmatmul.bf16.gmra.mxu0 %v8388_v50  ;;  %v6165_v32 = vor.u32 %v6751_v23, %v6164_v20 }
 0x180   : > { %1856 = vmatmul.bf16.gmra.mxu1 %v8390_v51  ;;  %2469 = vmatpush.bf16.msra.mxu0 %v6101_v19  ;;  %v6749_v19 = vld [vmem:[%s8153_s17 + $0xa4] sm:$0xf0] }
 0x181   : > { %v1991_v38 = vadd.f32 %v1757_v37, %v1183_v35  ;;  %1905 = vmatmul.bf16.gmra.mxu2 %v8392_v52  ;;  %2518 = vmatpush.bf16.msra.mxu1 %v6165_v32 }
 0x182   : > { %1954 = vmatmul.bf16.gmra.mxu3 %v8394_v53 }
 0x183   : > { %2023 = vst [vmem:[#allocation2 + $0x30] sm:$0xff] %v1991_v38  ;;  %v6220_v38 = vld [vmem:[%s8153_s17 + $0x120] sm:$0xf] }
 0x184   : > { %v1710_v57 = vpop.f32.mrf.mxu2  ;;  %v1614_v0 = vpop.f32.mrf.mxu0 }
 0x185   : > { %v1711_v62 = vadd.f32 %v1710_v57, %v1662_v39  ;;  %v1759_v63 = vpop.f32.mrf.mxu3  ;;  %v1663_v3 = vpop.f32.mrf.mxu1  ;;  %v6765_v39 = vld [vmem:[%s8153_s17 + $0x124] sm:$0xf0]  ;;  %v6284_v57 = vld [vmem:[%s8153_s17 + $0x1a0] sm:$0xf] }
 0x186   : > { %v1664_v6 = vadd.f32 %v1663_v3, %v1614_v0  ;;  %v6221_v56 = vor.u32 %v6765_v39, %v6220_v38  ;;  %v1189_v0 = vld [vmem:[#allocation2 + $0x60] sm:$0xff] }
 0x187   : > { %v1760_v4 = vadd.f32 %v1759_v63, %v1711_v62  ;;  %v6285_v63 = vor.u32 %v6781_v59, %v6284_v57 }
 0x188   : > { %2568 = vmatpush.bf16.msra.mxu2 %v6221_v56  ;;  %v6779_v56 = vld [vmem:[%s8153_s17 + $0x194] sm:$0xf0] }
 0x189   : > { %v1993_v5 = vadd.f32 %v1760_v4, %v1185_v2  ;;  %2617 = vmatpush.bf16.msra.mxu3 %v6285_v63 }
 0x18b   : > { %2025 = vst [vmem:[#allocation2 + $0x80] sm:$0xff] %v1993_v5  ;;  %v6092_v5 = vld [vmem:[%s8153_s17 + $0x20] sm:$0xf] }
 0x18c   : > { %v1712_v17 = vpop.f32.mrf.mxu2  ;;  %v1617_v31 = vpop.f32.mrf.mxu0 }
 0x18d   : > { %v1713_v29 = vadd.f32 %v1712_v17, %v1664_v6  ;;  %v1761_v30 = vpop.f32.mrf.mxu3  ;;  %v1666_v34 = vpop.f32.mrf.mxu1  ;;  %v6733_v6 = vld [vmem:[%s8153_s17 + $0x24] sm:$0xf0]  ;;  %v6156_v17 = vld [vmem:[%s8153_s17 + $0xa0] sm:$0xf] }
 0x18e   : > { %v1667_v37 = vadd.f32 %v1666_v34, %v1617_v31  ;;  %v6093_v8 = vor.u32 %v6733_v6, %v6092_v5  ;;  %v1191_v31 = vld [vmem:[#allocation2 + $0x8] sm:$0xff] }
 0x18f   : > { %v1762_v35 = vadd.f32 %v1761_v30, %v1713_v29  ;;  %1812 = vmatmul.bf16.gmra.mxu0 %v8416_v13  ;;  %v6157_v30 = vor.u32 %v6749_v19, %v6156_v17 }
 0x190   : > { %1861 = vmatmul.bf16.gmra.mxu1 %v8418_v14  ;;  %2470 = vmatpush.bf16.msra.mxu0 %v6093_v8  ;;  %v6747_v8 = vld [vmem:[%s8153_s17 + $0x94] sm:$0xf0] }
 0x191   : > { %v1995_v36 = vadd.f32 %v1762_v35, %v1187_v33  ;;  %1910 = vmatmul.bf16.gmra.mxu2 %v8420_v15  ;;  %2519 = vmatpush.bf16.msra.mxu1 %v6157_v30 }
 0x192   : > { %1959 = vmatmul.bf16.gmra.mxu3 %v8422_v16 }
 0x193   : > { %2027 = vst [vmem:[#allocation2 + $0xe8] sm:$0xff] %v1995_v36  ;;  %v6212_v36 = vld [vmem:[%s8153_s17 + $0x110] sm:$0xf] }
 0x194   : > { %v1715_v40 = vpop.f32.mrf.mxu2  ;;  %v1619_v62 = vpop.f32.mrf.mxu0 }
 0x195   : > { %v1716_v60 = vadd.f32 %v1715_v40, %v1667_v37  ;;  %v1764_v61 = vpop.f32.mrf.mxu3  ;;  %v1668_v1 = vpop.f32.mrf.mxu1  ;;  %v6763_v37 = vld [vmem:[%s8153_s17 + $0x114] sm:$0xf0]  ;;  %v6276_v40 = vld [vmem:[%s8153_s17 + $0x190] sm:$0xf] }
 0x196   : > { %v1669_v4 = vadd.f32 %v1668_v1, %v1619_v62  ;;  %v6213_v39 = vor.u32 %v6763_v37, %v6212_v36  ;;  %v1193_v62 = vld [vmem:[#allocation2 + $0x38] sm:$0xff] }
 0x197   : > { %v1765_v2 = vadd.f32 %v1764_v61, %v1716_v60  ;;  %v6277_v61 = vor.u32 %v6779_v56, %v6276_v40 }
 0x198   : > { %2569 = vmatpush.bf16.msra.mxu2 %v6213_v39  ;;  %v6777_v39 = vld [vmem:[%s8153_s17 + $0x184] sm:$0xf0] }
 0x199   : > { %v1997_v3 = vadd.f32 %v1765_v2, %v1189_v0  ;;  %2618 = vmatpush.bf16.msra.mxu3 %v6277_v61 }
 0x19b   : > { %2029 = vst [vmem:[#allocation2 + $0x60] sm:$0xff] %v1997_v3  ;;  %v6084_v3 = vld [vmem:[%s8153_s17 + $0x10] sm:$0xf] }
 0x19c   : > { %v1717_v7 = vpop.f32.mrf.mxu2  ;;  %v1622_v29 = vpop.f32.mrf.mxu0 }
 0x19d   : > { %v1718_v20 = vadd.f32 %v1717_v7, %v1669_v4  ;;  %v1766_v23 = vpop.f32.mrf.mxu3  ;;  %v1671_v32 = vpop.f32.mrf.mxu1  ;;  %v6731_v4 = vld [vmem:[%s8153_s17 + $0x14] sm:$0xf0]  ;;  %v6148_v7 = vld [vmem:[%s8153_s17 + $0x90] sm:$0xf] }
 0x19e   : > { %v1672_v35 = vadd.f32 %v1671_v32, %v1622_v29  ;;  %v6085_v6 = vor.u32 %v6731_v4, %v6084_v3  ;;  %v1195_v29 = vld [vmem:[#allocation2 + $0x40] sm:$0xff] }
 0x19f   : > { %v1767_v33 = vadd.f32 %v1766_v23, %v1718_v20  ;;  %1817 = vmatmul.bf16.gmra.mxu0 %v8444_v41  ;;  %v6149_v23 = vor.u32 %v6747_v8, %v6148_v7 }
 0x1a0   : > { %1866 = vmatmul.bf16.gmra.mxu1 %v8446_v42  ;;  %2471 = vmatpush.bf16.msra.mxu0 %v6085_v6  ;;  %v6745_v6 = vld [vmem:[%s8153_s17 + $0x84] sm:$0xf0] }
 0x1a1   : > { %v1999_v34 = vadd.f32 %v1767_v33, %v1191_v31  ;;  %1915 = vmatmul.bf16.gmra.mxu2 %v8448_v43  ;;  %2520 = vmatpush.bf16.msra.mxu1 %v6149_v23 }
 0x1a2   : > { %1964 = vmatmul.bf16.gmra.mxu3 %v8450_v44 }
 0x1a3   : > { %2031 = vst [vmem:[#allocation2 + $0x8] sm:$0xff] %v1999_v34  ;;  %v6204_v34 = vld [vmem:[%s8153_s17 + $0x100] sm:$0xf] }
 0x1a4   : > { %v1720_v38 = vpop.f32.mrf.mxu2  ;;  %v1624_v60 = vpop.f32.mrf.mxu0 }
 0x1a5   : > { %v1721_v57 = vadd.f32 %v1720_v38, %v1672_v35  ;;  %v1769_v59 = vpop.f32.mrf.mxu3  ;;  %v1673_v63 = vpop.f32.mrf.mxu1  ;;  %v6761_v35 = vld [vmem:[%s8153_s17 + $0x104] sm:$0xf0]  ;;  %v6268_v38 = vld [vmem:[%s8153_s17 + $0x180] sm:$0xf] }
 0x1a6   : > { %v1674_v2 = vadd.f32 %v1673_v63, %v1624_v60  ;;  %v6205_v37 = vor.u32 %v6761_v35, %v6204_v34  ;;  %v1197_v60 = vld [vmem:[#allocation2 + $0xe0] sm:$0xff] }
 0x1a7   : > { %v1770_v0 = vadd.f32 %v1769_v59, %v1721_v57  ;;  %v6269_v59 = vor.u32 %v6777_v39, %v6268_v38 }
 0x1a8   : > { %2570 = vmatpush.bf16.msra.mxu2 %v6205_v37  ;;  %v6326_v37 = vld [vmem:[%s8153_s17 + $0x1f8] sm:$0xf0] }
 0x1a9   : > { %v2001_v1 = vadd.f32 %v1770_v0, %v1193_v62  ;;  %2619 = vmatpush.bf16.msra.mxu3 %v6269_v59 }
 0x1ab   : > { %2033 = vst [vmem:[#allocation2 + $0x38] sm:$0xff] %v2001_v1  ;;  %v6076_v1 = vld [vmem:[%s8153_s17] sm:$0xf] }
 0x1ac   : > { %v1722_v5 = vpop.f32.mrf.mxu2  ;;  %v1627_v20 = vpop.f32.mrf.mxu0 }
 0x1ad   : > { %v1723_v17 = vadd.f32 %v1722_v5, %v1674_v2  ;;  %v1771_v19 = vpop.f32.mrf.mxu3  ;;  %v1676_v30 = vpop.f32.mrf.mxu1  ;;  %v6729_v2 = vld [vmem:[%s8153_s17 + $0x4] sm:$0xf0]  ;;  %v6140_v5 = vld [vmem:[%s8153_s17 + $0x80] sm:$0xf] }
 0x1ae   : > { %v1677_v33 = vadd.f32 %v1676_v30, %v1627_v20  ;;  %v6077_v4 = vor.u32 %v6729_v2, %v6076_v1  ;;  %v1199_v20 = vld [vmem:[#allocation2 + $0x70] sm:$0xff] }
 0x1af   : > { %v1772_v31 = vadd.f32 %v1771_v19, %v1723_v17  ;;  %1822 = vmatmul.bf16.gmra.mxu0 %v8472_v9  ;;  %v6141_v19 = vor.u32 %v6745_v6, %v6140_v5 }
 0x1b0   : > { %1871 = vmatmul.bf16.gmra.mxu1 %v8474_v10  ;;  %2472 = vmatpush.bf16.msra.mxu0 %v6077_v4  ;;  %v6198_v4 = vld [vmem:[%s8153_s17 + $0xf8] sm:$0xf0] }
 0x1b1   : > { %v2003_v32 = vadd.f32 %v1772_v31, %v1195_v29  ;;  %1920 = vmatmul.bf16.gmra.mxu2 %v8476_v11  ;;  %2521 = vmatpush.bf16.msra.mxu1 %v6141_v19 }
 0x1b2   : > { %1969 = vmatmul.bf16.gmra.mxu3 %v8478_v12 }
 0x1b3   : > { %2035 = vst [vmem:[#allocation2 + $0x40] sm:$0xff] %v2003_v32  ;;  %v6774_v32 = vld [vmem:[%s8153_s17 + $0x174] sm:$0xf] }
 0x1b4   : > { %v1725_v36 = vpop.f32.mrf.mxu2  ;;  %v1629_v57 = vpop.f32.mrf.mxu0 }
 0x1b5   : > { %v1726_v40 = vadd.f32 %v1725_v36, %v1677_v33  ;;  %v1774_v56 = vpop.f32.mrf.mxu3  ;;  %v1678_v61 = vpop.f32.mrf.mxu1  ;;  %v6262_v33 = vld [vmem:[%s8153_s17 + $0x178] sm:$0xf0]  ;;  %v6790_v36 = vld [vmem:[%s8153_s17 + $0x1f4] sm:$0xf] }
 0x1b6   : > { %v1679_v0 = vadd.f32 %v1678_v61, %v1629_v57  ;;  %v6265_v35 = vor.u32 %v6774_v32, %v6262_v33  ;;  %v1201_v57 = vld [vmem:[#allocation2 + $0xa8] sm:$0xff] }
 0x1b7   : > { %v1775_v62 = vadd.f32 %v1774_v56, %v1726_v40  ;;  %v6329_v56 = vor.u32 %v6790_v36, %v6326_v37 }
 0x1b8   : > { %2759 = vmatpush.bf16.msrb.mxu2 %v6265_v35  ;;  %v6318_v35 = vld [vmem:[%s8153_s17 + $0x1e8] sm:$0xf0] }
 0x1b9   : > { %v2005_v63 = vadd.f32 %v1775_v62, %v1197_v60  ;;  %2808 = vmatpush.bf16.msrb.mxu3 %v6329_v56 }
 0x1bb   : > { %2037 = vst [vmem:[#allocation2 + $0xe0] sm:$0xff] %v2005_v63  ;;  %v6742_v63 = vld [vmem:[%s8153_s17 + $0x74] sm:$0xf] }
 0x1bc   : > { %v1727_v3 = vpop.f32.mrf.mxu2  ;;  %v1632_v17 = vpop.f32.mrf.mxu0 }
 0x1bd   : > { %v1728_v7 = vadd.f32 %v1727_v3, %v1679_v0  ;;  %v1776_v8 = vpop.f32.mrf.mxu3  ;;  %v1681_v23 = vpop.f32.mrf.mxu1  ;;  %v6134_v0 = vld [vmem:[%s8153_s17 + $0x78] sm:$0xf0]  ;;  %v6758_v3 = vld [vmem:[%s8153_s17 + $0xf4] sm:$0xf] }
 0x1be   : > { %v1682_v31 = vadd.f32 %v1681_v23, %v1632_v17  ;;  %v6137_v2 = vor.u32 %v6742_v63, %v6134_v0  ;;  %v1203_v17 = vld [vmem:[#allocation2 + $0x10] sm:$0xff] }
 0x1bf   : > { %v1777_v29 = vadd.f32 %v1776_v8, %v1728_v7  ;;  %1827 = vmatmul.bf16.gmra.mxu0 %v8500_v45  ;;  %v6201_v8 = vor.u32 %v6758_v3, %v6198_v4 }
 0x1c0   : > { %1876 = vmatmul.bf16.gmra.mxu1 %v8502_v46  ;;  %2661 = vmatpush.bf16.msrb.mxu0 %v6137_v2  ;;  %v6190_v2 = vld [vmem:[%s8153_s17 + $0xe8] sm:$0xf0] }
 0x1c1   : > { %v2007_v30 = vadd.f32 %v1777_v29, %v1199_v20  ;;  %1925 = vmatmul.bf16.gmra.mxu2 %v8504_v47  ;;  %2710 = vmatpush.bf16.msrb.mxu1 %v6201_v8 }
 0x1c2   : > { %1974 = vmatmul.bf16.gmra.mxu3 %v8506_v48 }
 0x1c3   : > { %2039 = vst [vmem:[#allocation2 + $0x70] sm:$0xff] %v2007_v30  ;;  %v6772_v30 = vld [vmem:[%s8153_s17 + $0x164] sm:$0xf] }
 0x1c4   : > { %v1730_v34 = vpop.f32.mrf.mxu2  ;;  %v1634_v40 = vpop.f32.mrf.mxu0 }
 0x1c5   : > { %v1731_v38 = vadd.f32 %v1730_v34, %v1682_v31  ;;  %v1779_v39 = vpop.f32.mrf.mxu3  ;;  %v1683_v59 = vpop.f32.mrf.mxu1  ;;  %v6254_v31 = vld [vmem:[%s8153_s17 + $0x168] sm:$0xf0]  ;;  %v6788_v34 = vld [vmem:[%s8153_s17 + $0x1e4] sm:$0xf] }
 0x1c6   : > { %v1684_v62 = vadd.f32 %v1683_v59, %v1634_v40  ;;  %v6257_v33 = vor.u32 %v6772_v30, %v6254_v31  ;;  %v1205_v40 = vld [vmem:[#allocation2 + $0xa0] sm:$0xff] }
 0x1c7   : > { %v1780_v60 = vadd.f32 %v1779_v39, %v1731_v38  ;;  %v6321_v39 = vor.u32 %v6788_v34, %v6318_v35 }
 0x1c8   : > { %2760 = vmatpush.bf16.msrb.mxu2 %v6257_v33  ;;  %v6310_v33 = vld [vmem:[%s8153_s17 + $0x1d8] sm:$0xf0] }
 0x1c9   : > { %v2009_v61 = vadd.f32 %v1780_v60, %v1201_v57  ;;  %2809 = vmatpush.bf16.msrb.mxu3 %v6321_v39 }
 0x1cb   : > { %2041 = vst [vmem:[#allocation2 + $0xa8] sm:$0xff] %v2009_v61  ;;  %v6740_v61 = vld [vmem:[%s8153_s17 + $0x64] sm:$0xf] }
 0x1cc   : > { %v1732_v1 = vpop.f32.mrf.mxu2  ;;  %v1637_v7 = vpop.f32.mrf.mxu0 }
 0x1cd   : > { %v1733_v5 = vadd.f32 %v1732_v1, %v1684_v62  ;;  %v1781_v6 = vpop.f32.mrf.mxu3  ;;  %v1686_v19 = vpop.f32.mrf.mxu1  ;;  %v6126_v62 = vld [vmem:[%s8153_s17 + $0x68] sm:$0xf0]  ;;  %v6756_v1 = vld [vmem:[%s8153_s17 + $0xe4] sm:$0xf] }
 0x1ce   : > { %v1687_v29 = vadd.f32 %v1686_v19, %v1637_v7  ;;  %v6129_v0 = vor.u32 %v6740_v61, %v6126_v62  ;;  %v1207_v7 = vld [vmem:[#allocation2 + $0x20] sm:$0xff] }
 0x1cf   : > { %v1782_v20 = vadd.f32 %v1781_v6, %v1733_v5  ;;  %1832 = vmatmul.bf16.gmra.mxu0 %v8527_v18  ;;  %v6193_v6 = vor.u32 %v6756_v1, %v6190_v2 }
 0x1d0   : > { %1881 = vmatmul.bf16.gmra.mxu1 %v8530_v21  ;;  %2662 = vmatpush.bf16.msrb.mxu0 %v6129_v0  ;;  %v6182_v0 = vld [vmem:[%s8153_s17 + $0xd8] sm:$0xf0] }
 0x1d1   : > { %v2011_v23 = vadd.f32 %v1782_v20, %v1203_v17  ;;  %1930 = vmatmul.bf16.gmra.mxu2 %v8532_v22  ;;  %2711 = vmatpush.bf16.msrb.mxu1 %v6193_v6 }
 0x1d2   : > { %1979 = vmatmul.bf16.gmra.mxu3 %v8534_v24 }
 0x1d3   : > { %2043 = vst [vmem:[#allocation2 + $0x10] sm:$0xff] %v2011_v23  ;;  %v6770_v23 = vld [vmem:[%s8153_s17 + $0x154] sm:$0xf] }
 0x1d4   : > { %v1735_v32 = vpop.f32.mrf.mxu2  ;;  %v1639_v38 = vpop.f32.mrf.mxu0 }
 0x1d5   : > { %v1736_v36 = vadd.f32 %v1735_v32, %v1687_v29  ;;  %v1784_v37 = vpop.f32.mrf.mxu3  ;;  %v1688_v56 = vpop.f32.mrf.mxu1  ;;  %v6246_v29 = vld [vmem:[%s8153_s17 + $0x158] sm:$0xf0]  ;;  %v6786_v32 = vld [vmem:[%s8153_s17 + $0x1d4] sm:$0xf] }
 0x1d6   : > { %v1689_v60 = vadd.f32 %v1688_v56, %v1639_v38  ;;  %v6249_v31 = vor.u32 %v6770_v23, %v6246_v29  ;;  %v1178_v38 = vld [vmem:[#allocation2] sm:$0xff] }
 0x1d7   : > { %v1785_v57 = vadd.f32 %v1784_v37, %v1736_v36  ;;  %v6313_v37 = vor.u32 %v6786_v32, %v6310_v33 }
 0x1d8   : > { %2761 = vmatpush.bf16.msrb.mxu2 %v6249_v31  ;;  %v6302_v31 = vld [vmem:[%s8153_s17 + $0x1c8] sm:$0xf0] }
 0x1d9   : > { %v2013_v59 = vadd.f32 %v1785_v57, %v1205_v40  ;;  %2810 = vmatpush.bf16.msrb.mxu3 %v6313_v37 }
 0x1db   : > { %2045 = vst [vmem:[#allocation2 + $0xa0] sm:$0xff] %v2013_v59  ;;  %v6738_v59 = vld [vmem:[%s8153_s17 + $0x54] sm:$0xf] }
 0x1dc   : > { %v1737_v63 = vpop.f32.mrf.mxu2  ;;  %v1798_v5 = vpop.f32.mrf.mxu0 }
 0x1dd   : > { %v1738_v3 = vadd.f32 %v1737_v63, %v1689_v60  ;;  %v1786_v4 = vpop.f32.mrf.mxu3  ;;  %v1847_v8 = vpop.f32.mrf.mxu1  ;;  %v6118_v60 = vld [vmem:[%s8153_s17 + $0x58] sm:$0xf0]  ;;  %v6754_v63 = vld [vmem:[%s8153_s17 + $0xd4] sm:$0xf] }
 0x1de   : > { %v1848_v20 = vadd.f32 %v1847_v8, %v1798_v5  ;;  %v6121_v62 = vor.u32 %v6738_v59, %v6118_v60  ;;  %v1180_v5 = vld [vmem:[#allocation2 + $0x18] sm:$0xff] }
 0x1df   : > { %v1787_v17 = vadd.f32 %v1786_v4, %v1738_v3  ;;  %2473 = vmatmul.bf16.vlgmr.msra.gmra.mxu0 %v8323_v49  ;;  %v6185_v4 = vor.u32 %v6754_v63, %v6182_v0 }
 0x1e0   : > { %2522 = vmatmul.bf16.vlgmr.msra.gmra.mxu1 %v8328_v54  ;;  %2663 = vmatpush.bf16.msrb.mxu0 %v6121_v62  ;;  %v6174_v62 = vld [vmem:[%s8153_s17 + $0xc8] sm:$0xf0] }
 0x1e1   : > { %v2015_v19 = vadd.f32 %v1787_v17, %v1207_v7  ;;  %2571 = vmatmul.bf16.vlgmr.msra.gmra.mxu2 %v8330_v55  ;;  %2712 = vmatpush.bf16.msrb.mxu1 %v6185_v4 }
 0x1e2   : > { %2620 = vmatmul.bf16.vlgmr.msra.gmra.mxu3 %v8334_v58 }
 0x1e3   : > { %2047 = vst [vmem:[#allocation2 + $0x20] sm:$0xff] %v2015_v19  ;;  %v6768_v19 = vld [vmem:[%s8153_s17 + $0x144] sm:$0xf] }
 0x1e4   : > { %v1896_v30 = vpop.f32.mrf.mxu2  ;;  %v1800_v36 = vpop.f32.mrf.mxu0 }
 0x1e5   : > { %v1897_v34 = vadd.f32 %v1896_v30, %v1848_v20  ;;  %v1945_v35 = vpop.f32.mrf.mxu3  ;;  %v1849_v39 = vpop.f32.mrf.mxu1  ;;  %v6238_v20 = vld [vmem:[%s8153_s17 + $0x148] sm:$0xf0]  ;;  %v6784_v30 = vld [vmem:[%s8153_s17 + $0x1c4] sm:$0xf] }
 0x1e6   : > { %v1850_v57 = vadd.f32 %v1849_v39, %v1800_v36  ;;  %v6241_v29 = vor.u32 %v6768_v19, %v6238_v20  ;;  %v1182_v36 = vld [vmem:[#allocation2 + $0x68] sm:$0xff] }
 0x1e7   : > { %v1946_v40 = vadd.f32 %v1945_v35, %v1897_v34  ;;  %v6305_v35 = vor.u32 %v6784_v30, %v6302_v31 }
 0x1e8   : > { %2762 = vmatpush.bf16.msrb.mxu2 %v6241_v29  ;;  %v6294_v29 = vld [vmem:[%s8153_s17 + $0x1b8] sm:$0xf0] }
 0x1e9   : > { %v1986_v56 = vadd.f32 %v1946_v40, %v1178_v38  ;;  %2811 = vmatpush.bf16.msrb.mxu3 %v6305_v35 }
 0x1eb   : > { %2018 = vst [vmem:[#allocation2] sm:$0xff] %v1986_v56  ;;  %v6736_v56 = vld [vmem:[%s8153_s17 + $0x44] sm:$0xf] }
 0x1ec   : > { %v1898_v61 = vpop.f32.mrf.mxu2  ;;  %v1803_v3 = vpop.f32.mrf.mxu0 }
 0x1ed   : > { %v1899_v1 = vadd.f32 %v1898_v61, %v1850_v57  ;;  %v1947_v2 = vpop.f32.mrf.mxu3  ;;  %v1852_v6 = vpop.f32.mrf.mxu1  ;;  %v6110_v57 = vld [vmem:[%s8153_s17 + $0x48] sm:$0xf0]  ;;  %v6752_v61 = vld [vmem:[%s8153_s17 + $0xc4] sm:$0xf] }
 0x1ee   : > { %v1853_v17 = vadd.f32 %v1852_v6, %v1803_v3  ;;  %v6113_v60 = vor.u32 %v6736_v56, %v6110_v57  ;;  %v1184_v3 = vld [vmem:[#allocation2 + $0x48] sm:$0xff] }
 0x1ef   : > { %v1948_v7 = vadd.f32 %v1947_v2, %v1899_v1  ;;  %2478 = vmatmul.bf16.gmra.mxu0 %v8360_v25  ;;  %v6177_v2 = vor.u32 %v6752_v61, %v6174_v62 }
 0x1f0   : > { %2527 = vmatmul.bf16.gmra.mxu1 %v8362_v26  ;;  %2664 = vmatpush.bf16.msrb.mxu0 %v6113_v60  ;;  %v6166_v60 = vld [vmem:[%s8153_s17 + $0xb8] sm:$0xf0] }
 0x1f1   : > { %v1988_v8 = vadd.f32 %v1948_v7, %v1180_v5  ;;  %2576 = vmatmul.bf16.gmra.mxu2 %v8364_v27  ;;  %2713 = vmatpush.bf16.msrb.mxu1 %v6177_v2 }
 0x1f2   : > { %2625 = vmatmul.bf16.gmra.mxu3 %v8366_v28 }
 0x1f3   : > { %2020 = vst [vmem:[#allocation2 + $0x18] sm:$0xff] %v1988_v8  ;;  %v6766_v8 = vld [vmem:[%s8153_s17 + $0x134] sm:$0xf] }
 0x1f4   : > { %v1901_v23 = vpop.f32.mrf.mxu2  ;;  %v1805_v34 = vpop.f32.mrf.mxu0 }
 0x1f5   : > { %v1902_v32 = vadd.f32 %v1901_v23, %v1853_v17  ;;  %v1950_v33 = vpop.f32.mrf.mxu3  ;;  %v1854_v37 = vpop.f32.mrf.mxu1  ;;  %v6230_v17 = vld [vmem:[%s8153_s17 + $0x138] sm:$0xf0]  ;;  %v6782_v23 = vld [vmem:[%s8153_s17 + $0x1b4] sm:$0xf] }
 0x1f6   : > { %v1855_v40 = vadd.f32 %v1854_v37, %v1805_v34  ;;  %v6233_v20 = vor.u32 %v6766_v8, %v6230_v17  ;;  %v1186_v34 = vld [vmem:[#allocation2 + $0x88] sm:$0xff] }
 0x1f7   : > { %v1951_v38 = vadd.f32 %v1950_v33, %v1902_v32  ;;  %v6297_v33 = vor.u32 %v6782_v23, %v6294_v29 }
 0x1f8   : > { %2763 = vmatpush.bf16.msrb.mxu2 %v6233_v20  ;;  %v6286_v20 = vld [vmem:[%s8153_s17 + $0x1a8] sm:$0xf0] }
 0x1f9   : > { %v1990_v39 = vadd.f32 %v1951_v38, %v1182_v36  ;;  %2812 = vmatpush.bf16.msrb.mxu3 %v6297_v33 }
 0x1fb   : > { %2022 = vst [vmem:[#allocation2 + $0x68] sm:$0xff] %v1990_v39  ;;  %v6734_v39 = vld [vmem:[%s8153_s17 + $0x34] sm:$0xf] }
 0x1fc   : > { %v1903_v59 = vpop.f32.mrf.mxu2  ;;  %v1808_v1 = vpop.f32.mrf.mxu0 }
 0x1fd   : > { %v1904_v63 = vadd.f32 %v1903_v59, %v1855_v40  ;;  %v1952_v0 = vpop.f32.mrf.mxu3  ;;  %v1857_v4 = vpop.f32.mrf.mxu1  ;;  %v6102_v40 = vld [vmem:[%s8153_s17 + $0x38] sm:$0xf0]  ;;  %v6750_v59 = vld [vmem:[%s8153_s17 + $0xb4] sm:$0xf] }
 0x1fe   : > { %v1858_v7 = vadd.f32 %v1857_v4, %v1808_v1  ;;  %v6105_v57 = vor.u32 %v6734_v39, %v6102_v40  ;;  %v1188_v1 = vld [vmem:[#allocation2 + $0xb8] sm:$0xff] }
 0x1ff   : > { %v1953_v5 = vadd.f32 %v1952_v0, %v1904_v63  ;;  %2483 = vmatmul.bf16.gmra.mxu0 %v8388_v50  ;;  %v6169_v0 = vor.u32 %v6750_v59, %v6166_v60 }
 0x200   : > { %2532 = vmatmul.bf16.gmra.mxu1 %v8390_v51  ;;  %2665 = vmatpush.bf16.msrb.mxu0 %v6105_v57  ;;  %v6158_v57 = vld [vmem:[%s8153_s17 + $0xa8] sm:$0xf0] }
 0x201   : > { %v1992_v6 = vadd.f32 %v1953_v5, %v1184_v3  ;;  %2581 = vmatmul.bf16.gmra.mxu2 %v8392_v52  ;;  %2714 = vmatpush.bf16.msrb.mxu1 %v6169_v0 }
 0x202   : > { %2630 = vmatmul.bf16.gmra.mxu3 %v8394_v53 }
 0x203   : > { %2024 = vst [vmem:[#allocation2 + $0x48] sm:$0xff] %v1992_v6  ;;  %v6764_v6 = vld [vmem:[%s8153_s17 + $0x124] sm:$0xf] }
 0x204   : > { %v1906_v19 = vpop.f32.mrf.mxu2  ;;  %v1810_v32 = vpop.f32.mrf.mxu0 }
 0x205   : > { %v1907_v30 = vadd.f32 %v1906_v19, %v1858_v7  ;;  %v1955_v31 = vpop.f32.mrf.mxu3  ;;  %v1859_v35 = vpop.f32.mrf.mxu1  ;;  %v6222_v7 = vld [vmem:[%s8153_s17 + $0x128] sm:$0xf0]  ;;  %v6780_v19 = vld [vmem:[%s8153_s17 + $0x1a4] sm:$0xf] }
 0x206   : > { %v1860_v38 = vadd.f32 %v1859_v35, %v1810_v32  ;;  %v6225_v17 = vor.u32 %v6764_v6, %v6222_v7  ;;  %v1190_v32 = vld [vmem:[#allocation2 + $0xf0] sm:$0xff] }
 0x207   : > { %v1956_v36 = vadd.f32 %v1955_v31, %v1907_v30  ;;  %v6289_v31 = vor.u32 %v6780_v19, %v6286_v20 }
 0x208   : > { %2764 = vmatpush.bf16.msrb.mxu2 %v6225_v17  ;;  %v6278_v17 = vld [vmem:[%s8153_s17 + $0x198] sm:$0xf0] }
 0x209   : > { %v1994_v37 = vadd.f32 %v1956_v36, %v1186_v34  ;;  %2813 = vmatpush.bf16.msrb.mxu3 %v6289_v31 }
 0x20b   : > { %2026 = vst [vmem:[#allocation2 + $0x88] sm:$0xff] %v1994_v37  ;;  %v6732_v37 = vld [vmem:[%s8153_s17 + $0x24] sm:$0xf] }
 0x20c   : > { %v1908_v56 = vpop.f32.mrf.mxu2  ;;  %v1813_v63 = vpop.f32.mrf.mxu0 }
 0x20d   : > { %v1909_v61 = vadd.f32 %v1908_v56, %v1860_v38  ;;  %v1957_v62 = vpop.f32.mrf.mxu3  ;;  %v1862_v2 = vpop.f32.mrf.mxu1  ;;  %v6094_v38 = vld [vmem:[%s8153_s17 + $0x28] sm:$0xf0]  ;;  %v6748_v56 = vld [vmem:[%s8153_s17 + $0xa4] sm:$0xf] }
 0x20e   : > { %v1863_v5 = vadd.f32 %v1862_v2, %v1813_v63  ;;  %v6097_v40 = vor.u32 %v6732_v37, %v6094_v38  ;;  %v1192_v63 = vld [vmem:[#allocation2 + $0x78] sm:$0xff] }
 0x20f   : > { %v1958_v3 = vadd.f32 %v1957_v62, %v1909_v61  ;;  %2488 = vmatmul.bf16.gmra.mxu0 %v8416_v13  ;;  %v6161_v62 = vor.u32 %v6748_v56, %v6158_v57 }
 0x210   : > { %2537 = vmatmul.bf16.gmra.mxu1 %v8418_v14  ;;  %2666 = vmatpush.bf16.msrb.mxu0 %v6097_v40  ;;  %v6150_v40 = vld [vmem:[%s8153_s17 + $0x98] sm:$0xf0] }
 0x211   : > { %v1996_v4 = vadd.f32 %v1958_v3, %v1188_v1  ;;  %2586 = vmatmul.bf16.gmra.mxu2 %v8420_v15  ;;  %2715 = vmatpush.bf16.msrb.mxu1 %v6161_v62 }
 0x212   : > { %2635 = vmatmul.bf16.gmra.mxu3 %v8422_v16 }
 0x213   : > { %2028 = vst [vmem:[#allocation2 + $0xb8] sm:$0xff] %v1996_v4  ;;  %v6762_v4 = vld [vmem:[%s8153_s17 + $0x114] sm:$0xf] }
 0x214   : > { %v1911_v8 = vpop.f32.mrf.mxu2  ;;  %v1815_v30 = vpop.f32.mrf.mxu0 }
 0x215   : > { %v1912_v23 = vadd.f32 %v1911_v8, %v1863_v5  ;;  %v1960_v29 = vpop.f32.mrf.mxu3  ;;  %v1864_v33 = vpop.f32.mrf.mxu1  ;;  %v6214_v5 = vld [vmem:[%s8153_s17 + $0x118] sm:$0xf0]  ;;  %v6778_v8 = vld [vmem:[%s8153_s17 + $0x194] sm:$0xf] }
 0x216   : > { %v1865_v36 = vadd.f32 %v1864_v33, %v1815_v30  ;;  %v6217_v7 = vor.u32 %v6762_v4, %v6214_v5  ;;  %v1194_v30 = vld [vmem:[#allocation2 + $0x58] sm:$0xff] }
 0x217   : > { %v1961_v34 = vadd.f32 %v1960_v29, %v1912_v23  ;;  %v6281_v29 = vor.u32 %v6778_v8, %v6278_v17 }
 0x218   : > { %2765 = vmatpush.bf16.msrb.mxu2 %v6217_v7  ;;  %v6270_v7 = vld [vmem:[%s8153_s17 + $0x188] sm:$0xf0] }
 0x219   : > { %v1998_v35 = vadd.f32 %v1961_v34, %v1190_v32  ;;  %2814 = vmatpush.bf16.msrb.mxu3 %v6281_v29 }
 0x21b   : > { %2030 = vst [vmem:[#allocation2 + $0xf0] sm:$0xff] %v1998_v35  ;;  %v6730_v35 = vld [vmem:[%s8153_s17 + $0x14] sm:$0xf] }
 0x21c   : > { %v1913_v39 = vpop.f32.mrf.mxu2  ;;  %v1818_v61 = vpop.f32.mrf.mxu0 }
 0x21d   : > { %v1914_v59 = vadd.f32 %v1913_v39, %v1865_v36  ;;  %v1962_v60 = vpop.f32.mrf.mxu3  ;;  %v1867_v0 = vpop.f32.mrf.mxu1  ;;  %v6086_v36 = vld [vmem:[%s8153_s17 + $0x18] sm:$0xf0]  ;;  %v6746_v39 = vld [vmem:[%s8153_s17 + $0x94] sm:$0xf] }
 0x21e   : > { %v1868_v3 = vadd.f32 %v1867_v0, %v1818_v61  ;;  %v6089_v38 = vor.u32 %v6730_v35, %v6086_v36  ;;  %v1196_v61 = vld [vmem:[#allocation2 + $0xc8] sm:$0xff] }
 0x21f   : > { %v1963_v1 = vadd.f32 %v1962_v60, %v1914_v59  ;;  %2493 = vmatmul.bf16.gmra.mxu0 %v8444_v41  ;;  %v6153_v60 = vor.u32 %v6746_v39, %v6150_v40 }
 0x220   : > { %2542 = vmatmul.bf16.gmra.mxu1 %v8446_v42  ;;  %2667 = vmatpush.bf16.msrb.mxu0 %v6089_v38  ;;  %v6142_v38 = vld [vmem:[%s8153_s17 + $0x88] sm:$0xf0] }
 0x221   : > { %v2000_v2 = vadd.f32 %v1963_v1, %v1192_v63  ;;  %2591 = vmatmul.bf16.gmra.mxu2 %v8448_v43  ;;  %2716 = vmatpush.bf16.msrb.mxu1 %v6153_v60 }
 0x222   : > { %2640 = vmatmul.bf16.gmra.mxu3 %v8450_v44 }
 0x223   : > { %2032 = vst [vmem:[#allocation2 + $0x78] sm:$0xff] %v2000_v2  ;;  %v6760_v2 = vld [vmem:[%s8153_s17 + $0x104] sm:$0xf] }
 0x224   : > { %v1916_v6 = vpop.f32.mrf.mxu2  ;;  %v1820_v23 = vpop.f32.mrf.mxu0 }
 0x225   : > { %v1917_v19 = vadd.f32 %v1916_v6, %v1868_v3  ;;  %v1965_v20 = vpop.f32.mrf.mxu3  ;;  %v1869_v31 = vpop.f32.mrf.mxu1  ;;  %v6206_v3 = vld [vmem:[%s8153_s17 + $0x108] sm:$0xf0]  ;;  %v6776_v6 = vld [vmem:[%s8153_s17 + $0x184] sm:$0xf] }
 0x226   : > { %v1870_v34 = vadd.f32 %v1869_v31, %v1820_v23  ;;  %v6209_v5 = vor.u32 %v6760_v2, %v6206_v3  ;;  %v1198_v23 = vld [vmem:[#allocation2 + $0x90] sm:$0xff] }
 0x227   : > { %v1966_v32 = vadd.f32 %v1965_v20, %v1917_v19  ;;  %v6273_v20 = vor.u32 %v6776_v6, %v6270_v7 }
 0x228   : > { %2766 = vmatpush.bf16.msrb.mxu2 %v6209_v5 }
 0x229   : > { %v2002_v33 = vadd.f32 %v1966_v32, %v1194_v30  ;;  %2815 = vmatpush.bf16.msrb.mxu3 %v6273_v20 }
 0x22b   : > { %2034 = vst [vmem:[#allocation2 + $0x58] sm:$0xff] %v2002_v33  ;;  %v6728_v33 = vld [vmem:[%s8153_s17 + $0x4] sm:$0xf] }
 0x22c   : > { %v1918_v37 = vpop.f32.mrf.mxu2  ;;  %v1823_v59 = vpop.f32.mrf.mxu0 }
 0x22d   : > { %v1919_v56 = vadd.f32 %v1918_v37, %v1870_v34  ;;  %v1967_v57 = vpop.f32.mrf.mxu3  ;;  %v1872_v62 = vpop.f32.mrf.mxu1  ;;  %v6078_v34 = vld [vmem:[%s8153_s17 + $0x8] sm:$0xf0]  ;;  %v6744_v37 = vld [vmem:[%s8153_s17 + $0x84] sm:$0xf] }
 0x22e   : > { %v1873_v1 = vadd.f32 %v1872_v62, %v1823_v59  ;;  %v6081_v36 = vor.u32 %v6728_v33, %v6078_v34  ;;  %v1200_v59 = vld [vmem:[#allocation2 + $0xc0] sm:$0xff] }
 0x22f   : > { %v1968_v63 = vadd.f32 %v1967_v57, %v1919_v56  ;;  %2498 = vmatmul.bf16.gmra.mxu0 %v8472_v9  ;;  %v6145_v57 = vor.u32 %v6744_v37, %v6142_v38  ;;  %v1206_v38 = vld [vmem:[#allocation2 + $0xf8] sm:$0xff] }
 0x230   : > { %2547 = vmatmul.bf16.gmra.mxu1 %v8474_v10  ;;  %2668 = vmatpush.bf16.msrb.mxu0 %v6081_v36 }
 0x231   : > { %v2004_v0 = vadd.f32 %v1968_v63, %v1196_v61  ;;  %2596 = vmatmul.bf16.gmra.mxu2 %v8476_v11  ;;  %2717 = vmatpush.bf16.msrb.mxu1 %v6145_v57 }
 0x232   : > { %2645 = vmatmul.bf16.gmra.mxu3 %v8478_v12 }
 0x233   : > { %2036 = vst [vmem:[#allocation2 + $0xc8] sm:$0xff] %v2004_v0 }
 0x234   : > { %v1921_v4 = vpop.f32.mrf.mxu2  ;;  %v1825_v19 = vpop.f32.mrf.mxu0 }
 0x235   : > { %v1922_v8 = vadd.f32 %v1921_v4, %v1873_v1  ;;  %v1970_v17 = vpop.f32.mrf.mxu3  ;;  %v1874_v29 = vpop.f32.mrf.mxu1  ;;  %v1202_v4 = vld [vmem:[#allocation2 + $0xd0] sm:$0xff] }
 0x236   : > { %v1875_v32 = vadd.f32 %v1874_v29, %v1825_v19  ;;  %v1204_v29 = vld [vmem:[#allocation2 + $0x28] sm:$0xff] }
 0x237   : > { %v1971_v30 = vadd.f32 %v1970_v17, %v1922_v8 }
 0x239   : > { %v2006_v31 = vadd.f32 %v1971_v30, %v1198_v23 }
 0x23b   : > { %2038 = vst [vmem:[#allocation2 + $0x90] sm:$0xff] %v2006_v31 }
 0x23c   : > { %v1923_v35 = vpop.f32.mrf.mxu2  ;;  %v1828_v56 = vpop.f32.mrf.mxu0 }
 0x23d   : > { %v1924_v39 = vadd.f32 %v1923_v35, %v1875_v32  ;;  %v1972_v40 = vpop.f32.mrf.mxu3  ;;  %v1877_v60 = vpop.f32.mrf.mxu1 }
 0x23e   : > { %v1878_v63 = vadd.f32 %v1877_v60, %v1828_v56 }
 0x23f   : > { %v1973_v61 = vadd.f32 %v1972_v40, %v1924_v39  ;;  %2503 = vmatmul.bf16.gmra.mxu0 %v8500_v45 }
 0x240   : > { %2552 = vmatmul.bf16.gmra.mxu1 %v8502_v46 }
 0x241   : > { %v2008_v62 = vadd.f32 %v1973_v61, %v1200_v59  ;;  %2601 = vmatmul.bf16.gmra.mxu2 %v8504_v47 }
 0x242   : > { %2650 = vmatmul.bf16.gmra.mxu3 %v8506_v48 }
 0x243   : > { %2040 = vst [vmem:[#allocation2 + $0xc0] sm:$0xff] %v2008_v62 }
 0x244   : > { %v1926_v0 = vpop.f32.mrf.mxu2  ;;  %v1830_v3 = vpop.f32.mrf.mxu0 }
 0x245   : > { %v1927_v1 = vadd.f32 %v1926_v0, %v1878_v63  ;;  %v1975_v2 = vpop.f32.mrf.mxu3  ;;  %v1879_v5 = vpop.f32.mrf.mxu1  ;;  %v1208_v63 = vld [vmem:[#allocation2 + $0x98] sm:$0xff] }
 0x246   : > { %v1880_v8 = vadd.f32 %v1879_v5, %v1830_v3 }
 0x247   : > { %v1976_v6 = vadd.f32 %v1975_v2, %v1927_v1 }
 0x249   : > { %v2010_v7 = vadd.f32 %v1976_v6, %v1202_v4 }
 0x24b   : > { %2042 = vst [vmem:[#allocation2 + $0xd0] sm:$0xff] %v2010_v7 }
 0x24c   : > { %v1928_v17 = vpop.f32.mrf.mxu2  ;;  %v1833_v23 = vpop.f32.mrf.mxu0 }
 0x24d   : > { %v1929_v19 = vadd.f32 %v1928_v17, %v1880_v8  ;;  %v1977_v20 = vpop.f32.mrf.mxu3  ;;  %v1882_v30 = vpop.f32.mrf.mxu1  ;;  %v2049_v8 = vld [vmem:[#allocation3 + $0x80] sm:$0xff] }
 0x24e   : > { %v1883_v33 = vadd.f32 %v1882_v30, %v1833_v23 }
 0x24f   : > { %v1978_v31 = vadd.f32 %v1977_v20, %v1929_v19  ;;  %2508 = vmatmul.bf16.gmra.mxu0 %v8527_v18 }
 0x250   : > { %2557 = vmatmul.bf16.gmra.mxu1 %v8530_v21 }
 0x251   : > { %v2012_v32 = vadd.f32 %v1978_v31, %v1204_v29  ;;  %2606 = vmatmul.bf16.gmra.mxu2 %v8532_v22 }
 0x252   : > { %2655 = vmatmul.bf16.gmra.mxu3 %v8534_v24 }
 0x253   : > { %2044 = vst [vmem:[#allocation2 + $0x28] sm:$0xff] %v2012_v32 }
 0x254   : > { %v1931_v34 = vpop.f32.mrf.mxu2  ;;  %v1835_v37 = vpop.f32.mrf.mxu0 }
 0x255   : > { %v1932_v35 = vadd.f32 %v1931_v34, %v1883_v33  ;;  %v1980_v36 = vpop.f32.mrf.mxu3  ;;  %v1884_v39 = vpop.f32.mrf.mxu1 }
 0x256   : > { %v1885_v57 = vadd.f32 %v1884_v39, %v1835_v37 }
 0x257   : > { %v1981_v40 = vadd.f32 %v1980_v36, %v1932_v35 }
 0x259   : > { %v2014_v56 = vadd.f32 %v1981_v40, %v1206_v38  ;;  %v2053_v38 = vld [vmem:[#allocation3 + $0x8] sm:$0xff] }
 0x25b   : > { %2046 = vst [vmem:[#allocation2 + $0xf8] sm:$0xff] %v2014_v56 }
 0x25c   : > { %v1933_v59 = vpop.f32.mrf.mxu2  ;;  %v2474_v62 = vpop.f32.mrf.mxu0 }
 0x25d   : > { %v1934_v60 = vadd.f32 %v1933_v59, %v1885_v57  ;;  %v1982_v61 = vpop.f32.mrf.mxu3  ;;  %v2523_v0 = vpop.f32.mrf.mxu1 }
 0x25e   : > { %v2524_v3 = vadd.f32 %v2523_v0, %v2474_v62 }
 0x25f   : > { %v1983_v1 = vadd.f32 %v1982_v61, %v1934_v60  ;;  %2669 = vmatmul.bf16.vlgmr.msrb.gmra.mxu0 %v8323_v49 }
 0x260   : > { %2718 = vmatmul.bf16.vlgmr.msrb.gmra.mxu1 %v8328_v54  ;;  %v2051_v54 = vld [vmem:[#allocation3 + $0xe8] sm:$0xff] }
 0x261   : > { %v2016_v2 = vadd.f32 %v1983_v1, %v1208_v63  ;;  %2767 = vmatmul.bf16.vlgmr.msrb.gmra.mxu2 %v8330_v55 }
 0x262   : > { %2816 = vmatmul.bf16.vlgmr.msrb.gmra.mxu3 %v8334_v58 }
 0x263   : > { %2048 = vst [vmem:[#allocation2 + $0x98] sm:$0xff] %v2016_v2 }
 0x264   : > { %v2572_v4 = vpop.f32.mrf.mxu2  ;;  %v2476_v7 = vpop.f32.mrf.mxu0 }
 0x265   : > { %v2573_v5 = vadd.f32 %v2572_v4, %v2524_v3  ;;  %v2621_v6 = vpop.f32.mrf.mxu3  ;;  %v2525_v17 = vpop.f32.mrf.mxu1  ;;  %v2057_v4 = vld [vmem:[#allocation3 + $0xd0] sm:$0xff] }
 0x266   : > { %v2526_v23 = vadd.f32 %v2525_v17, %v2476_v7 }
 0x267   : > { %v2622_v19 = vadd.f32 %v2621_v6, %v2573_v5 }
 0x269   : > { %v2857_v20 = vadd.f32 %v2622_v19, %v2049_v8 }
 0x26b   : > { %2889 = vst [vmem:[#allocation3 + $0x80] sm:$0xff] %v2857_v20 }
 0x26c   : > { %v2574_v49 = vpop.f32.mrf.mxu2  ;;  %v2479_v31 = vpop.f32.mrf.mxu0 }
 0x26d   : > { %v2575_v29 = vadd.f32 %v2574_v49, %v2526_v23  ;;  %v2623_v30 = vpop.f32.mrf.mxu3  ;;  %v2528_v32 = vpop.f32.mrf.mxu1 }
 0x26e   : > { %v2529_v33 = vadd.f32 %v2528_v32, %v2479_v31  ;;  %v2061_v32 = vld [vmem:[#allocation3 + $0xe0] sm:$0xff] }
 0x26f   : > { %v2624_v55 = vadd.f32 %v2623_v30, %v2575_v29  ;;  %2674 = vmatmul.bf16.gmra.mxu0 %v8360_v25 }
 0x270   : > { %2723 = vmatmul.bf16.gmra.mxu1 %v8362_v26  ;;  %v2055_v26 = vld [vmem:[#allocation3 + $0x58] sm:$0xff] }
 0x271   : > { %v2859_v58 = vadd.f32 %v2624_v55, %v2051_v54  ;;  %2772 = vmatmul.bf16.gmra.mxu2 %v8364_v27 }
 0x272   : > { %2821 = vmatmul.bf16.gmra.mxu3 %v8366_v28 }
 0x273   : > { %2891 = vst [vmem:[#allocation3 + $0xe8] sm:$0xff] %v2859_v58 }
 0x274   : > { %v2577_v34 = vpop.f32.mrf.mxu2  ;;  %v2481_v37 = vpop.f32.mrf.mxu0 }
 0x275   : > { %v2578_v35 = vadd.f32 %v2577_v34, %v2529_v33  ;;  %v2626_v36 = vpop.f32.mrf.mxu3  ;;  %v2530_v39 = vpop.f32.mrf.mxu1 }
 0x276   : > { %v2531_v57 = vadd.f32 %v2530_v39, %v2481_v37 }
 0x277   : > { %v2627_v40 = vadd.f32 %v2626_v36, %v2578_v35 }
 0x279   : > { %v2861_v56 = vadd.f32 %v2627_v40, %v2053_v38 }
 0x27b   : > { %2893 = vst [vmem:[#allocation3 + $0x8] sm:$0xff] %v2861_v56 }
 0x27c   : > { %v2579_v25 = vpop.f32.mrf.mxu2  ;;  %v2484_v61 = vpop.f32.mrf.mxu0 }
 0x27d   : > { %v2580_v59 = vadd.f32 %v2579_v25, %v2531_v57  ;;  %v2628_v60 = vpop.f32.mrf.mxu3  ;;  %v2533_v62 = vpop.f32.mrf.mxu1 }
 0x27e   : > { %v2534_v63 = vadd.f32 %v2533_v62, %v2484_v61 }
 0x27f   : > { %v2629_v27 = vadd.f32 %v2628_v60, %v2580_v59  ;;  %2679 = vmatmul.bf16.gmra.mxu0 %v8388_v50  ;;  %v2065_v59 = vld [vmem:[#allocation3 + $0x10] sm:$0xff] }
 0x280   : > { %2728 = vmatmul.bf16.gmra.mxu1 %v8390_v51  ;;  %v2059_v51 = vld [vmem:[#allocation3 + $0x38] sm:$0xff] }
 0x281   : > { %v2863_v28 = vadd.f32 %v2629_v27, %v2055_v26  ;;  %2777 = vmatmul.bf16.gmra.mxu2 %v8392_v52 }
 0x282   : > { %2826 = vmatmul.bf16.gmra.mxu3 %v8394_v53 }
 0x283   : > { %2895 = vst [vmem:[#allocation3 + $0x58] sm:$0xff] %v2863_v28 }
 0x284   : > { %v2582_v0 = vpop.f32.mrf.mxu2  ;;  %v2486_v3 = vpop.f32.mrf.mxu0 }
 0x285   : > { %v2583_v1 = vadd.f32 %v2582_v0, %v2534_v63  ;;  %v2631_v2 = vpop.f32.mrf.mxu3  ;;  %v2535_v5 = vpop.f32.mrf.mxu1 }
 0x286   : > { %v2536_v8 = vadd.f32 %v2535_v5, %v2486_v3 }
 0x287   : > { %v2632_v6 = vadd.f32 %v2631_v2, %v2583_v1 }
 0x289   : > { %v2865_v7 = vadd.f32 %v2632_v6, %v2057_v4  ;;  %v2069_v6 = vld [vmem:[#allocation3 + $0xd8] sm:$0xff] }
 0x28b   : > { %2897 = vst [vmem:[#allocation3 + $0xd0] sm:$0xff] %v2865_v7 }
 0x28c   : > { %v2584_v50 = vpop.f32.mrf.mxu2  ;;  %v2489_v20 = vpop.f32.mrf.mxu0 }
 0x28d   : > { %v2585_v17 = vadd.f32 %v2584_v50, %v2536_v8  ;;  %v2633_v19 = vpop.f32.mrf.mxu3  ;;  %v2538_v23 = vpop.f32.mrf.mxu1 }
 0x28e   : > { %v2539_v49 = vadd.f32 %v2538_v23, %v2489_v20 }
 0x28f   : > { %v2634_v52 = vadd.f32 %v2633_v19, %v2585_v17  ;;  %2684 = vmatmul.bf16.gmra.mxu0 %v8416_v13 }
 0x290   : > { %2733 = vmatmul.bf16.gmra.mxu1 %v8418_v14  ;;  %v2063_v14 = vld [vmem:[#allocation3 + $0x18] sm:$0xff] }
 0x291   : > { %v2867_v53 = vadd.f32 %v2634_v52, %v2059_v51  ;;  %2782 = vmatmul.bf16.gmra.mxu2 %v8420_v15 }
 0x292   : > { %2831 = vmatmul.bf16.gmra.mxu3 %v8422_v16 }
 0x293   : > { %2899 = vst [vmem:[#allocation3 + $0x38] sm:$0xff] %v2867_v53 }
 0x294   : > { %v2587_v29 = vpop.f32.mrf.mxu2  ;;  %v2491_v54 = vpop.f32.mrf.mxu0 }
 0x295   : > { %v2588_v30 = vadd.f32 %v2587_v29, %v2539_v49  ;;  %v2636_v31 = vpop.f32.mrf.mxu3  ;;  %v2540_v55 = vpop.f32.mrf.mxu1 }
 0x296   : > { %v2541_v34 = vadd.f32 %v2540_v55, %v2491_v54 }
 0x297   : > { %v2637_v58 = vadd.f32 %v2636_v31, %v2588_v30  ;;  %v2073_v31 = vld [vmem:[#allocation3 + $0x88] sm:$0xff] }
 0x299   : > { %v2869_v33 = vadd.f32 %v2637_v58, %v2061_v32 }
 0x29b   : > { %2901 = vst [vmem:[#allocation3 + $0xe0] sm:$0xff] %v2869_v33 }
 0x29c   : > { %v2589_v13 = vpop.f32.mrf.mxu2  ;;  %v2494_v37 = vpop.f32.mrf.mxu0 }
 0x29d   : > { %v2590_v35 = vadd.f32 %v2589_v13, %v2541_v34  ;;  %v2638_v36 = vpop.f32.mrf.mxu3  ;;  %v2543_v38 = vpop.f32.mrf.mxu1 }
 0x29e   : > { %v2544_v39 = vadd.f32 %v2543_v38, %v2494_v37 }
 0x29f   : > { %v2639_v15 = vadd.f32 %v2638_v36, %v2590_v35  ;;  %2689 = vmatmul.bf16.gmra.mxu0 %v8444_v41 }
 0x2a0   : > { %2738 = vmatmul.bf16.gmra.mxu1 %v8446_v42  ;;  %v2067_v42 = vld [vmem:[#allocation3 + $0x50] sm:$0xff] }
 0x2a1   : > { %v2871_v16 = vadd.f32 %v2639_v15, %v2063_v14  ;;  %2787 = vmatmul.bf16.gmra.mxu2 %v8448_v43 }
 0x2a2   : > { %2836 = vmatmul.bf16.gmra.mxu3 %v8450_v44 }
 0x2a3   : > { %2903 = vst [vmem:[#allocation3 + $0x18] sm:$0xff] %v2871_v16  ;;  %v2077_v16 = vld [vmem:[#allocation3 + $0xb8] sm:$0xff] }
 0x2a4   : > { %v2592_v40 = vpop.f32.mrf.mxu2  ;;  %v2496_v25 = vpop.f32.mrf.mxu0 }
 0x2a5   : > { %v2593_v56 = vadd.f32 %v2592_v40, %v2544_v39  ;;  %v2641_v57 = vpop.f32.mrf.mxu3  ;;  %v2545_v60 = vpop.f32.mrf.mxu1 }
 0x2a6   : > { %v2546_v62 = vadd.f32 %v2545_v60, %v2496_v25 }
 0x2a7   : > { %v2642_v61 = vadd.f32 %v2641_v57, %v2593_v56 }
 0x2a9   : > { %v2873_v26 = vadd.f32 %v2642_v61, %v2065_v59 }
 0x2ab   : > { %2905 = vst [vmem:[#allocation3 + $0x10] sm:$0xff] %v2873_v26 }
 0x2ac   : > { %v2594_v41 = vpop.f32.mrf.mxu2  ;;  %v2499_v63 = vpop.f32.mrf.mxu0 }
 0x2ad   : > { %v2595_v27 = vadd.f32 %v2594_v41, %v2546_v62  ;;  %v2643_v28 = vpop.f32.mrf.mxu3  ;;  %v2548_v0 = vpop.f32.mrf.mxu1 }
 0x2ae   : > { %v2549_v1 = vadd.f32 %v2548_v0, %v2499_v63  ;;  %v2050_v63 = vld [vmem:[#allocation3 + $0xc8] sm:$0xff] }
 0x2af   : > { %v2644_v43 = vadd.f32 %v2643_v28, %v2595_v27  ;;  %2694 = vmatmul.bf16.gmra.mxu0 %v8472_v9 }
 0x2b0   : > { %2743 = vmatmul.bf16.gmra.mxu1 %v8474_v10  ;;  %v2071_v10 = vld [vmem:[#allocation3 + $0x20] sm:$0xff] }
 0x2b1   : > { %v2875_v44 = vadd.f32 %v2644_v43, %v2067_v42  ;;  %2792 = vmatmul.bf16.gmra.mxu2 %v8476_v11 }
 0x2b2   : > { %2841 = vmatmul.bf16.gmra.mxu3 %v8478_v12 }
 0x2b3   : > { %2907 = vst [vmem:[#allocation3 + $0x50] sm:$0xff] %v2875_v44 }
 0x2b4   : > { %v2597_v2 = vpop.f32.mrf.mxu2  ;;  %v2501_v5 = vpop.f32.mrf.mxu0 }
 0x2b5   : > { %v2598_v3 = vadd.f32 %v2597_v2, %v2549_v1  ;;  %v2646_v4 = vpop.f32.mrf.mxu3  ;;  %v2550_v7 = vpop.f32.mrf.mxu1 }
 0x2b6   : > { %v2551_v17 = vadd.f32 %v2550_v7, %v2501_v5  ;;  %v2052_v5 = vld [vmem:[#allocation3 + $0x78] sm:$0xff] }
 0x2b7   : > { %v2647_v8 = vadd.f32 %v2646_v4, %v2598_v3 }
 0x2b9   : > { %v2877_v50 = vadd.f32 %v2647_v8, %v2069_v6 }
 0x2bb   : > { %2909 = vst [vmem:[#allocation3 + $0xd8] sm:$0xff] %v2877_v50 }
 0x2bc   : > { %v2599_v9 = vpop.f32.mrf.mxu2  ;;  %v2504_v51 = vpop.f32.mrf.mxu0 }
 0x2bd   : > { %v2600_v19 = vadd.f32 %v2599_v9, %v2551_v17  ;;  %v2648_v20 = vpop.f32.mrf.mxu3  ;;  %v2553_v23 = vpop.f32.mrf.mxu1 }
 0x2be   : > { %v2554_v52 = vadd.f32 %v2553_v23, %v2504_v51  ;;  %v2054_v51 = vld [vmem:[#allocation3 + $0x90] sm:$0xff] }
 0x2bf   : > { %v2649_v11 = vadd.f32 %v2648_v20, %v2600_v19  ;;  %2699 = vmatmul.bf16.gmra.mxu0 %v8500_v45 }
 0x2c0   : > { %2748 = vmatmul.bf16.gmra.mxu1 %v8502_v46  ;;  %v2075_v46 = vld [vmem:[#allocation3 + $0xf8] sm:$0xff] }
 0x2c1   : > { %v2879_v12 = vadd.f32 %v2649_v11, %v2071_v10  ;;  %2797 = vmatmul.bf16.gmra.mxu2 %v8504_v47 }
 0x2c2   : > { %2846 = vmatmul.bf16.gmra.mxu3 %v8506_v48 }
 0x2c3   : > { %2911 = vst [vmem:[#allocation3 + $0x20] sm:$0xff] %v2879_v12 }
 0x2c4   : > { %v2602_v53 = vpop.f32.mrf.mxu2  ;;  %v2506_v30 = vpop.f32.mrf.mxu0 }
 0x2c5   : > { %v2603_v49 = vadd.f32 %v2602_v53, %v2554_v52  ;;  %v2651_v29 = vpop.f32.mrf.mxu3  ;;  %v2555_v54 = vpop.f32.mrf.mxu1 }
 0x2c6   : > { %v2556_v58 = vadd.f32 %v2555_v54, %v2506_v30  ;;  %v2056_v30 = vld [vmem:[#allocation3 + $0xa8] sm:$0xff] }
 0x2c7   : > { %v2652_v32 = vadd.f32 %v2651_v29, %v2603_v49 }
 0x2c9   : > { %v2881_v55 = vadd.f32 %v2652_v32, %v2073_v31 }
 0x2cb   : > { %2913 = vst [vmem:[#allocation3 + $0x88] sm:$0xff] %v2881_v55 }
 0x2cc   : > { %v2604_v45 = vpop.f32.mrf.mxu2  ;;  %v2509_v13 = vpop.f32.mrf.mxu0 }
 0x2cd   : > { %v2605_v33 = vadd.f32 %v2604_v45, %v2556_v58  ;;  %v2653_v34 = vpop.f32.mrf.mxu3  ;;  %v2558_v35 = vpop.f32.mrf.mxu1 }
 0x2ce   : > { %v2559_v36 = vadd.f32 %v2558_v35, %v2509_v13  ;;  %v2058_v13 = vld [vmem:[#allocation3 + $0xb0] sm:$0xff] }
 0x2cf   : > { %v2654_v47 = vadd.f32 %v2653_v34, %v2605_v33  ;;  %2704 = vmatmul.bf16.gmra.mxu0 %v8527_v18 }
 0x2d0   : > { %2753 = vmatmul.bf16.gmra.mxu1 %v8530_v21  ;;  %v2079_v21 = vld [vmem:[#allocation3 + $0x28] sm:$0xff] }
 0x2d1   : > { %v2883_v48 = vadd.f32 %v2654_v47, %v2075_v46  ;;  %2802 = vmatmul.bf16.gmra.mxu2 %v8532_v22 }
 0x2d2   : > { %2851 = vmatmul.bf16.gmra.mxu3 %v8534_v24 }
 0x2d3   : > { %2915 = vst [vmem:[#allocation3 + $0xf8] sm:$0xff] %v2883_v48 }
 0x2d4   : > { %v2607_v37 = vpop.f32.mrf.mxu2  ;;  %v2511_v15 = vpop.f32.mrf.mxu0 }
 0x2d5   : > { %v2608_v14 = vadd.f32 %v2607_v37, %v2559_v36  ;;  %v2656_v38 = vpop.f32.mrf.mxu3  ;;  %v2560_v39 = vpop.f32.mrf.mxu1 }
 0x2d6   : > { %v2561_v57 = vadd.f32 %v2560_v39, %v2511_v15  ;;  %v2060_v15 = vld [vmem:[#allocation3 + $0x40] sm:$0xff] }
 0x2d7   : > { %v2657_v40 = vadd.f32 %v2656_v38, %v2608_v14 }
 0x2d9   : > { %v2885_v56 = vadd.f32 %v2657_v40, %v2077_v16 }
 0x2db   : > { %2917 = vst [vmem:[#allocation3 + $0xb8] sm:$0xff] %v2885_v56 }
 0x2dc   : > { %v2609_v18 = vpop.f32.mrf.mxu2  ;;  %v2670_v60 = vpop.f32.mrf.mxu0 }
 0x2dd   : > { %v2610_v25 = vadd.f32 %v2609_v18, %v2561_v57  ;;  %v2658_v59 = vpop.f32.mrf.mxu3  ;;  %v2719_v61 = vpop.f32.mrf.mxu1 }
 0x2de   : > { %v2720_v24 = vadd.f32 %v2719_v61, %v2670_v60  ;;  %v2062_v60 = vld [vmem:[#allocation3 + $0x60] sm:$0xff] }
 0x2df   : > { %v2659_v22 = vadd.f32 %v2658_v59, %v2610_v25 }
 0x2e1   : > { %v2887_v26 = vadd.f32 %v2659_v22, %v2079_v21 }
 0x2e3   : > { %2919 = vst [vmem:[#allocation3 + $0x28] sm:$0xff] %v2887_v26 }
 0x2e4   : > { %v2768_v62 = vpop.f32.mrf.mxu2  ;;  %v2672_v28 = vpop.f32.mrf.mxu0 }
 0x2e5   : > { %v2769_v41 = vadd.f32 %v2768_v62, %v2720_v24  ;;  %v2817_v27 = vpop.f32.mrf.mxu3  ;;  %v2721_v42 = vpop.f32.mrf.mxu1 }
 0x2e6   : > { %v2722_v44 = vadd.f32 %v2721_v42, %v2672_v28  ;;  %v2064_v28 = vld [vmem:[#allocation3 + $0x68] sm:$0xff] }
 0x2e7   : > { %v2818_v0 = vadd.f32 %v2817_v27, %v2769_v41 }
 0x2e9   : > { %v2858_v43 = vadd.f32 %v2818_v0, %v2050_v63 }
 0x2eb   : > { %2890 = vst [vmem:[#allocation3 + $0xc8] sm:$0xff] %v2858_v43 }
 0x2ec   : > { %v2770_v1 = vpop.f32.mrf.mxu2  ;;  %v2675_v4 = vpop.f32.mrf.mxu0 }
 0x2ed   : > { %v2771_v2 = vadd.f32 %v2770_v1, %v2722_v44  ;;  %v2819_v3 = vpop.f32.mrf.mxu3  ;;  %v2724_v6 = vpop.f32.mrf.mxu1 }
 0x2ee   : > { %v2725_v50 = vadd.f32 %v2724_v6, %v2675_v4  ;;  %v2066_v4 = vld [vmem:[#allocation3 + $0x70] sm:$0xff] }
 0x2ef   : > { %v2820_v7 = vadd.f32 %v2819_v3, %v2771_v2 }
 0x2f1   : > { %v2860_v8 = vadd.f32 %v2820_v7, %v2052_v5 }
 0x2f3   : > { %2892 = vst [vmem:[#allocation3 + $0x78] sm:$0xff] %v2860_v8 }
 0x2f4   : > { %v2773_v17 = vpop.f32.mrf.mxu2  ;;  %v2677_v20 = vpop.f32.mrf.mxu0 }
 0x2f5   : > { %v2774_v9 = vadd.f32 %v2773_v17, %v2725_v50  ;;  %v2822_v19 = vpop.f32.mrf.mxu3  ;;  %v2726_v10 = vpop.f32.mrf.mxu1 }
 0x2f6   : > { %v2727_v12 = vadd.f32 %v2726_v10, %v2677_v20  ;;  %v2068_v20 = vld [vmem:[#allocation3 + $0xa0] sm:$0xff] }
 0x2f7   : > { %v2823_v23 = vadd.f32 %v2822_v19, %v2774_v9 }
 0x2f9   : > { %v2862_v11 = vadd.f32 %v2823_v23, %v2054_v51 }
 0x2fb   : > { %2894 = vst [vmem:[#allocation3 + $0x90] sm:$0xff] %v2862_v11 }
 0x2fc   : > { %v2775_v52 = vpop.f32.mrf.mxu2  ;;  %v2680_v29 = vpop.f32.mrf.mxu0 }
 0x2fd   : > { %v2776_v53 = vadd.f32 %v2775_v52, %v2727_v12  ;;  %v2824_v49 = vpop.f32.mrf.mxu3  ;;  %v2729_v31 = vpop.f32.mrf.mxu1 }
 0x2fe   : > { %v2730_v55 = vadd.f32 %v2729_v31, %v2680_v29  ;;  %v2070_v29 = vld [vmem:[#allocation3 + $0x30] sm:$0xff] }
 0x2ff   : > { %v2825_v54 = vadd.f32 %v2824_v49, %v2776_v53 }
 0x301   : > { %v2864_v32 = vadd.f32 %v2825_v54, %v2056_v30 }
 0x303   : > { %2896 = vst [vmem:[#allocation3 + $0xa8] sm:$0xff] %v2864_v32 }
 0x304   : > { %v2778_v58 = vpop.f32.mrf.mxu2  ;;  %v2682_v34 = vpop.f32.mrf.mxu0 }
 0x305   : > { %v2779_v45 = vadd.f32 %v2778_v58, %v2730_v55  ;;  %v2827_v33 = vpop.f32.mrf.mxu3  ;;  %v2731_v46 = vpop.f32.mrf.mxu1 }
 0x306   : > { %v2732_v48 = vadd.f32 %v2731_v46, %v2682_v34  ;;  %v2072_v34 = vld [vmem:[#allocation3 + $0xf0] sm:$0xff] }
 0x307   : > { %v2828_v35 = vadd.f32 %v2827_v33, %v2779_v45 }
 0x309   : > { %v2866_v47 = vadd.f32 %v2828_v35, %v2058_v13 }
 0x30b   : > { %2898 = vst [vmem:[#allocation3 + $0xb0] sm:$0xff] %v2866_v47 }
 0x30c   : > { %v2780_v36 = vpop.f32.mrf.mxu2  ;;  %v2685_v38 = vpop.f32.mrf.mxu0 }
 0x30d   : > { %v2781_v37 = vadd.f32 %v2780_v36, %v2732_v48  ;;  %v2829_v14 = vpop.f32.mrf.mxu3  ;;  %v2734_v16 = vpop.f32.mrf.mxu1 }
 0x30e   : > { %v2735_v56 = vadd.f32 %v2734_v16, %v2685_v38  ;;  %v2074_v38 = vld [vmem:[#allocation3 + $0x48] sm:$0xff] }
 0x30f   : > { %v2830_v39 = vadd.f32 %v2829_v14, %v2781_v37 }
 0x311   : > { %v2868_v40 = vadd.f32 %v2830_v39, %v2060_v15 }
 0x313   : > { %2900 = vst [vmem:[#allocation3 + $0x40] sm:$0xff] %v2868_v40 }
 0x314   : > { %v2783_v57 = vpop.f32.mrf.mxu2  ;;  %v2687_v59 = vpop.f32.mrf.mxu0 }
 0x315   : > { %v2784_v18 = vadd.f32 %v2783_v57, %v2735_v56  ;;  %v2832_v25 = vpop.f32.mrf.mxu3  ;;  %v2736_v21 = vpop.f32.mrf.mxu1 }
 0x316   : > { %v2737_v26 = vadd.f32 %v2736_v21, %v2687_v59 }
 0x317   : > { %v2833_v61 = vadd.f32 %v2832_v25, %v2784_v18  ;;  %v2076_v25 = vld [vmem:[#allocation3 + $0xc0] sm:$0xff] }
 0x319   : > { %v2870_v22 = vadd.f32 %v2833_v61, %v2062_v60 }
 0x31b   : > { %2902 = vst [vmem:[#allocation3 + $0x60] sm:$0xff] %v2870_v22 }
 0x31c   : > { %v2785_v24 = vpop.f32.mrf.mxu2  ;;  %v2690_v27 = vpop.f32.mrf.mxu0 }
 0x31d   : > { %v2786_v62 = vadd.f32 %v2785_v24, %v2737_v26  ;;  %v2834_v41 = vpop.f32.mrf.mxu3  ;;  %v2739_v63 = vpop.f32.mrf.mxu1 }
 0x31e   : > { %v2740_v43 = vadd.f32 %v2739_v63, %v2690_v27 }
 0x31f   : > { %v2835_v42 = vadd.f32 %v2834_v41, %v2786_v62  ;;  %v2078_v41 = vld [vmem:[#allocation3] sm:$0xff] }
 0x321   : > { %v2872_v0 = vadd.f32 %v2835_v42, %v2064_v28 }
 0x323   : > { %2904 = vst [vmem:[#allocation3 + $0x68] sm:$0xff] %v2872_v0 }
 0x324   : > { %v2788_v44 = vpop.f32.mrf.mxu2  ;;  %v2692_v3 = vpop.f32.mrf.mxu0 }
 0x325   : > { %v2789_v1 = vadd.f32 %v2788_v44, %v2740_v43  ;;  %v2837_v2 = vpop.f32.mrf.mxu3  ;;  %v2741_v5 = vpop.f32.mrf.mxu1 }
 0x326   : > { %v2742_v8 = vadd.f32 %v2741_v5, %v2692_v3 }
 0x327   : > { %v2838_v6 = vadd.f32 %v2837_v2, %v2789_v1  ;;  %v2080_v1 = vld [vmem:[#allocation3 + $0x98] sm:$0xff] }
 0x329   : > { %v2874_v7 = vadd.f32 %v2838_v6, %v2066_v4 }
 0x32b   : > { %2906 = vst [vmem:[#allocation3 + $0x70] sm:$0xff] %v2874_v7 }
 0x32c   : > { %v2790_v50 = vpop.f32.mrf.mxu2  ;;  %v2695_v19 = vpop.f32.mrf.mxu0 }
 0x32d   : > { %v2791_v17 = vadd.f32 %v2790_v50, %v2742_v8  ;;  %v2839_v9 = vpop.f32.mrf.mxu3  ;;  %v2744_v51 = vpop.f32.mrf.mxu1 }
 0x32e   : > { %v2745_v11 = vadd.f32 %v2744_v51, %v2695_v19 }
 0x32f   : > { %v2840_v10 = vadd.f32 %v2839_v9, %v2791_v17 }
 0x331   : > { %v2876_v23 = vadd.f32 %v2840_v10, %v2068_v20 }
 0x333   : > { %2908 = vst [vmem:[#allocation3 + $0xa0] sm:$0xff] %v2876_v23 }
 0x334   : > { %v2793_v12 = vpop.f32.mrf.mxu2  ;;  %v2697_v49 = vpop.f32.mrf.mxu0 }
 0x335   : > { %v2794_v52 = vadd.f32 %v2793_v12, %v2745_v11  ;;  %v2842_v53 = vpop.f32.mrf.mxu3  ;;  %v2746_v30 = vpop.f32.mrf.mxu1 }
 0x336   : > { %v2747_v32 = vadd.f32 %v2746_v30, %v2697_v49 }
 0x337   : > { %v2843_v31 = vadd.f32 %v2842_v53, %v2794_v52 }
 0x339   : > { %v2878_v54 = vadd.f32 %v2843_v31, %v2070_v29 }
 0x33b   : > { %2910 = vst [vmem:[#allocation3 + $0x30] sm:$0xff] %v2878_v54 }
 0x33c   : > { %v2795_v55 = vpop.f32.mrf.mxu2  ;;  %v2700_v33 = vpop.f32.mrf.mxu0 }
 0x33d   : > { %v2796_v58 = vadd.f32 %v2795_v55, %v2747_v32  ;;  %v2844_v45 = vpop.f32.mrf.mxu3  ;;  %v2749_v13 = vpop.f32.mrf.mxu1 }
 0x33e   : > { %v2750_v47 = vadd.f32 %v2749_v13, %v2700_v33 }
 0x33f   : > { %v2845_v46 = vadd.f32 %v2844_v45, %v2796_v58 }
 0x341   : > { %v2880_v35 = vadd.f32 %v2845_v46, %v2072_v34 }
 0x343   : > { %2912 = vst [vmem:[#allocation3 + $0xf0] sm:$0xff] %v2880_v35 }
 0x344   : > { %v2798_v48 = vpop.f32.mrf.mxu2  ;;  %v2702_v14 = vpop.f32.mrf.mxu0 }
 0x345   : > { %v2799_v36 = vadd.f32 %v2798_v48, %v2750_v47  ;;  %v2847_v37 = vpop.f32.mrf.mxu3  ;;  %v2751_v15 = vpop.f32.mrf.mxu1 }
 0x346   : > { %v2752_v40 = vadd.f32 %v2751_v15, %v2702_v14 }
 0x347   : > { %v2848_v16 = vadd.f32 %v2847_v37, %v2799_v36 }
 0x349   : > { %v2882_v39 = vadd.f32 %v2848_v16, %v2074_v38 }
 0x34b   : > { %2914 = vst [vmem:[#allocation3 + $0x48] sm:$0xff] %v2882_v39 }
 0x34c   : > { %v2800_v56 = vpop.f32.mrf.mxu2  ;;  %v2705_v59 = vpop.f32.mrf.mxu0 }
 0x34d   : > { %v2801_v57 = vadd.f32 %v2800_v56, %v2752_v40  ;;  %v2849_v18 = vpop.f32.mrf.mxu3  ;;  %v2754_v60 = vpop.f32.mrf.mxu1 }
 0x34e   : > { %v2755_v22 = vadd.f32 %v2754_v60, %v2705_v59 }
 0x34f   : > { %v2850_v21 = vadd.f32 %v2849_v18, %v2801_v57 }
 0x351   : > { %v2884_v61 = vadd.f32 %v2850_v21, %v2076_v25 }
 0x353   : > { %2916 = vst [vmem:[#allocation3 + $0xc0] sm:$0xff] %v2884_v61 }
 0x354   : > { %v2803_v26 = vpop.f32.mrf.mxu2  ;;  %v2707_v28 = vpop.f32.mrf.mxu0 }
 0x355   : > { %v2804_v24 = vadd.f32 %v2803_v26, %v2755_v22  ;;  %v2852_v62 = vpop.f32.mrf.mxu3  ;;  %v2756_v63 = vpop.f32.mrf.mxu1 }
 0x356   : > { %v2757_v0 = vadd.f32 %v2756_v63, %v2707_v28 }
 0x357   : > { %v2853_v27 = vadd.f32 %v2852_v62, %v2804_v24 }
 0x359   : > { %v2886_v42 = vadd.f32 %v2853_v27, %v2078_v41 }
 0x35b   : > { %2918 = vst [vmem:[#allocation3] sm:$0xff] %v2886_v42 }
 0x35c   : > { %v2805_v43 = vpop.f32.mrf.mxu2 }
 0x35d   : > { %v2806_v44 = vadd.f32 %v2805_v43, %v2757_v0  ;;  %v2854_v2 = vpop.f32.mrf.mxu3 }
 0x35f   : > { %v2855_v3 = vadd.f32 %v2854_v2, %v2806_v44  ;;  %2924 = sbr.rel (%p6330_p1) target bundleno = 1900 (0x76c), region = 164 }
 0x361   : > { %v2888_v4 = vadd.f32 %v2855_v3, %v2080_v1 }
 0x363   : > { %2920 = vst [vmem:[#allocation3 + $0x98] sm:$0xff] %v2888_v4 }
 0x364   : > { %v6815_v5 = vld [vmem:[#allocation13 + $0x38] sm:$0xff]  ;;  %v6814_v7 = vld [vmem:[#allocation13 + $0x30] sm:$0xff]  ;;  %v6813_v50 = vld [vmem:[#allocation13 + $0x28] sm:$0xff]  ;;  %s9958_s0 = sld [smem:[#allocation52_spill]] }
 0x365   : > { %v6823_v6 = vld [vmem:[#allocation13 + $0x78] sm:$0xff]  ;;  %6872 = vmatpush.bf16.msra.mxu2 %v6815_v5  ;;  %v6822_v8 = vld [vmem:[#allocation13 + $0x70] sm:$0xff]  ;;  %3257 = vmatpush.bf16.msra.mxu0 %v6815_v5  ;;  %v6821_v17 = vld [vmem:[#allocation13 + $0x68] sm:$0xff]  ;;  %s9959_s15 = sld [smem:[#allocation55_spill]] }
 0x366   : > { %6880 = vmatpush.bf16.msra.mxu3 %v6823_v6  ;;  %3306 = vmatpush.bf16.msra.mxu1 %v6823_v6  ;;  %v6812_v9 = vld [vmem:[#allocation13 + $0x20] sm:$0xff]  ;;  %v6811_v20 = vld [vmem:[#allocation13 + $0x18] sm:$0xff]  ;;  %v6810_v10 = vld [vmem:[#allocation13 + $0x10] sm:$0xff]  ;;  %s9960_s5 = sld [smem:[#allocation56_spill]] }
 0x367   : > { %v6820_v19 = vld [vmem:[#allocation13 + $0x60] sm:$0xff]  ;;  %v6819_v51 = vld [vmem:[#allocation13 + $0x58] sm:$0xff]  ;;  %v6818_v23 = vld [vmem:[#allocation13 + $0x50] sm:$0xff]  ;;  %s9961_s4 = sld [smem:[#allocation61_spill]] }
 0x368   : > { %v6809_v12 = vld [vmem:[#allocation13 + $0x8] sm:$0xff]  ;;  %v3014_v54 = vld [vmem:[#allocation3 + $0xa0] sm:$0xff]  ;;  %v6798_v48 = vld [vmem:[#allocation12 + $0x30] sm:$0xff]  ;;  %s9962_s16 = sld [smem:[#allocation65_spill]] }
 0x369   : > { %6873 = vmatpush.bf16.msra.mxu2 %v6814_v7  ;;  %3258 = vmatpush.bf16.msra.mxu0 %v6814_v7  ;;  %v6817_v52 = vld [vmem:[#allocation13 + $0x48] sm:$0xff]  ;;  %v6808_v33 = vld [vmem:[#allocation13] sm:$0xff]  ;;  %v6799_v13 = vld [vmem:[#allocation12 + $0x38] sm:$0xff]  ;;  %s9963_s27 = sld [smem:[#allocation59_spill]] }
 0x36a   : > { %6881 = vmatpush.bf16.msra.mxu3 %v6822_v8  ;;  %3307 = vmatpush.bf16.msra.mxu1 %v6822_v8  ;;  %v3027_v11 = vld [vmem:[%s9958_s0] sm:$0x3]  ;;  %v3011_v53 = vld [vmem:[#allocation3 + $0x10] sm:$0xff]  ;;  %v6816_v34 = vld [vmem:[#allocation13 + $0x40] sm:$0xff]  ;;  %s9964_s25 = sld [smem:[#allocation63_spill]] }
 0x36b   : > { %v8760_v49 = vperm.slane %v3027_v11, 0  ;;  %v8762_v29 = vperm.slane %v3027_v11, 1  ;;  %v3013_v30 = vld [vmem:[#allocation3 + $0x50] sm:$0xff]  ;;  %v6807_v46 = vld [vmem:[#allocation12 + $0x78] sm:$0xff]  ;;  %v6796_v40 = vld [vmem:[#allocation12 + $0x20] sm:$0xff]  ;;  %s9965_s30 = sld [smem:[#allocation67_spill]] }
 0x36c   : > { %v3012_v31 = vld [vmem:[#allocation3 + $0x70] sm:$0xff]  ;;  %v3015_v38 = vld [vmem:[#allocation3 + $0xd8] sm:$0xff]  ;;  %v3017_v15 = vld [vmem:[#allocation3 + $0x20] sm:$0xff] }
 0x36d   : > { %6874 = vmatpush.bf16.msra.mxu2 %v6813_v50  ;;  %3259 = vmatpush.bf16.msra.mxu0 %v6813_v50  ;;  %v3049_v32 = vadd.f32 %v8760_v49, %v3011_v53  ;;  %v3051_v55 = vadd.f32 %v8760_v49, %v3013_v30  ;;  %v3050_v58 = vadd.f32 %v8762_v29, %v3012_v31  ;;  %v6806_v36 = vld [vmem:[#allocation12 + $0x70] sm:$0xff]  ;;  %v6797_v37 = vld [vmem:[#allocation12 + $0x28] sm:$0xff]  ;;  %v6804_v56 = vld [vmem:[#allocation12 + $0x60] sm:$0xff] }
 0x36e   : > { %6882 = vmatpush.bf16.msra.mxu3 %v6821_v17  ;;  %3308 = vmatpush.bf16.msra.mxu1 %v6821_v17  ;;  %v3052_v45 = vadd.f32 %v8762_v29, %v3014_v54  ;;  %v6805_v14 = vld [vmem:[#allocation12 + $0x68] sm:$0xff]  ;;  %v3053_v57 = vadd.f32 %v8760_v49, %v3015_v38  ;;  %v3055_v18 = vadd.f32 %v8760_v49, %v3017_v15  ;;  %v6795_v60 = vld [vmem:[#allocation12 + $0x18] sm:$0xff]  ;;  %v6794_v26 = vld [vmem:[#allocation12 + $0x10] sm:$0xff] }
 0x36f   : > { %v3121_v35 = vpack.c.bf16 %v3051_v55, %v3049_v32  ;;  %v3016_v16 = vld [vmem:[#allocation3 + $0x30] sm:$0xff]  ;;  %v6803_v21 = vld [vmem:[#allocation12 + $0x58] sm:$0xff]  ;;  %v2997_v27 = vld [vmem:[#allocation3 + $0xe8] sm:$0xff] }
 0x370   : > { %v3122_v47 = vpack.c.bf16 %v3052_v45, %v3050_v58  ;;  %v3018_v39 = vld [vmem:[#allocation3 + $0xf0] sm:$0xff]  ;;  %v3054_v25 = vadd.f32 %v8762_v29, %v3016_v16  ;;  %v3123_v61 = vpack.c.bf16 %v3055_v18, %v3053_v57  ;;  %v2995_v41 = vld [vmem:[#allocation3 + $0x80] sm:$0xff]  ;;  %v3035_v42 = vadd.f32 %v8760_v49, %v2997_v27  ;;  %v2996_v0 = vld [vmem:[#allocation3 + $0xc8] sm:$0xff] }
 0x371   : > { %6875 = vmatpush.bf16.msra.mxu2 %v6812_v9  ;;  %3260 = vmatpush.bf16.msra.mxu0 %v6812_v9  ;;  %v3056_v59 = vadd.f32 %v8762_v29, %v3018_v39  ;;  %v6802_v24 = vld [vmem:[#allocation12 + $0x50] sm:$0xff]  ;;  %v6793_v62 = vld [vmem:[#allocation12 + $0x8] sm:$0xff]  ;;  %v3033_v63 = vadd.f32 %v8760_v49, %v2995_v41  ;;  %v3034_v44 = vadd.f32 %v8762_v29, %v2996_v0  ;;  %v3022_v6 = vld [vmem:[#allocation3 + $0xc0] sm:$0xff] }
 0x372   : > { %6883 = vmatpush.bf16.msra.mxu3 %v6820_v19  ;;  %3309 = vmatpush.bf16.msra.mxu1 %v6820_v19  ;;  %v6801_v28 = vld [vmem:[#allocation12 + $0x48] sm:$0xff]  ;;  %v2998_v43 = vld [vmem:[#allocation3 + $0x78] sm:$0xff]  ;;  %v6792_v8 = vld [vmem:[#allocation12] sm:$0xff] }
 0x373   : > { %v3124_v22 = vpack.c.bf16 %v3056_v59, %v3054_v25  ;;  %v3036_v1 = vadd.f32 %v8762_v29, %v2998_v43  ;;  %v3019_v2 = vld [vmem:[#allocation3 + $0x88] sm:$0xff]  ;;  %v3113_v3 = vpack.c.bf16 %v3035_v42, %v3033_v63  ;;  %v3021_v4 = vld [vmem:[#allocation3 + $0xf8] sm:$0xff]  ;;  %v2957_v15 = vld [vmem:[#allocation9] sm:$0x3] }
 0x374   : > { %v3020_v5 = vld [vmem:[#allocation3 + $0x48] sm:$0xff]  ;;  %v3057_v17 = vadd.f32 %v8760_v49, %v3019_v2  ;;  %v3059_v9 = vadd.f32 %v8760_v49, %v3021_v4  ;;  %v3001_v11 = vld [vmem:[#allocation3 + $0x58] sm:$0xff]  ;;  %v2925_v59 = vld [vmem:[#allocation2 + $0xb0] sm:$0xff] }
 0x375   : > { %6876 = vmatpush.bf16.msra.mxu2 %v6811_v20  ;;  %3261 = vmatpush.bf16.msra.mxu0 %v6811_v20  ;;  %v3114_v7 = vpack.c.bf16 %v3036_v1, %v3034_v44  ;;  %v6800_v50 = vld [vmem:[#allocation12 + $0x40] sm:$0xff]  ;;  %v3058_v19 = vadd.f32 %v8762_v29, %v3020_v5  ;;  %v3060_v20 = vadd.f32 %v8762_v29, %v3022_v6  ;;  %v3023_v55 = vld [vmem:[#allocation3 + $0xb8] sm:$0xff] }
 0x376   : > { %6884 = vmatpush.bf16.msra.mxu3 %v6819_v51  ;;  %3310 = vmatpush.bf16.msra.mxu1 %v6819_v51  ;;  %v3125_v51 = vpack.c.bf16 %v3059_v9, %v3057_v17  ;;  %v3039_v53 = vadd.f32 %v8760_v49, %v3001_v11  ;;  %v3002_v30 = vld [vmem:[#allocation3 + $0xa8] sm:$0xff]  ;;  %v3005_v38 = vld [vmem:[#allocation3 + $0x38] sm:$0xff]  ;;  %v3007_v43 = vld [vmem:[#allocation3 + $0xe0] sm:$0xff] }
 0x377   : > { %v3040_v54 = vadd.f32 %v8762_v29, %v3002_v30  ;;  %v3025_v45 = vld [vmem:[#allocation3 + $0x28] sm:$0xff]  ;;  %v3043_v39 = vadd.f32 %v8760_v49, %v3005_v38  ;;  %v6846_v0 = vld [vmem:[#allocation18 + $0x30] sm:$0xff]  ;;  %v3045_v1 = vadd.f32 %v8760_v49, %v3007_v43  ;;  %v2948_v43 = vld [vmem:[#allocation2 + $0xc0] sm:$0xff] }
 0x378   : > { %v3009_v44 = vld [vmem:[#allocation3 + $0x18] sm:$0xff]  ;;  %v3010_v4 = vld [vmem:[#allocation3 + $0x68] sm:$0xff]  ;;  %v2931_v17 = vld [vmem:[#allocation2 + $0x30] sm:$0xff] }
 0x379   : > { %6877 = vmatpush.bf16.msra.mxu2 %v6810_v10  ;;  %3262 = vmatpush.bf16.msra.mxu0 %v6810_v10  ;;  %v3126_v10 = vpack.c.bf16 %v3060_v20, %v3058_v19  ;;  %v3047_v2 = vadd.f32 %v8760_v49, %v3009_v44  ;;  %v3048_v6 = vadd.f32 %v8762_v29, %v3010_v4  ;;  %v2930_v9 = vld [vmem:[#allocation2 + $0x68] sm:$0xff]  ;;  %v2936_v30 = vld [vmem:[#allocation2 + $0xb8] sm:$0xff] }
 0x37a   : > { %6885 = vmatpush.bf16.msra.mxu3 %v6818_v23  ;;  %3311 = vmatpush.bf16.msra.mxu1 %v6818_v23  ;;  %v2999_v23 = vld [vmem:[#allocation3 + $0x8] sm:$0xff] }
 0x37b   : > { %v2932_v19 = vld [vmem:[#allocation2 + $0x48] sm:$0xff] }
 0x37d   : > { %6878 = vmatpush.bf16.msra.mxu2 %v6809_v12  ;;  %3263 = vmatpush.bf16.msra.mxu0 %v6809_v12  ;;  %v3000_v12 = vld [vmem:[#allocation3 + $0x90] sm:$0xff] }
 0x37e   : > { %6886 = vmatpush.bf16.msra.mxu3 %v6817_v52  ;;  %3312 = vmatpush.bf16.msra.mxu1 %v6817_v52  ;;  %v3037_v52 = vadd.f32 %v8760_v49, %v2999_v23  ;;  %v3038_v31 = vadd.f32 %v8762_v29, %v3000_v12  ;;  %v2933_v12 = vld [vmem:[#allocation2 + $0x80] sm:$0xff] }
 0x380   : > { %v3115_v32 = vpack.c.bf16 %v3039_v53, %v3037_v52  ;;  %v3116_v58 = vpack.c.bf16 %v3040_v54, %v3038_v31  ;;  %v2935_v52 = vld [vmem:[#allocation2 + $0xe8] sm:$0xff] }
 0x381   : > { %6879 = vmatpush.bf16.msra.mxu2 %v6808_v33  ;;  %3264 = vmatpush.bf16.msra.mxu0 %v6808_v33  ;;  %v3024_v33 = vld [vmem:[#allocation3] sm:$0xff]  ;;  %v2934_v53 = vld [vmem:[#allocation2 + $0x88] sm:$0xff] }
 0x382   : > { %6887 = vmatpush.bf16.msra.mxu3 %v6816_v34  ;;  %3313 = vmatpush.bf16.msra.mxu1 %v6816_v34  ;;  %v3026_v34 = vld [vmem:[#allocation3 + $0x98] sm:$0xff] }
 0x384   : > { %3285 = vmatmul.bf16.vlgmr.msra.gmra.mxu2 %v3121_v35  ;;  %3265 = vmatmul.bf16.vlgmr.msra.gmra.mxu0 %v3113_v3  ;;  %v3062_v35 = vadd.f32 %v8762_v29, %v3024_v33  ;;  %v3008_v3 = vld [vmem:[#allocation3 + $0x60] sm:$0xff] }
 0x385   : > { %3451 = vmatpush.bf16.msrb.mxu2 %v6799_v13  ;;  %3334 = vmatmul.bf16.vlgmr.msra.gmra.mxu3 %v3122_v47  ;;  %v3061_v13 = vadd.f32 %v8760_v49, %v3023_v55  ;;  %v3064_v47 = vadd.f32 %v8762_v29, %v3026_v34  ;;  %v3046_v5 = vadd.f32 %v8762_v29, %v3008_v3  ;;  %v2937_v33 = vld [vmem:[#allocation2 + $0x60] sm:$0xff] }
 0x386   : > { %3500 = vmatpush.bf16.msrb.mxu3 %v6807_v46  ;;  %3314 = vmatmul.bf16.vlgmr.msra.gmra.mxu1 %v3114_v7  ;;  %v3063_v46 = vadd.f32 %v8760_v49, %v3025_v45  ;;  %v3119_v7 = vpack.c.bf16 %v3047_v2, %v3045_v1  ;;  %v6844_v34 = vld [vmem:[#allocation18 + $0x20] sm:$0xff] }
 0x389   : > { %3452 = vmatpush.bf16.msrb.mxu2 %v6798_v48  ;;  %v3127_v48 = vpack.c.bf16 %v3063_v46, %v3061_v13  ;;  %v2939_v13 = vld [vmem:[#allocation2 + $0x8] sm:$0xff]  ;;  %v2938_v46 = vld [vmem:[#allocation2 + $0xf0] sm:$0xff] }
 0x38a   : > { %3501 = vmatpush.bf16.msrb.mxu3 %v6806_v36  ;;  %v3128_v36 = vpack.c.bf16 %v3064_v47, %v3062_v35  ;;  %v2940_v35 = vld [vmem:[#allocation2 + $0x78] sm:$0xff] }
 0x38d   : > { %3453 = vmatpush.bf16.msrb.mxu2 %v6797_v37  ;;  %v6847_v37 = vld [vmem:[#allocation18 + $0x38] sm:$0xff] }
 0x38e   : > { %3502 = vmatpush.bf16.msrb.mxu3 %v6805_v14  ;;  %v3003_v14 = vld [vmem:[#allocation3 + $0xd0] sm:$0xff] }
 0x38f   : > { %v3041_v16 = vadd.f32 %v8760_v49, %v3003_v14 }
 0x391   : > { %3454 = vmatpush.bf16.msrb.mxu2 %v6796_v40  ;;  %v3004_v40 = vld [vmem:[#allocation3 + $0xb0] sm:$0xff]  ;;  %v3117_v25 = vpack.c.bf16 %v3043_v39, %v3041_v16  ;;  %v6843_v16 = vld [vmem:[#allocation18 + $0x18] sm:$0xff] }
 0x392   : > { %3503 = vmatpush.bf16.msrb.mxu3 %v6804_v56  ;;  %v3006_v56 = vld [vmem:[#allocation3 + $0x40] sm:$0xff]  ;;  %v3042_v57 = vadd.f32 %v8762_v29, %v3004_v40  ;;  %v2942_v40 = vld [vmem:[#allocation2 + $0x58] sm:$0xff] }
 0x393   : > { %v3044_v18 = vadd.f32 %v8762_v29, %v3006_v56  ;;  %v6845_v29 = vld [vmem:[#allocation18 + $0x28] sm:$0xff]  ;;  %v2943_v39 = vld [vmem:[#allocation2 + $0x40] sm:$0xff] }
 0x394   : > { %3290 = vmatmul.bf16.gmra.mxu2 %v3123_v61  ;;  %3270 = vmatmul.bf16.gmra.mxu0 %v3115_v32  ;;  %v2944_v56 = vld [vmem:[#allocation2 + $0xc8] sm:$0xff] }
 0x395   : > { %3455 = vmatpush.bf16.msrb.mxu2 %v6795_v60  ;;  %3339 = vmatmul.bf16.gmra.mxu3 %v3124_v22  ;;  %v8792_v60 = vperm.slane %v2957_v15, 0  ;;  %v3118_v61 = vpack.c.bf16 %v3044_v18, %v3042_v57  ;;  %v2927_v22 = vld [vmem:[#allocation2 + $0xd8] sm:$0xff] }
 0x396   : > { %3504 = vmatpush.bf16.msrb.mxu3 %v6803_v21  ;;  %3319 = vmatmul.bf16.gmra.mxu1 %v3116_v58  ;;  %v8794_v21 = vperm.slane %v2957_v15, 1  ;;  %v2941_v15 = vld [vmem:[#allocation2 + $0x38] sm:$0xff] }
 0x397   : > { %v2965_v41 = vadd.f32 %v8792_v60, %v2927_v22  ;;  %v2971_v31 = vadd.f32 %v8792_v60, %v2933_v12  ;;  %v2973_v54 = vadd.f32 %v8792_v60, %v2935_v52  ;;  %v2975_v47 = vadd.f32 %v8792_v60, %v2937_v33  ;;  %v2953_v33 = vld [vmem:[#allocation2 + $0xa0] sm:$0xff] }
 0x398   : > { %v2968_v49 = vadd.f32 %v8794_v21, %v2930_v9  ;;  %v2972_v32 = vadd.f32 %v8794_v21, %v2934_v53  ;;  %v2974_v55 = vadd.f32 %v8794_v21, %v2936_v30  ;;  %v2979_v57 = vadd.f32 %v8792_v60, %v2941_v15 }
 0x399   : > { %3456 = vmatpush.bf16.msrb.mxu2 %v6794_v26  ;;  %v2926_v26 = vld [vmem:[#allocation2] sm:$0xff]  ;;  %v3069_v58 = vpack.c.bf16 %v2973_v54, %v2971_v31  ;;  %v2981_v18 = vadd.f32 %v8792_v60, %v2943_v39  ;;  %v2986_v3 = vadd.f32 %v8794_v21, %v2948_v43 }
 0x39a   : > { %3505 = vmatpush.bf16.msrb.mxu3 %v6802_v24  ;;  %v2928_v24 = vld [vmem:[#allocation2 + $0x18] sm:$0xff]  ;;  %v2964_v27 = vadd.f32 %v8794_v21, %v2926_v26  ;;  %v3070_v45 = vpack.c.bf16 %v2974_v55, %v2972_v32  ;;  %v6840_v39 = vld [vmem:[#allocation18] sm:$0xff] }
 0x39b   : > { %v6831_v26 = vld [vmem:[#allocation15 + $0x38] sm:$0xff] }
 0x39c   : > { %3701 = vmatpush.bf16.msrb.mxu0 %v6831_v26  ;;  %v6827_v32 = vld [vmem:[#allocation15 + $0x18] sm:$0xff] }
 0x39d   : > { %3457 = vmatpush.bf16.msrb.mxu2 %v6793_v62  ;;  %v2963_v62 = vadd.f32 %v8792_v60, %v2925_v59  ;;  %v2982_v59 = vadd.f32 %v8794_v21, %v2944_v56 }
 0x39e   : > { %3506 = vmatpush.bf16.msrb.mxu3 %v6801_v28  ;;  %v2966_v28 = vadd.f32 %v8794_v21, %v2928_v24 }
 0x39f   : > { %v3065_v63 = vpack.c.bf16 %v2965_v41, %v2963_v62 }
 0x3a0   : > { %v3066_v42 = vpack.c.bf16 %v2966_v28, %v2964_v27  ;;  %v2945_v27 = vld [vmem:[#allocation2 + $0xe0] sm:$0xff]  ;;  %v6830_v28 = vld [vmem:[#allocation15 + $0x30] sm:$0xff] }
 0x3a1   : > { %3458 = vmatpush.bf16.msrb.mxu2 %v6792_v8  ;;  %v2929_v8 = vld [vmem:[#allocation2 + $0x50] sm:$0xff]  ;;  %3702 = vmatpush.bf16.msrb.mxu0 %v6830_v28  ;;  %v2983_v44 = vadd.f32 %v8792_v60, %v2945_v27 }
 0x3a2   : > { %3507 = vmatpush.bf16.msrb.mxu3 %v6800_v50  ;;  %v3120_v50 = vpack.c.bf16 %v3048_v6, %v3046_v5  ;;  %v2967_v20 = vadd.f32 %v8792_v60, %v2929_v8  ;;  %v6829_v8 = vld [vmem:[#allocation15 + $0x28] sm:$0xff] }
 0x3a4   : > { %3295 = vmatmul.bf16.gmra.mxu2 %v3125_v51  ;;  %3275 = vmatmul.bf16.gmra.mxu0 %v3117_v25  ;;  %v2969_v51 = vadd.f32 %v8792_v60, %v2931_v17  ;;  %v2980_v25 = vadd.f32 %v8794_v21, %v2942_v40 }
 0x3a5   : > { %3344 = vmatmul.bf16.gmra.mxu3 %v3126_v10  ;;  %4327 = vmatpush.bf16.msra.mxu2 %v6847_v37  ;;  %v2970_v10 = vadd.f32 %v8794_v21, %v2932_v19  ;;  %v2978_v37 = vadd.f32 %v8794_v21, %v2940_v35  ;;  %v2949_v19 = vld [vmem:[#allocation2 + $0xa8] sm:$0xff]  ;;  %v2991_v35 = vadd.f32 %v8792_v60, %v2953_v33 }
 0x3a6   : > { %3324 = vmatmul.bf16.gmra.mxu1 %v3118_v61  ;;  %v3067_v23 = vpack.c.bf16 %v2969_v51, %v2967_v20  ;;  %v3073_v61 = vpack.c.bf16 %v2981_v18, %v2979_v57  ;;  %v3074_v22 = vpack.c.bf16 %v2982_v59, %v2980_v25  ;;  %3703 = vmatpush.bf16.msrb.mxu0 %v6829_v8  ;;  %v6828_v20 = vld [vmem:[#allocation15 + $0x20] sm:$0xff]  ;;  %v6841_v51 = vld [vmem:[#allocation18 + $0x8] sm:$0xff] }
 0x3a7   : > { %v3068_v11 = vpack.c.bf16 %v2970_v10, %v2968_v49  ;;  %v2951_v49 = vld [vmem:[#allocation2 + $0x10] sm:$0xff] }
 0x3a8   : > { %v2950_v10 = vld [vmem:[#allocation2 + $0xd0] sm:$0xff] }
 0x3a9   : > { %4328 = vmatpush.bf16.msra.mxu2 %v6846_v0  ;;  %v2946_v0 = vld [vmem:[#allocation2 + $0x90] sm:$0xff]  ;;  %v2988_v12 = vadd.f32 %v8794_v21, %v2950_v10 }
 0x3aa   : > { %v2984_v2 = vadd.f32 %v8794_v21, %v2946_v0  ;;  %3704 = vmatpush.bf16.msrb.mxu0 %v6828_v20  ;;  %v6825_v57 = vld [vmem:[#allocation15 + $0x8] sm:$0xff]  ;;  %v6863_v0 = vld [vmem:[#allocation21 + $0x38] sm:$0xff] }
 0x3ad   : > { %4329 = vmatpush.bf16.msra.mxu2 %v6845_v29  ;;  %v2989_v29 = vadd.f32 %v8792_v60, %v2951_v49 }
 0x3ae   : > { %3705 = vmatpush.bf16.msrb.mxu0 %v6827_v32  ;;  %v6862_v32 = vld [vmem:[#allocation21 + $0x30] sm:$0xff] }
 0x3b1   : > { %4330 = vmatpush.bf16.msra.mxu2 %v6844_v34  ;;  %v2955_v34 = vld [vmem:[#allocation2 + $0x20] sm:$0xff] }
 0x3b4   : > { %3300 = vmatmul.bf16.gmra.mxu2 %v3127_v48  ;;  %3280 = vmatmul.bf16.gmra.mxu0 %v3119_v7  ;;  %v2977_v48 = vadd.f32 %v8792_v60, %v2939_v13  ;;  %v3076_v7 = vpack.c.bf16 %v2986_v3, %v2984_v2  ;;  %v2954_v13 = vld [vmem:[#allocation2 + $0xf8] sm:$0xff] }
 0x3b5   : > { %3349 = vmatmul.bf16.gmra.mxu3 %v3128_v36  ;;  %v2976_v36 = vadd.f32 %v8794_v21, %v2938_v46  ;;  %4331 = vmatpush.bf16.msra.mxu2 %v6843_v16  ;;  %v2956_v46 = vld [vmem:[#allocation2 + $0x98] sm:$0xff] }
 0x3b6   : > { %3329 = vmatmul.bf16.gmra.mxu1 %v3120_v50  ;;  %v3071_v14 = vpack.c.bf16 %v2977_v48, %v2975_v47  ;;  %v2993_v47 = vadd.f32 %v8792_v60, %v2955_v34  ;;  %v2992_v48 = vadd.f32 %v8794_v21, %v2954_v13  ;;  %v6826_v16 = vld [vmem:[#allocation15 + $0x10] sm:$0xff] }
 0x3b7   : > { %v3072_v38 = vpack.c.bf16 %v2978_v37, %v2976_v36  ;;  %v2994_v36 = vadd.f32 %v8794_v21, %v2956_v46  ;;  %3706 = vmatpush.bf16.msrb.mxu0 %v6826_v16 }
 0x3b9   : > { %v3080_v15 = vpack.c.bf16 %v2994_v36, %v2992_v48 }
 0x3bb   : > { %3707 = vmatpush.bf16.msrb.mxu0 %v6825_v57 }
 0x3c4   : > { %3459 = vmatmul.bf16.vlgmr.msrb.gmra.mxu2 %v3065_v63  ;;  %v6842_v63 = vld [vmem:[#allocation18 + $0x10] sm:$0xff] }
 0x3c5   : > { %3508 = vmatmul.bf16.vlgmr.msrb.gmra.mxu3 %v3066_v42  ;;  %v2947_v42 = vld [vmem:[#allocation2 + $0x70] sm:$0xff]  ;;  %4332 = vmatpush.bf16.msra.mxu2 %v6842_v63 }
 0x3c6   : > { %v2985_v1 = vadd.f32 %v8792_v60, %v2947_v42 }
 0x3c8   : > { %v3075_v6 = vpack.c.bf16 %v2985_v1, %v2983_v44  ;;  %v8859_v44 = vld [vmem:[%s9959_s15] ss:$0 sm:$0xff] }
 0x3c9   : > { %4333 = vmatpush.bf16.msra.mxu2 %v6841_v51 }
 0x3cd   : > { %4334 = vmatpush.bf16.msra.mxu2 %v6840_v39 }
 0x3d4   : > { %3464 = vmatmul.bf16.gmra.mxu2 %v3067_v23  ;;  %v2952_v23 = vld [vmem:[#allocation2 + $0x28] sm:$0xff] }
 0x3d5   : > { %3513 = vmatmul.bf16.gmra.mxu3 %v3068_v11  ;;  %v2987_v11 = vadd.f32 %v8792_v60, %v2949_v19  ;;  %v2990_v52 = vadd.f32 %v8794_v21, %v2952_v23  ;;  %v6824_v21 = vld [vmem:[#allocation15] sm:$0xff] }
 0x3d6   : > { %3708 = vmatpush.bf16.msrb.mxu0 %v6824_v21 }
 0x3d7   : > { %v3077_v31 = vpack.c.bf16 %v2989_v29, %v2987_v11  ;;  %v3078_v54 = vpack.c.bf16 %v2990_v52, %v2988_v12  ;;  %v8872_v11 = vld [vmem:[%s9890_s9] ss:$0 sm:$0xff] }
 0x3da   : > { %4953 = vmatpush.bf16.msra.mxu0 %v6863_v0 }
 0x3de   : > { %4954 = vmatpush.bf16.msra.mxu0 %v6862_v32 }
 0x3e4   : > { %3469 = vmatmul.bf16.gmra.mxu2 %v3069_v58 }
 0x3e5   : > { %3518 = vmatmul.bf16.gmra.mxu3 %v3070_v45 }
 0x3f4   : > { %3474 = vmatmul.bf16.gmra.mxu2 %v3071_v14 }
 0x3f5   : > { %3523 = vmatmul.bf16.gmra.mxu3 %v3072_v38  ;;  %v3079_v38 = vpack.c.bf16 %v2993_v47, %v2991_v35 }
 0x401   : > { %v3266_v40 = vpop.f32.mrf.mxu0 }
 0x403   : > { %v3315_v56 = vpop.f32.mrf.mxu1 }
 0x404   : > { %3479 = vmatmul.bf16.gmra.mxu2 %v3073_v61 }
 0x405   : > { %3528 = vmatmul.bf16.gmra.mxu3 %v3074_v22 }
 0x407   : > { %v3286_v24 = vpop.f32.mrf.mxu2 }
 0x408   : > { %v3335_v62 = vpop.f32.mrf.mxu3 }
 0x409   : > { %v8820_v41 = vadd.f32 %v3335_v62, %v3286_v24  ;;  %v3268_v59 = vpop.f32.mrf.mxu0  ;;  %v3316_v24 = vadd.f32 %v3315_v56, %v3266_v40 }
 0x40b   : > { %v3317_v61 = vpop.f32.mrf.mxu1 }
 0x40c   : > { %v3318_v1 = vadd.f32 %v3317_v61, %v3268_v59 }
 0x40f   : > { %v8826_v4 = vpop.f32.mrf.mxu2 }
 0x410   : > { %v8828_v5 = vpop.f32.mrf.mxu3 }
 0x411   : > { %v3271_v63 = vpop.f32.mrf.mxu0 }
 0x413   : > { %v3320_v42 = vpop.f32.mrf.mxu1 }
 0x414   : > { %3484 = vmatmul.bf16.gmra.mxu2 %v3075_v6  ;;  %v3321_v51 = vadd.f32 %v3320_v42, %v3271_v63 }
 0x415   : > { %3533 = vmatmul.bf16.gmra.mxu3 %v3076_v7 }
 0x417   : > { %v3291_v50 = vpop.f32.mrf.mxu2 }
 0x418   : > { %v3340_v17 = vpop.f32.mrf.mxu3 }
 0x419   : > { %v8830_v9 = vadd.f32 %v3340_v17, %v3291_v50  ;;  %v8865_v50 = vld [vmem:[%s9960_s5] ss:$0 sm:$0xff]  ;;  %v3273_v19 = vpop.f32.mrf.mxu0 }
 0x41b   : > { %v3322_v20 = vpop.f32.mrf.mxu1 }
 0x41c   : > { %v3323_v35 = vadd.f32 %v3322_v20, %v3273_v19 }
 0x41f   : > { %v8836_v53 = vpop.f32.mrf.mxu2 }
 0x420   : > { %v8838_v30 = vpop.f32.mrf.mxu3 }
 0x421   : > { %v3276_v34 = vpop.f32.mrf.mxu0 }
 0x423   : > { %v3325_v13 = vpop.f32.mrf.mxu1 }
 0x424   : > { %3489 = vmatmul.bf16.gmra.mxu2 %v3077_v31  ;;  %v3326_v39 = vadd.f32 %v3325_v13, %v3276_v34 }
 0x425   : > { %3538 = vmatmul.bf16.gmra.mxu3 %v3078_v54  ;;  %v6855_v54 = vld [vmem:[#allocation19 + $0x38] sm:$0xff] }
 0x426   : > { %4468 = vmatpush.bf16.msra.mxu3 %v6855_v54  ;;  %v6860_v54 = vld [vmem:[#allocation21 + $0x20] sm:$0xff] }
 0x427   : > { %v3296_v55 = vpop.f32.mrf.mxu2 }
 0x428   : > { %v3345_v58 = vpop.f32.mrf.mxu3 }
 0x429   : > { %v8840_v45 = vadd.f32 %v3345_v58, %v3296_v55 }
 0x42f   : > { %v8846_v37 = vpop.f32.mrf.mxu2 }
 0x430   : > { %v8848_v14 = vpop.f32.mrf.mxu3 }
 0x434   : > { %3494 = vmatmul.bf16.gmra.mxu2 %v3079_v38 }
 0x435   : > { %3543 = vmatmul.bf16.gmra.mxu3 %v3080_v15 }
 0x437   : > { %v3301_v60 = vpop.f32.mrf.mxu2 }
 0x438   : > { %v3350_v18 = vpop.f32.mrf.mxu3 }
 0x439   : > { %v8850_v25 = vadd.f32 %v3350_v18, %v3301_v60  ;;  %v3278_v60 = vpop.f32.mrf.mxu0  ;;  %v3327_v18 = vpop.f32.mrf.mxu1 }
 0x43f   : > { %v8852_v22 = vpop.f32.mrf.mxu2 }
 0x440   : > { %v8854_v26 = vpop.f32.mrf.mxu3 }
 0x447   : > { %v3460_v62 = vpop.f32.mrf.mxu2 }
 0x448   : > { %v3509_v27 = vpop.f32.mrf.mxu3  ;;  %v3461_v28 = vadd.f32 %v3460_v62, %v3316_v24  ;;  %v6854_v62 = vld [vmem:[#allocation19 + $0x30] sm:$0xff] }
 0x449   : > { %4469 = vmatpush.bf16.msra.mxu3 %v6854_v62 }
 0x44a   : > { %v3510_v43 = vadd.f32 %v3509_v27, %v3461_v28  ;;  %v6861_v27 = vld [vmem:[#allocation21 + $0x28] sm:$0xff] }
 0x44b   : > { %4955 = vmatpush.bf16.msra.mxu0 %v6861_v27 }
 0x44c   : > { %v3553_v2 = vadd.f32 %v8859_v44, %v3510_v43  ;;  %v3328_v43 = vadd.f32 %v3327_v18, %v3278_v60 }
 0x44e   : > { %v3569_v8 = vmax.f32 %v3553_v2, 0.0 }
 0x44f   : > { %v3462_v3 = vpop.f32.mrf.mxu2  ;;  %4956 = vmatpush.bf16.msra.mxu0 %v6860_v54 }
 0x450   : > { %v3511_v6 = vpop.f32.mrf.mxu3  ;;  %v3463_v7 = vadd.f32 %v3462_v3, %v3318_v1  ;;  %v3589_v10 = vmul.f32 %v8865_v50, %v3569_v8  ;;  %v3330_v8 = vpop.f32.mrf.mxu1 }
 0x452   : > { %v3512_v17 = vadd.f32 %v3511_v6, %v3463_v7  ;;  %v3609_v58 = vadd.f32 %v8872_v11, %v3589_v10  ;;  %v3281_v7 = vpop.f32.mrf.mxu0 }
 0x453   : > { %v3331_v20 = vadd.f32 %v3330_v8, %v3281_v7 }
 0x454   : > { %v3554_v49 = vadd.f32 %v8859_v44, %v3512_v17 }
 0x456   : > { %v3570_v23 = vmax.f32 %v3554_v49, 0.0 }
 0x457   : > { %v3465_v29 = vpop.f32.mrf.mxu2 }
 0x458   : > { %v3514_v12 = vpop.f32.mrf.mxu3  ;;  %v3590_v52 = vmul.f32 %v8865_v50, %v3570_v23  ;;  %v3466_v31 = vadd.f32 %v3465_v29, %v3321_v51  ;;  %v3332_v34 = vpop.f32.mrf.mxu1 }
 0x45a   : > { %v3515_v55 = vadd.f32 %v3514_v12, %v3466_v31  ;;  %v3610_v33 = vadd.f32 %v8872_v11, %v3590_v52  ;;  %v6853_v31 = vld [vmem:[#allocation19 + $0x28] sm:$0xff] }
 0x45b   : > { %4470 = vmatpush.bf16.msra.mxu3 %v6853_v31  ;;  %v3343_v31 = vadd.f32 %v8838_v30, %v8836_v53 }
 0x45c   : > { %v8877_v46 = vpack.c.bf16 %v3610_v33, %v3609_v58  ;;  %v3555_v47 = vadd.f32 %v8859_v44, %v3515_v55  ;;  %v3283_v33 = vpop.f32.mrf.mxu0 }
 0x45e   : > { %3709 = vmatmul.bf16.vlgmr.msrb.gmra.mxu0 %v8877_v46  ;;  %4335 = vmatmul.bf16.vlgmr.msra.gmra.mxu2 %v8877_v46  ;;  %v3571_v15 = vmax.f32 %v3555_v47, 0.0 }
 0x45f   : > { %v3467_v48 = vpop.f32.mrf.mxu2 }
 0x460   : > { %v3516_v36 = vpop.f32.mrf.mxu3  ;;  %v3468_v38 = vadd.f32 %v3467_v48, %v3323_v35  ;;  %v3591_v56 = vmul.f32 %v8865_v50, %v3571_v15  ;;  %v3333_v35 = vadd.f32 %v3332_v34, %v3283_v33 }
 0x462   : > { %v3517_v16 = vadd.f32 %v3516_v36, %v3468_v38  ;;  %v3611_v63 = vadd.f32 %v8872_v11, %v3591_v56 }
 0x464   : > { %v3556_v40 = vadd.f32 %v8859_v44, %v3517_v16 }
 0x466   : > { %v3572_v57 = vmax.f32 %v3556_v40, 0.0 }
 0x467   : > { %v3470_v21 = vpop.f32.mrf.mxu2 }
 0x468   : > { %v3519_v59 = vpop.f32.mrf.mxu3  ;;  %v3592_v61 = vmul.f32 %v8865_v50, %v3572_v57  ;;  %v3471_v24 = vadd.f32 %v3470_v21, %v3326_v39 }
 0x46a   : > { %v3520_v28 = vadd.f32 %v3519_v59, %v3471_v24  ;;  %v3612_v42 = vadd.f32 %v8872_v11, %v3592_v61  ;;  %v6852_v59 = vld [vmem:[#allocation19 + $0x20] sm:$0xff]  ;;  %v6859_v61 = vld [vmem:[#allocation21 + $0x18] sm:$0xff] }
 0x46b   : > { %4471 = vmatpush.bf16.msra.mxu3 %v6852_v59  ;;  %4957 = vmatpush.bf16.msra.mxu0 %v6859_v61  ;;  %v6856_v61 = vld [vmem:[#allocation21] sm:$0xff] }
 0x46c   : > { %v8887_v0 = vpack.c.bf16 %v3612_v42, %v3611_v63  ;;  %v3557_v1 = vadd.f32 %v8859_v44, %v3520_v28  ;;  %v3338_v63 = vadd.f32 %v8828_v5, %v8826_v4 }
 0x46e   : > { %3714 = vmatmul.bf16.gmra.mxu0 %v8887_v0  ;;  %4340 = vmatmul.bf16.gmra.mxu2 %v8887_v0  ;;  %v3573_v17 = vmax.f32 %v3557_v1, 0.0 }
 0x46f   : > { %v3472_v2 = vpop.f32.mrf.mxu2 }
 0x470   : > { %v3521_v3 = vpop.f32.mrf.mxu3  ;;  %v3473_v6 = vadd.f32 %v3472_v2, %v3328_v43  ;;  %v3593_v49 = vmul.f32 %v8865_v50, %v3573_v17  ;;  %v6839_v2 = vld [vmem:[#allocation16 + $0x38] sm:$0xff] }
 0x471   : > { %3842 = vmatpush.bf16.msrb.mxu1 %v6839_v2 }
 0x472   : > { %v3522_v19 = vadd.f32 %v3521_v3, %v3473_v6  ;;  %v3613_v55 = vadd.f32 %v8872_v11, %v3593_v49  ;;  %v6858_v49 = vld [vmem:[#allocation21 + $0x10] sm:$0xff] }
 0x473   : > { %4958 = vmatpush.bf16.msra.mxu0 %v6858_v49 }
 0x474   : > { %v3558_v51 = vadd.f32 %v8859_v44, %v3522_v19 }
 0x476   : > { %v3574_v10 = vmax.f32 %v3558_v51, 0.0  ;;  %v6851_v51 = vld [vmem:[#allocation19 + $0x18] sm:$0xff] }
 0x477   : > { %v3475_v23 = vpop.f32.mrf.mxu2  ;;  %4472 = vmatpush.bf16.msra.mxu3 %v6851_v51  ;;  %v6848_v51 = vld [vmem:[#allocation19] sm:$0xff] }
 0x478   : > { %v3524_v29 = vpop.f32.mrf.mxu3  ;;  %v3594_v12 = vmul.f32 %v8865_v50, %v3574_v10  ;;  %v3476_v52 = vadd.f32 %v3475_v23, %v3331_v20  ;;  %v6838_v10 = vld [vmem:[#allocation16 + $0x30] sm:$0xff] }
 0x479   : > { %3843 = vmatpush.bf16.msrb.mxu1 %v6838_v10 }
 0x47a   : > { %v3525_v32 = vadd.f32 %v3524_v29, %v3476_v52  ;;  %v3614_v58 = vadd.f32 %v8872_v11, %v3594_v12 }
 0x47c   : > { %v8897_v13 = vpack.c.bf16 %v3614_v58, %v3613_v55  ;;  %v3559_v47 = vadd.f32 %v8859_v44, %v3525_v32  ;;  %v6837_v58 = vld [vmem:[#allocation16 + $0x28] sm:$0xff] }
 0x47d   : > { %3844 = vmatpush.bf16.msrb.mxu1 %v6837_v58  ;;  %v6871_v58 = vld [vmem:[#allocation22 + $0x38] sm:$0xff] }
 0x47e   : > { %3719 = vmatmul.bf16.gmra.mxu0 %v8897_v13  ;;  %4345 = vmatmul.bf16.gmra.mxu2 %v8897_v13  ;;  %v3575_v15 = vmax.f32 %v3559_v47, 0.0 }
 0x47f   : > { %v3477_v48 = vpop.f32.mrf.mxu2 }
 0x480   : > { %v3526_v36 = vpop.f32.mrf.mxu3  ;;  %v3478_v38 = vadd.f32 %v3477_v48, %v3333_v35  ;;  %v3595_v40 = vmul.f32 %v8865_v50, %v3575_v15  ;;  %v6850_v15 = vld [vmem:[#allocation19 + $0x10] sm:$0xff] }
 0x481   : > { %4473 = vmatpush.bf16.msra.mxu3 %v6850_v15 }
 0x482   : > { %v3527_v16 = vadd.f32 %v3526_v36, %v3478_v38  ;;  %v3615_v62 = vadd.f32 %v8872_v11, %v3595_v40 }
 0x484   : > { %v3560_v39 = vadd.f32 %v8859_v44, %v3527_v16  ;;  %v6857_v16 = vld [vmem:[#allocation21 + $0x8] sm:$0xff] }
 0x485   : > { %4959 = vmatpush.bf16.msra.mxu0 %v6857_v16 }
 0x486   : > { %v3576_v56 = vmax.f32 %v3560_v39, 0.0  ;;  %v6836_v39 = vld [vmem:[#allocation16 + $0x20] sm:$0xff] }
 0x487   : > { %v3480_v57 = vpop.f32.mrf.mxu2  ;;  %3845 = vmatpush.bf16.msrb.mxu1 %v6836_v39 }
 0x488   : > { %v3529_v60 = vpop.f32.mrf.mxu3  ;;  %v3596_v18 = vmul.f32 %v8865_v50, %v3576_v56  ;;  %v3481_v21 = vadd.f32 %v3480_v57, %v8820_v41 }
 0x489   : > { %4960 = vmatpush.bf16.msra.mxu0 %v6856_v61 }
 0x48a   : > { %v3530_v24 = vadd.f32 %v3529_v60, %v3481_v21  ;;  %v3616_v27 = vadd.f32 %v8872_v11, %v3596_v18  ;;  %v6835_v60 = vld [vmem:[#allocation16 + $0x18] sm:$0xff]  ;;  %v3348_v21 = vadd.f32 %v8848_v14, %v8846_v37 }
 0x48b   : > { %3846 = vmatpush.bf16.msrb.mxu1 %v6835_v60 }
 0x48c   : > { %v8908_v28 = vpack.c.bf16 %v3616_v27, %v3615_v62  ;;  %v3561_v42 = vadd.f32 %v8859_v44, %v3530_v24  ;;  %v6834_v27 = vld [vmem:[#allocation16 + $0x10] sm:$0xff] }
 0x48e   : > { %3724 = vmatmul.bf16.gmra.mxu0 %v8908_v28  ;;  %4350 = vmatmul.bf16.gmra.mxu2 %v8908_v28  ;;  %v3577_v3 = vmax.f32 %v3561_v42, 0.0 }
 0x48f   : > { %v3482_v41 = vpop.f32.mrf.mxu2  ;;  %3847 = vmatpush.bf16.msrb.mxu1 %v6834_v27 }
 0x490   : > { %v3531_v43 = vpop.f32.mrf.mxu3  ;;  %v3483_v1 = vadd.f32 %v3482_v41, %v3338_v63  ;;  %v3597_v8 = vmul.f32 %v8865_v50, %v3577_v3 }
 0x492   : > { %v3532_v6 = vadd.f32 %v3531_v43, %v3483_v1  ;;  %v3617_v29 = vadd.f32 %v8872_v11, %v3597_v8 }
 0x494   : > { %v3562_v7 = vadd.f32 %v8859_v44, %v3532_v6 }
 0x496   : > { %v3578_v17 = vmax.f32 %v3562_v7, 0.0 }
 0x497   : > { %v3485_v19 = vpop.f32.mrf.mxu2 }
 0x498   : > { %v3534_v4 = vpop.f32.mrf.mxu3  ;;  %v3598_v5 = vmul.f32 %v8865_v50, %v3578_v17  ;;  %v3486_v20 = vadd.f32 %v3485_v19, %v8830_v9 }
 0x49a   : > { %v3535_v23 = vadd.f32 %v3534_v4, %v3486_v20  ;;  %v3618_v12 = vadd.f32 %v8872_v11, %v3598_v5  ;;  %v3353_v4 = vadd.f32 %v8854_v26, %v8852_v22  ;;  %v6833_v20 = vld [vmem:[#allocation16 + $0x8] sm:$0xff] }
 0x49b   : > { %3848 = vmatpush.bf16.msrb.mxu1 %v6833_v20 }
 0x49c   : > { %v8921_v52 = vpack.c.bf16 %v3618_v12, %v3617_v29  ;;  %v3563_v54 = vadd.f32 %v8859_v44, %v3535_v23 }
 0x49e   : > { %3729 = vmatmul.bf16.gmra.mxu0 %v8921_v52  ;;  %4355 = vmatmul.bf16.gmra.mxu2 %v8921_v52  ;;  %v3579_v33 = vmax.f32 %v3563_v54, 0.0 }
 0x49f   : > { %v3487_v9 = vpop.f32.mrf.mxu2 }
 0x4a0   : > { %v3536_v32 = vpop.f32.mrf.mxu3  ;;  %v3488_v55 = vadd.f32 %v3487_v9, %v3343_v31  ;;  %v3599_v47 = vmul.f32 %v8865_v50, %v3579_v33  ;;  %v6832_v31 = vld [vmem:[#allocation16] sm:$0xff]  ;;  %v8966_v33 = vld [vmem:[%s9892_s11] ss:$0 sm:$0xff] }
 0x4a1   : > { %3849 = vmatpush.bf16.msrb.mxu1 %v6832_v31 }
 0x4a2   : > { %v3537_v34 = vadd.f32 %v3536_v32, %v3488_v55  ;;  %v3619_v56 = vadd.f32 %v8872_v11, %v3599_v47  ;;  %v8973_v47 = vld [vmem:[%s9961_s4] ss:$0 sm:$0xff] }
 0x4a4   : > { %v3564_v35 = vadd.f32 %v8859_v44, %v3537_v34 }
 0x4a5   : > { %5094 = vmatpush.bf16.msra.mxu1 %v6871_v58 }
 0x4a6   : > { %v3580_v48 = vmax.f32 %v3564_v35, 0.0 }
 0x4a7   : > { %v3490_v36 = vpop.f32.mrf.mxu2 }
 0x4a8   : > { %v3539_v53 = vpop.f32.mrf.mxu3  ;;  %v3600_v30 = vmul.f32 %v8865_v50, %v3580_v48  ;;  %v3491_v38 = vadd.f32 %v3490_v36, %v8840_v45  ;;  %v6849_v45 = vld [vmem:[#allocation19 + $0x8] sm:$0xff] }
 0x4a9   : > { %4474 = vmatpush.bf16.msra.mxu3 %v6849_v45 }
 0x4aa   : > { %v3540_v40 = vadd.f32 %v3539_v53, %v3491_v38  ;;  %v3620_v57 = vadd.f32 %v8872_v11, %v3600_v30 }
 0x4ac   : > { %v8934_v18 = vpack.c.bf16 %v3620_v57, %v3619_v56  ;;  %v3565_v59 = vadd.f32 %v8859_v44, %v3540_v40  ;;  %v6869_v57 = vld [vmem:[#allocation22 + $0x28] sm:$0xff] }
 0x4ad   : > { %4475 = vmatpush.bf16.msra.mxu3 %v6848_v51 }
 0x4ae   : > { %3734 = vmatmul.bf16.gmra.mxu0 %v8934_v18  ;;  %4360 = vmatmul.bf16.gmra.mxu2 %v8934_v18  ;;  %v3581_v42 = vmax.f32 %v3565_v59, 0.0 }
 0x4af   : > { %v3492_v24 = vpop.f32.mrf.mxu2 }
 0x4b0   : > { %v3541_v62 = vpop.f32.mrf.mxu3  ;;  %v3493_v63 = vadd.f32 %v3492_v24, %v3348_v21  ;;  %v3601_v14 = vmul.f32 %v8865_v50, %v3581_v42 }
 0x4b2   : > { %v3542_v41 = vadd.f32 %v3541_v62, %v3493_v63  ;;  %v3621_v8 = vadd.f32 %v8872_v11, %v3601_v14 }
 0x4b4   : > { %v3566_v37 = vadd.f32 %v8859_v44, %v3542_v41 }
 0x4b6   : > { %v3582_v43 = vmax.f32 %v3566_v37, 0.0 }
 0x4b7   : > { %v3495_v1 = vpop.f32.mrf.mxu2 }
 0x4b8   : > { %v3544_v2 = vpop.f32.mrf.mxu3  ;;  %v3602_v3 = vmul.f32 %v8865_v50, %v3582_v43  ;;  %v3496_v6 = vadd.f32 %v3495_v1, %v8850_v25  ;;  %v6868_v43 = vld [vmem:[#allocation22 + $0x20] sm:$0xff] }
 0x4ba   : > { %v3545_v7 = vadd.f32 %v3544_v2, %v3496_v6  ;;  %v3622_v17 = vadd.f32 %v8872_v11, %v3602_v3 }
 0x4bc   : > { %v8947_v19 = vpack.c.bf16 %v3622_v17, %v3621_v8  ;;  %v3567_v5 = vadd.f32 %v8859_v44, %v3545_v7 }
 0x4be   : > { %3739 = vmatmul.bf16.gmra.mxu0 %v8947_v19  ;;  %4365 = vmatmul.bf16.gmra.mxu2 %v8947_v19  ;;  %v3583_v23 = vmax.f32 %v3567_v5, 0.0 }
 0x4bf   : > { %v3497_v49 = vpop.f32.mrf.mxu2 }
 0x4c0   : > { %v3498_v25 = vadd.f32 %v3497_v49, %v3353_v4  ;;  %v3546_v10 = vpop.f32.mrf.mxu3  ;;  %v3603_v22 = vmul.f32 %v8865_v50, %v3583_v23 }
 0x4c2   : > { %v3547_v29 = vadd.f32 %v3546_v10, %v3498_v25  ;;  %v3623_v9 = vadd.f32 %v8872_v11, %v3603_v22  ;;  %v6867_v10 = vld [vmem:[#allocation22 + $0x18] sm:$0xff] }
 0x4c4   : > { %v3568_v12 = vadd.f32 %v8859_v44, %v3547_v29 }
 0x4c6   : > { %v3584_v26 = vmax.f32 %v3568_v12, 0.0 }
 0x4c8   : > { %v3604_v54 = vmul.f32 %v8865_v50, %v3584_v26  ;;  %v6870_v50 = vld [vmem:[#allocation22 + $0x30] sm:$0xff] }
 0x4c9   : > { %5095 = vmatpush.bf16.msra.mxu1 %v6870_v50 }
 0x4ca   : > { %v3624_v32 = vadd.f32 %v8872_v11, %v3604_v54 }
 0x4cc   : > { %v8959_v55 = vpack.c.bf16 %v3624_v32, %v3623_v9 }
 0x4cd   : > { %5096 = vmatpush.bf16.msra.mxu1 %v6869_v57 }
 0x4ce   : > { %3744 = vmatmul.bf16.gmra.mxu0 %v8959_v55  ;;  %4370 = vmatmul.bf16.gmra.mxu2 %v8959_v55 }
 0x4d1   : > { %5097 = vmatpush.bf16.msra.mxu1 %v6868_v43  ;;  %v6864_v43 = vld [vmem:[#allocation22] sm:$0xff] }
 0x4d5   : > { %5098 = vmatpush.bf16.msra.mxu1 %v6867_v10 }
 0x4db   : > { %v3710_v44 = vpop.f32.mrf.mxu0 }
 0x4dc   : > { %v3711_v11 = vadd.f32 %v8966_v33, %v3710_v44 }
 0x4de   : > { %4961 = vmatmul.bf16.vlgmr.msra.gmra.mxu0 %v8877_v46  ;;  %v3750_v36 = vmax.f32 %v3711_v11, 0.0  ;;  %v6866_v11 = vld [vmem:[#allocation22 + $0x10] sm:$0xff] }
 0x4df   : > { %5099 = vmatpush.bf16.msra.mxu1 %v6866_v11 }
 0x4e1   : > { %v4336_v34 = vpop.f32.mrf.mxu2 }
 0x4e2   : > { %v4337_v30 = vadd.f32 %v8973_v47, %v4336_v34 }
 0x4e3   : > { %v3712_v35 = vpop.f32.mrf.mxu0 }
 0x4e4   : > { %v3713_v48 = vadd.f32 %v8966_v33, %v3712_v35  ;;  %v4376_v39 = vmax.f32 %v4337_v30, 0.0 }
 0x4e6   : > { %v3751_v53 = vmax.f32 %v3713_v48, 0.0 }
 0x4e8   : > { %v3766_v38 = vpack.c.bf16 %v3751_v53, %v3750_v36 }
 0x4e9   : > { %v4338_v15 = vpop.f32.mrf.mxu2 }
 0x4ea   : > { %v4339_v46 = vadd.f32 %v8973_v47, %v4338_v15  ;;  %3850 = vmatmul.bf16.vlgmr.msrb.gmra.mxu1 %v3766_v38 }
 0x4eb   : > { %v3715_v16 = vpop.f32.mrf.mxu0 }
 0x4ec   : > { %v4377_v40 = vmax.f32 %v4339_v46, 0.0  ;;  %v3716_v21 = vadd.f32 %v8966_v33, %v3715_v16 }
 0x4ee   : > { %v4392_v56 = vpack.c.bf16 %v4377_v40, %v4376_v39  ;;  %4966 = vmatmul.bf16.gmra.mxu0 %v8887_v0  ;;  %v3752_v61 = vmax.f32 %v3716_v21, 0.0 }
 0x4f0   : > { %4476 = vmatmul.bf16.vlgmr.msra.gmra.mxu3 %v4392_v56 }
 0x4f1   : > { %v4341_v60 = vpop.f32.mrf.mxu2 }
 0x4f2   : > { %v4342_v62 = vadd.f32 %v8973_v47, %v4341_v60  ;;  %v6865_v60 = vld [vmem:[#allocation22 + $0x8] sm:$0xff] }
 0x4f3   : > { %v3717_v59 = vpop.f32.mrf.mxu0  ;;  %5100 = vmatpush.bf16.msra.mxu1 %v6865_v60 }
 0x4f4   : > { %v3718_v45 = vadd.f32 %v8966_v33, %v3717_v59  ;;  %v4378_v0 = vmax.f32 %v4342_v62, 0.0 }
 0x4f6   : > { %v3753_v24 = vmax.f32 %v3718_v45, 0.0 }
 0x4f7   : > { %5101 = vmatpush.bf16.msra.mxu1 %v6864_v43 }
 0x4f8   : > { %v3767_v27 = vpack.c.bf16 %v3753_v24, %v3752_v61 }
 0x4f9   : > { %v4343_v63 = vpop.f32.mrf.mxu2 }
 0x4fa   : > { %v4344_v42 = vadd.f32 %v8973_v47, %v4343_v63  ;;  %3855 = vmatmul.bf16.gmra.mxu1 %v3767_v27 }
 0x4fb   : > { %v3720_v41 = vpop.f32.mrf.mxu0 }
 0x4fc   : > { %v4379_v37 = vmax.f32 %v4344_v42, 0.0  ;;  %v3721_v2 = vadd.f32 %v8966_v33, %v3720_v41 }
 0x4fe   : > { %v4393_v14 = vpack.c.bf16 %v4379_v37, %v4378_v0  ;;  %4971 = vmatmul.bf16.gmra.mxu0 %v8897_v13  ;;  %v3754_v7 = vmax.f32 %v3721_v2, 0.0 }
 0x500   : > { %4481 = vmatmul.bf16.gmra.mxu3 %v4393_v14 }
 0x501   : > { %v4346_v1 = vpop.f32.mrf.mxu2 }
 0x502   : > { %v4347_v17 = vadd.f32 %v8973_v47, %v4346_v1 }
 0x503   : > { %v3722_v3 = vpop.f32.mrf.mxu0 }
 0x504   : > { %v3723_v6 = vadd.f32 %v8966_v33, %v3722_v3  ;;  %v4380_v13 = vmax.f32 %v4347_v17, 0.0 }
 0x506   : > { %v3755_v8 = vmax.f32 %v3723_v6, 0.0 }
 0x508   : > { %v3768_v4 = vpack.c.bf16 %v3755_v8, %v3754_v7 }
 0x509   : > { %v4348_v5 = vpop.f32.mrf.mxu2 }
 0x50a   : > { %v4349_v20 = vadd.f32 %v8973_v47, %v4348_v5  ;;  %3860 = vmatmul.bf16.gmra.mxu1 %v3768_v4 }
 0x50b   : > { %v3725_v51 = vpop.f32.mrf.mxu0 }
 0x50c   : > { %v4381_v49 = vmax.f32 %v4349_v20, 0.0  ;;  %v3726_v29 = vadd.f32 %v8966_v33, %v3725_v51 }
 0x50e   : > { %v4394_v25 = vpack.c.bf16 %v4381_v49, %v4380_v13  ;;  %4976 = vmatmul.bf16.gmra.mxu0 %v8908_v28  ;;  %v3756_v22 = vmax.f32 %v3726_v29, 0.0 }
 0x510   : > { %4486 = vmatmul.bf16.gmra.mxu3 %v4394_v25 }
 0x511   : > { %v4351_v23 = vpop.f32.mrf.mxu2 }
 0x512   : > { %v4352_v54 = vadd.f32 %v8973_v47, %v4351_v23 }
 0x513   : > { %v3727_v12 = vpop.f32.mrf.mxu0 }
 0x514   : > { %v3728_v31 = vadd.f32 %v8966_v33, %v3727_v12  ;;  %v4382_v28 = vmax.f32 %v4352_v54, 0.0 }
 0x516   : > { %v3757_v26 = vmax.f32 %v3728_v31, 0.0 }
 0x518   : > { %v3769_v9 = vpack.c.bf16 %v3757_v26, %v3756_v22 }
 0x519   : > { %v4353_v32 = vpop.f32.mrf.mxu2 }
 0x51a   : > { %v4354_v58 = vadd.f32 %v8973_v47, %v4353_v32  ;;  %3865 = vmatmul.bf16.gmra.mxu1 %v3769_v9 }
 0x51b   : > { %v3730_v44 = vpop.f32.mrf.mxu0 }
 0x51c   : > { %v4383_v50 = vmax.f32 %v4354_v58, 0.0  ;;  %v3731_v48 = vadd.f32 %v8966_v33, %v3730_v44 }
 0x51e   : > { %v4395_v34 = vpack.c.bf16 %v4383_v50, %v4382_v28  ;;  %4981 = vmatmul.bf16.gmra.mxu0 %v8921_v52  ;;  %v3758_v30 = vmax.f32 %v3731_v48, 0.0  ;;  %v9016_v28 = vld [vmem:[%s9962_s16] ss:$0 sm:$0xff] }
 0x520   : > { %4491 = vmatmul.bf16.gmra.mxu3 %v4395_v34 }
 0x521   : > { %v4356_v35 = vpop.f32.mrf.mxu2 }
 0x522   : > { %v4357_v15 = vadd.f32 %v8973_v47, %v4356_v35 }
 0x523   : > { %v3732_v36 = vpop.f32.mrf.mxu0 }
 0x524   : > { %v3733_v53 = vadd.f32 %v8966_v33, %v3732_v36  ;;  %v4384_v52 = vmax.f32 %v4357_v15, 0.0 }
 0x526   : > { %v3759_v38 = vmax.f32 %v3733_v53, 0.0 }
 0x528   : > { %v3770_v46 = vpack.c.bf16 %v3759_v38, %v3758_v30 }
 0x529   : > { %v4358_v16 = vpop.f32.mrf.mxu2 }
 0x52a   : > { %v4359_v39 = vadd.f32 %v8973_v47, %v4358_v16  ;;  %3870 = vmatmul.bf16.gmra.mxu1 %v3770_v46  ;;  %v9035_v46 = vld [vmem:[%s9964_s25] ss:$0 sm:$0xff] }
 0x52b   : > { %v3735_v40 = vpop.f32.mrf.mxu0 }
 0x52c   : > { %v4385_v56 = vmax.f32 %v4359_v39, 0.0  ;;  %v3736_v59 = vadd.f32 %v8966_v33, %v3735_v40 }
 0x52e   : > { %v4396_v57 = vpack.c.bf16 %v4385_v56, %v4384_v52  ;;  %4986 = vmatmul.bf16.gmra.mxu0 %v8934_v18  ;;  %v3760_v24 = vmax.f32 %v3736_v59, 0.0 }
 0x530   : > { %4496 = vmatmul.bf16.gmra.mxu3 %v4396_v57 }
 0x531   : > { %v4361_v21 = vpop.f32.mrf.mxu2 }
 0x532   : > { %v4362_v27 = vadd.f32 %v8973_v47, %v4361_v21 }
 0x533   : > { %v3737_v45 = vpop.f32.mrf.mxu0 }
 0x534   : > { %v3738_v61 = vadd.f32 %v8966_v33, %v3737_v45  ;;  %v4386_v18 = vmax.f32 %v4362_v27, 0.0 }
 0x536   : > { %v3761_v62 = vmax.f32 %v3738_v61, 0.0 }
 0x538   : > { %v3771_v63 = vpack.c.bf16 %v3761_v62, %v3760_v24 }
 0x539   : > { %v4363_v42 = vpop.f32.mrf.mxu2 }
 0x53a   : > { %v4364_v41 = vadd.f32 %v8973_v47, %v4363_v42  ;;  %3875 = vmatmul.bf16.gmra.mxu1 %v3771_v63 }
 0x53b   : > { %v3740_v0 = vpop.f32.mrf.mxu0 }
 0x53c   : > { %v4387_v37 = vmax.f32 %v4364_v41, 0.0  ;;  %v3741_v2 = vadd.f32 %v8966_v33, %v3740_v0 }
 0x53e   : > { %v4397_v14 = vpack.c.bf16 %v4387_v37, %v4386_v18  ;;  %4991 = vmatmul.bf16.gmra.mxu0 %v8947_v19  ;;  %v3762_v7 = vmax.f32 %v3741_v2, 0.0 }
 0x540   : > { %4501 = vmatmul.bf16.gmra.mxu3 %v4397_v14 }
 0x541   : > { %v4366_v1 = vpop.f32.mrf.mxu2 }
 0x542   : > { %v4367_v17 = vadd.f32 %v8973_v47, %v4366_v1 }
 0x543   : > { %v3742_v3 = vpop.f32.mrf.mxu0 }
 0x544   : > { %v3743_v6 = vadd.f32 %v8966_v33, %v3742_v3  ;;  %v4388_v19 = vmax.f32 %v4367_v17, 0.0 }
 0x546   : > { %v3763_v8 = vmax.f32 %v3743_v6, 0.0 }
 0x548   : > { %v3772_v4 = vpack.c.bf16 %v3763_v8, %v3762_v7 }
 0x549   : > { %v4368_v5 = vpop.f32.mrf.mxu2 }
 0x54a   : > { %v4369_v20 = vadd.f32 %v8973_v47, %v4368_v5  ;;  %3880 = vmatmul.bf16.gmra.mxu1 %v3772_v4 }
 0x54b   : > { %v3745_v51 = vpop.f32.mrf.mxu0 }
 0x54c   : > { %v4389_v13 = vmax.f32 %v4369_v20, 0.0  ;;  %v3746_v10 = vadd.f32 %v8966_v33, %v3745_v51 }
 0x54e   : > { %v4398_v49 = vpack.c.bf16 %v4389_v13, %v4388_v19  ;;  %4996 = vmatmul.bf16.gmra.mxu0 %v8959_v55  ;;  %v3764_v12 = vmax.f32 %v3746_v10, 0.0 }
 0x550   : > { %4506 = vmatmul.bf16.gmra.mxu3 %v4398_v49 }
 0x551   : > { %v4371_v25 = vpop.f32.mrf.mxu2 }
 0x552   : > { %v4372_v22 = vadd.f32 %v8973_v47, %v4371_v25 }
 0x553   : > { %v3747_v23 = vpop.f32.mrf.mxu0 }
 0x554   : > { %v3748_v29 = vadd.f32 %v8966_v33, %v3747_v23  ;;  %v4390_v58 = vmax.f32 %v4372_v22, 0.0 }
 0x556   : > { %v3765_v31 = vmax.f32 %v3748_v29, 0.0 }
 0x558   : > { %v3773_v26 = vpack.c.bf16 %v3765_v31, %v3764_v12 }
 0x559   : > { %v4373_v54 = vpop.f32.mrf.mxu2 }
 0x55a   : > { %v4374_v9 = vadd.f32 %v8973_v47, %v4373_v54  ;;  %3885 = vmatmul.bf16.gmra.mxu1 %v3773_v26  ;;  %v9023_v47 = vld [vmem:[%s9963_s27] ss:$0 sm:$0xff] }
 0x55b   : > { %v4962_v32 = vpop.f32.mrf.mxu0 }
 0x55c   : > { %v4391_v44 = vmax.f32 %v4374_v9, 0.0  ;;  %v4963_v33 = vadd.f32 %v9016_v28, %v4962_v32 }
 0x55e   : > { %v4399_v55 = vpack.c.bf16 %v4391_v44, %v4390_v58  ;;  %v5002_v11 = vmax.f32 %v4963_v33, 0.0 }
 0x560   : > { %4511 = vmatmul.bf16.gmra.mxu3 %v4399_v55 }
 0x563   : > { %v4964_v50 = vpop.f32.mrf.mxu0 }
 0x564   : > { %v4965_v34 = vadd.f32 %v9016_v28, %v4964_v50 }
 0x566   : > { %v5003_v35 = vmax.f32 %v4965_v34, 0.0 }
 0x567   : > { %v3851_v48 = vpop.f32.mrf.mxu1 }
 0x568   : > { %v5018_v36 = vpack.c.bf16 %v5003_v35, %v5002_v11  ;;  %v9026_v53 = vadd.f32 %v9023_v47, %v3851_v48 }
 0x56a   : > { %5102 = vmatmul.bf16.vlgmr.msra.gmra.mxu1 %v5018_v36  ;;  %3891 = vmax.xlane.f32.xlu0 %v9026_v53 }
 0x56b   : > { %v4967_v30 = vpop.f32.mrf.mxu0 }
 0x56c   : > { %v4968_v16 = vadd.f32 %v9016_v28, %v4967_v30 }
 0x56e   : > { %v5004_v57 = vmax.f32 %v4968_v16, 0.0 }
 0x56f   : > { %v3853_v38 = vpop.f32.mrf.mxu1 }
 0x570   : > { %v9030_v15 = vadd.f32 %v9023_v47, %v3853_v38 }
 0x572   : > { %3893 = vmax.xlane.f32.xlu0 %v9030_v15 }
 0x573   : > { %v4477_v39 = vpop.f32.mrf.mxu3  ;;  %v4969_v40 = vpop.f32.mrf.mxu0 }
 0x574   : > { %v9040_v52 = vadd.f32 %v9035_v46, %v4477_v39  ;;  %v4970_v56 = vadd.f32 %v9016_v28, %v4969_v40 }
 0x576   : > { %v5005_v60 = vmax.f32 %v4970_v56, 0.0  ;;  %4517 = vmax.xlane.f32.xlu2 %v9040_v52 }
 0x577   : > { %v3856_v21 = vpop.f32.mrf.mxu1 }
 0x578   : > { %v5019_v59 = vpack.c.bf16 %v5005_v60, %v5004_v57  ;;  %v9045_v45 = vadd.f32 %v9023_v47, %v3856_v21 }
 0x57a   : > { %5107 = vmatmul.bf16.gmra.mxu1 %v5019_v59  ;;  %3895 = vmax.xlane.f32.xlu1 %v9045_v45 }
 0x57b   : > { %v4479_v61 = vpop.f32.mrf.mxu3  ;;  %v4972_v24 = vpop.f32.mrf.mxu0 }
 0x57c   : > { %v9049_v62 = vadd.f32 %v9035_v46, %v4479_v61  ;;  %v4973_v42 = vadd.f32 %v9016_v28, %v4972_v24 }
 0x57e   : > { %4519 = vmax.xlane.f32.xlu0 %v9049_v62  ;;  %v5006_v37 = vmax.f32 %v4973_v42, 0.0 }
 0x57f   : > { %v3858_v27 = vpop.f32.mrf.mxu1 }
 0x580   : > { %v9053_v63 = vadd.f32 %v9023_v47, %v3858_v27 }
 0x582   : > { %3897 = vmax.xlane.f32.xlu1 %v9053_v63 }
 0x583   : > { %v4482_v41 = vpop.f32.mrf.mxu3  ;;  %v4974_v0 = vpop.f32.mrf.mxu0 }
 0x584   : > { %v4975_v18 = vadd.f32 %v9016_v28, %v4974_v0  ;;  %v9062_v3 = vadd.f32 %v9035_v46, %v4482_v41 }
 0x586   : > { %v5007_v14 = vmax.f32 %v4975_v18, 0.0 }
 0x587   : > { %v3861_v43 = vpop.f32.mrf.mxu1 }
 0x588   : > { %v5020_v1 = vpack.c.bf16 %v5007_v14, %v5006_v37  ;;  %v9059_v2 = vadd.f32 %v9023_v47, %v3861_v43 }
 0x58a   : > { %5112 = vmatmul.bf16.gmra.mxu1 %v5020_v1  ;;  %3899 = vmax.xlane.f32.xlu2 %v9059_v2 }
 0x58b   : > { %4521 = vmax.xlane.f32.xlu1 %v9062_v3  ;;  %v4484_v6 = vpop.f32.mrf.mxu3  ;;  %v4977_v7 = vpop.f32.mrf.mxu0 }
 0x58c   : > { %v9067_v17 = vadd.f32 %v9035_v46, %v4484_v6  ;;  %v4978_v4 = vadd.f32 %v9016_v28, %v4977_v7 }
 0x58e   : > { %v5008_v13 = vmax.f32 %v4978_v4, 0.0 }
 0x58f   : > { %v3863_v8 = vpop.f32.mrf.mxu1 }
 0x590   : > { %v9077_v23 = vadd.f32 %v9023_v47, %v3863_v8 }
 0x592   : > { %4523 = vmax.xlane.f32.xlu2 %v9067_v17 }
 0x593   : > { %v4487_v5 = vpop.f32.mrf.mxu3  ;;  %v4979_v20 = vpop.f32.mrf.mxu0 }
 0x594   : > { %v9072_v51 = vadd.f32 %v9035_v46, %v4487_v5  ;;  %v4980_v19 = vadd.f32 %v9016_v28, %v4979_v20 }
 0x596   : > { %v5009_v49 = vmax.f32 %v4980_v19, 0.0  ;;  %4525 = vmax.xlane.f32.xlu0 %v9072_v51 }
 0x597   : > { %v3866_v25 = vpop.f32.mrf.mxu1 }
 0x598   : > { %v5021_v10 = vpack.c.bf16 %v5009_v49, %v5008_v13  ;;  %v9081_v31 = vadd.f32 %v9023_v47, %v3866_v25 }
 0x59a   : > { %5117 = vmatmul.bf16.gmra.mxu1 %v5021_v10  ;;  %3901 = vmax.xlane.f32.xlu2 %v9077_v23 }
 0x59b   : > { %v4489_v29 = vpop.f32.mrf.mxu3  ;;  %v4982_v12 = vpop.f32.mrf.mxu0 }
 0x59c   : > { %v9084_v22 = vadd.f32 %v9035_v46, %v4489_v29  ;;  %v4983_v54 = vadd.f32 %v9016_v28, %v4982_v12 }
 0x59e   : > { %4527 = vmax.xlane.f32.xlu1 %v9084_v22  ;;  %3903 = vmax.xlane.f32.xlu0 %v9081_v31  ;;  %v5010_v33 = vmax.f32 %v4983_v54, 0.0 }
 0x59f   : > { %v3868_v26 = vpop.f32.mrf.mxu1 }
 0x5a0   : > { %v9094_v55 = vadd.f32 %v9023_v47, %v3868_v26 }
 0x5a3   : > { %v4492_v9 = vpop.f32.mrf.mxu3  ;;  %v4984_v32 = vpop.f32.mrf.mxu0 }
 0x5a4   : > { %v9090_v58 = vadd.f32 %v9035_v46, %v4492_v9  ;;  %v4985_v44 = vadd.f32 %v9016_v28, %v4984_v32 }
 0x5a6   : > { %v5011_v50 = vmax.f32 %v4985_v44, 0.0  ;;  %4529 = vmax.xlane.f32.xlu2 %v9090_v58  ;;  %3905 = vmax.xlane.f32.xlu1 %v9094_v55 }
 0x5a7   : > { %v3871_v34 = vpop.f32.mrf.mxu1 }
 0x5a8   : > { %v5022_v11 = vpack.c.bf16 %v5011_v50, %v5010_v33  ;;  %v9099_v36 = vadd.f32 %v9023_v47, %v3871_v34 }
 0x5aa   : > { %5122 = vmatmul.bf16.gmra.mxu1 %v5022_v11 }
 0x5ab   : > { %v4494_v35 = vpop.f32.mrf.mxu3  ;;  %v4987_v48 = vpop.f32.mrf.mxu0 }
 0x5ac   : > { %v9102_v30 = vadd.f32 %v9035_v46, %v4494_v35  ;;  %v4988_v16 = vadd.f32 %v9016_v28, %v4987_v48 }
 0x5ae   : > { %3907 = vmax.xlane.f32.xlu2 %v9099_v36  ;;  %4531 = vmax.xlane.f32.xlu0 %v9102_v30  ;;  %v5012_v21 = vmax.f32 %v4988_v16, 0.0 }
 0x5af   : > { %v3873_v38 = vpop.f32.mrf.mxu1 }
 0x5b0   : > { %v9108_v56 = vadd.f32 %v9023_v47, %v3873_v38 }
 0x5b3   : > { %v4497_v39 = vpop.f32.mrf.mxu3  ;;  %v4989_v40 = vpop.f32.mrf.mxu0 }
 0x5b4   : > { %v9111_v57 = vadd.f32 %v9035_v46, %v4497_v39  ;;  %v4990_v60 = vadd.f32 %v9016_v28, %v4989_v40 }
 0x5b6   : > { %v5013_v59 = vmax.f32 %v4990_v60, 0.0  ;;  %4533 = vmax.xlane.f32.xlu1 %v9111_v57  ;;  %3909 = vmax.xlane.f32.xlu0 %v9108_v56 }
 0x5b7   : > { %v3876_v61 = vpop.f32.mrf.mxu1 }
 0x5b8   : > { %v5023_v24 = vpack.c.bf16 %v5013_v59, %v5012_v21  ;;  %v9117_v41 = vadd.f32 %v9023_v47, %v3876_v61 }
 0x5ba   : > { %5127 = vmatmul.bf16.gmra.mxu1 %v5023_v24 }
 0x5bb   : > { %v4499_v27 = vpop.f32.mrf.mxu3  ;;  %v4992_v42 = vpop.f32.mrf.mxu0 }
 0x5bc   : > { %v9120_v0 = vadd.f32 %v9035_v46, %v4499_v27  ;;  %v4993_v37 = vadd.f32 %v9016_v28, %v4992_v42 }
 0x5be   : > { %4535 = vmax.xlane.f32.xlu2 %v9120_v0  ;;  %3911 = vmax.xlane.f32.xlu1 %v9117_v41  ;;  %v5014_v8 = vmax.f32 %v4993_v37, 0.0 }
 0x5bf   : > { %v3878_v18 = vpop.f32.mrf.mxu1 }
 0x5c0   : > { %v9126_v1 = vadd.f32 %v9023_v47, %v3878_v18 }
 0x5c3   : > { %v4502_v14 = vpop.f32.mrf.mxu3  ;;  %v4994_v43 = vpop.f32.mrf.mxu0 }
 0x5c4   : > { %v9129_v6 = vadd.f32 %v9035_v46, %v4502_v14  ;;  %v4995_v7 = vadd.f32 %v9016_v28, %v4994_v43 }
 0x5c6   : > { %v5015_v4 = vmax.f32 %v4995_v7, 0.0  ;;  %3913 = vmax.xlane.f32.xlu2 %v9126_v1  ;;  %4537 = vmax.xlane.f32.xlu0 %v9129_v6 }
 0x5c7   : > { %v3881_v5 = vpop.f32.mrf.mxu1 }
 0x5c8   : > { %v5024_v20 = vpack.c.bf16 %v5015_v4, %v5014_v8  ;;  %v9135_v49 = vadd.f32 %v9023_v47, %v3881_v5 }
 0x5ca   : > { %5132 = vmatmul.bf16.gmra.mxu1 %v5024_v20 }
 0x5cb   : > { %v4504_v19 = vpop.f32.mrf.mxu3  ;;  %v4997_v13 = vpop.f32.mrf.mxu0 }
 0x5cc   : > { %v9138_v25 = vadd.f32 %v9035_v46, %v4504_v19  ;;  %v4998_v29 = vadd.f32 %v9016_v28, %v4997_v13 }
 0x5ce   : > { %4539 = vmax.xlane.f32.xlu1 %v9138_v25  ;;  %3915 = vmax.xlane.f32.xlu0 %v9135_v49  ;;  %v5016_v44 = vmax.f32 %v4998_v29, 0.0 }
 0x5cf   : > { %v3883_v10 = vpop.f32.mrf.mxu1 }
 0x5d0   : > { %v9144_v54 = vadd.f32 %v9023_v47, %v3883_v10 }
 0x5d3   : > { %v4507_v12 = vpop.f32.mrf.mxu3  ;;  %v4999_v26 = vpop.f32.mrf.mxu0 }
 0x5d4   : > { %v9147_v9 = vadd.f32 %v9035_v46, %v4507_v12  ;;  %v5000_v32 = vadd.f32 %v9016_v28, %v4999_v26 }
 0x5d6   : > { %v5017_v33 = vmax.f32 %v5000_v32, 0.0  ;;  %4541 = vmax.xlane.f32.xlu2 %v9147_v9  ;;  %3917 = vmax.xlane.f32.xlu1 %v9144_v54 }
 0x5d7   : > { %v3886_v50 = vpop.f32.mrf.mxu1 }
 0x5d8   : > { %v5025_v34 = vpack.c.bf16 %v5017_v33, %v5016_v44  ;;  %v9153_v35 = vadd.f32 %v9023_v47, %v3886_v50 }
 0x5da   : > { %5137 = vmatmul.bf16.gmra.mxu1 %v5025_v34 }
 0x5db   : > { %v4509_v11 = vpop.f32.mrf.mxu3 }
 0x5dc   : > { %v9156_v48 = vadd.f32 %v9035_v46, %v4509_v11 }
 0x5dd   : > { %v3892_v38 = vpop.xlane.xlu0 %3891 }
 0x5de   : > { %3919 = vmax.xlane.f32.xlu2 %v9153_v35  ;;  %4543 = vmax.xlane.f32.xlu0 %v9156_v48  ;;  %v3923_v16 = vsub.f32 %v9026_v53, %v3892_v38  ;;  %v9173_v53 = vld [vmem:[%s9965_s30] ss:$0 sm:$0xff] }
 0x5df   : > { %v3888_v28 = vpop.f32.mrf.mxu1 }
 0x5e0   : > { %v3939_v40 = vmul.f32 1.442695, %v3923_v16  ;;  %v9162_v60 = vadd.f32 %v9023_v47, %v3888_v28 }
 0x5e2   : > { %7084 = vpow2.f32 %v3939_v40 }
 0x5e3   : > { %v4512_v39 = vpop.f32.mrf.mxu3 }
 0x5e4   : > { %v9165_v21 = vadd.f32 %v9035_v46, %v4512_v39 }
 0x5e5   : > { %v3894_v59 = vpop.xlane.xlu0 %3893 }
 0x5e6   : > { %4545 = vmax.xlane.f32.xlu1 %v9165_v21  ;;  %3921 = vmax.xlane.f32.xlu0 %v9162_v60  ;;  %v3924_v61 = vsub.f32 %v9030_v15, %v3894_v59 }
 0x5e7   : > { %v5103_v24 = vpop.f32.mrf.mxu1 }
 0x5e8   : > { %v3941_v42 = vmul.f32 1.442695, %v3924_v61  ;;  %v9177_v37 = vadd.f32 %v9173_v53, %v5103_v24  ;;  %v9182_v7 = vpop.eup %7084 }
 0x5e9   : > { %v4518_v27 = vpop.xlane.xlu2 %4517 }
 0x5ea   : > { %v4549_v47 = vsub.f32 %v9040_v52, %v4518_v27 }
 0x5eb   : > { %v4514_v18 = vpop.f32.mrf.mxu3 }
 0x5ec   : > { %v4565_v14 = vmul.f32 1.442695, %v4549_v47  ;;  %v9180_v43 = vadd.f32 %v9035_v46, %v4514_v18 }
 0x5ed   : > { %v3896_v15 = vpop.xlane.xlu1 %3895 }
 0x5ee   : > { %7086 = vpow2.f32 %v4565_v14  ;;  %4547 = vmax.xlane.f32.xlu2 %v9180_v43  ;;  %5143 = vmax.xlane.f32.xlu0 %v9177_v37  ;;  %v3925_v52 = vsub.f32 %v9045_v45, %v3896_v15 }
 0x5ef   : > { %7088 = vpow2.f32 %v3941_v42  ;;  %3971 = vadd.xlane.f32.xlu1 %v9182_v7  ;;  %v5105_v8 = vpop.f32.mrf.mxu1 }
 0x5f0   : > { %v3943_v20 = vmul.f32 1.442695, %v3925_v52  ;;  %v9194_v10 = vadd.f32 %v9173_v53, %v5105_v8 }
 0x5f1   : > { %v4520_v4 = vpop.xlane.xlu0 %4519 }
 0x5f2   : > { %v4550_v5 = vsub.f32 %v9049_v62, %v4520_v4 }
 0x5f4   : > { %v9189_v46 = vpop.eup %7086  ;;  %v4567_v19 = vmul.f32 1.442695, %v4550_v5 }
 0x5f5   : > { %v9191_v13 = vpop.eup %7088  ;;  %v3898_v29 = vpop.xlane.xlu1 %3897 }
 0x5f6   : > { %7090 = vpow2.f32 %v4567_v19  ;;  %4597 = vadd.xlane.f32.xlu0 %v9189_v46  ;;  %3973 = vadd.xlane.f32.xlu2 %v9191_v13  ;;  %v3926_v62 = vsub.f32 %v9053_v63, %v3898_v29 }
 0x5f7   : > { %7092 = vpow2.f32 %v3943_v20  ;;  %5145 = vmax.xlane.f32.xlu1 %v9194_v10  ;;  %v5108_v45 = vpop.f32.mrf.mxu1 }
 0x5f8   : > { %v3945_v26 = vmul.f32 1.442695, %v3926_v62  ;;  %v9203_v32 = vadd.f32 %v9173_v53, %v5108_v45 }
 0x5fa   : > { %7094 = vpow2.f32 %v3945_v26 }
 0x5fc   : > { %v9200_v12 = vpop.eup %7090 }
 0x5fd   : > { %v9205_v44 = vpop.eup %7092  ;;  %v3900_v33 = vpop.xlane.xlu2 %3899 }
 0x5fe   : > { %v4522_v50 = vpop.xlane.xlu1 %4521  ;;  %3975 = vadd.xlane.f32.xlu0 %v9205_v44  ;;  %5147 = vmax.xlane.f32.xlu2 %v9203_v32  ;;  %v3927_v38 = vsub.f32 %v9059_v2, %v3900_v33 }
 0x5ff   : > { %v4551_v34 = vsub.f32 %v9062_v3, %v4522_v50  ;;  %4599 = vadd.xlane.f32.xlu1 %v9200_v12  ;;  %v5110_v11 = vpop.f32.mrf.mxu1 }
 0x600   : > { %v9213_v28 = vadd.f32 %v9173_v53, %v5110_v11  ;;  %v9215_v39 = vpop.eup %7094  ;;  %v3947_v59 = vmul.f32 1.442695, %v3927_v38 }
 0x601   : > { %v4569_v63 = vmul.f32 1.442695, %v4551_v34 }
 0x603   : > { %7096 = vpow2.f32 %v4569_v63 }
 0x605   : > { %v4524_v16 = vpop.xlane.xlu2 %4523 }
 0x606   : > { %v4552_v40 = vsub.f32 %v9067_v17, %v4524_v16  ;;  %5149 = vmax.xlane.f32.xlu0 %v9213_v28 }
 0x607   : > { %3977 = vadd.xlane.f32.xlu1 %v9215_v39  ;;  %v5113_v3 = vpop.f32.mrf.mxu1 }
 0x608   : > { %v4571_v61 = vmul.f32 1.442695, %v4552_v40  ;;  %v9225_v42 = vadd.f32 %v9173_v53, %v5113_v3 }
 0x609   : > { %v9220_v24 = vpop.eup %7096  ;;  %v4526_v27 = vpop.xlane.xlu0 %4525 }
 0x60a   : > { %7098 = vpow2.f32 %v4571_v61  ;;  %4601 = vadd.xlane.f32.xlu2 %v9220_v24  ;;  %v4553_v2 = vsub.f32 %v9072_v51, %v4526_v27 }
 0x60b   : > { %7100 = vpow2.f32 %v3947_v59 }
 0x60c   : > { %v4573_v47 = vmul.f32 1.442695, %v4553_v2 }
 0x60d   : > { %v3902_v17 = vpop.xlane.xlu2 %3901 }
 0x60e   : > { %7102 = vpow2.f32 %v4573_v47  ;;  %v3928_v18 = vsub.f32 %v9077_v23, %v3902_v17 }
 0x60f   : > { %5151 = vmax.xlane.f32.xlu1 %v9225_v42  ;;  %v5115_v14 = vpop.f32.mrf.mxu1 }
 0x610   : > { %v9229_v15 = vpop.eup %7098  ;;  %v3949_v52 = vmul.f32 1.442695, %v3928_v18  ;;  %v9243_v26 = vadd.f32 %v9173_v53, %v5115_v14 }
 0x611   : > { %v9231_v8 = vpop.eup %7100  ;;  %v4528_v4 = vpop.xlane.xlu1 %4527  ;;  %4603 = vadd.xlane.f32.xlu0 %v9229_v15 }
 0x612   : > { %v3904_v51 = vpop.xlane.xlu0 %3903  ;;  %7104 = vpow2.f32 %v3949_v52  ;;  %3979 = vadd.xlane.f32.xlu2 %v9231_v8  ;;  %v4554_v20 = vsub.f32 %v9084_v22, %v4528_v4 }
 0x613   : > { %v3929_v5 = vsub.f32 %v9081_v31, %v3904_v51 }
 0x614   : > { %v9237_v23 = vpop.eup %7102  ;;  %v4575_v29 = vmul.f32 1.442695, %v4554_v20 }
 0x615   : > { %v3951_v19 = vmul.f32 1.442695, %v3929_v5 }
 0x617   : > { %7106 = vpow2.f32 %v3951_v19  ;;  %4605 = vadd.xlane.f32.xlu1 %v9237_v23  ;;  %v5118_v45 = vpop.f32.mrf.mxu1 }
 0x618   : > { %v9240_v62 = vpop.eup %7104  ;;  %7108 = vpow2.f32 %v4575_v29  ;;  %v9252_v63 = vadd.f32 %v9173_v53, %v5118_v45 }
 0x619   : > { %v4530_v33 = vpop.xlane.xlu2 %4529  ;;  %v3906_v50 = vpop.xlane.xlu1 %3905  ;;  %3981 = vadd.xlane.f32.xlu0 %v9240_v62 }
 0x61a   : > { %v4555_v31 = vsub.f32 %v9090_v58, %v4530_v33  ;;  %5153 = vmax.xlane.f32.xlu2 %v9243_v26  ;;  %v3930_v22 = vsub.f32 %v9094_v55, %v3906_v50 }
 0x61c   : > { %v4577_v11 = vmul.f32 1.442695, %v4555_v31  ;;  %v3953_v38 = vmul.f32 1.442695, %v3930_v22 }
 0x61d   : > { %v9249_v34 = vpop.eup %7106 }
 0x61e   : > { %v9255_v40 = vpop.eup %7108  ;;  %7110 = vpow2.f32 %v4577_v11 }
 0x61f   : > { %3983 = vadd.xlane.f32.xlu1 %v9249_v34  ;;  %v5120_v16 = vpop.f32.mrf.mxu1  ;;  %7112 = vpow2.f32 %v3953_v38 }
 0x620   : > { %v9262_v27 = vadd.f32 %v9173_v53, %v5120_v16 }
 0x621   : > { %v3908_v59 = vpop.xlane.xlu2 %3907  ;;  %5155 = vmax.xlane.f32.xlu0 %v9252_v63  ;;  %v4532_v58 = vpop.xlane.xlu0 %4531 }
 0x622   : > { %v3931_v3 = vsub.f32 %v9099_v36, %v3908_v59  ;;  %4607 = vadd.xlane.f32.xlu2 %v9255_v40  ;;  %v4556_v55 = vsub.f32 %v9102_v30, %v4532_v58 }
 0x624   : > { %v4579_v61 = vmul.f32 1.442695, %v4556_v55  ;;  %v3955_v2 = vmul.f32 1.442695, %v3931_v3  ;;  %v9265_v17 = vpop.eup %7110 }
 0x625   : > { %v9267_v18 = vpop.eup %7112 }
 0x626   : > { %7114 = vpow2.f32 %v4579_v61 }
 0x627   : > { %5157 = vmax.xlane.f32.xlu1 %v9262_v27  ;;  %v5123_v47 = vpop.f32.mrf.mxu1  ;;  %7116 = vpow2.f32 %v3955_v2 }
 0x628   : > { %v9279_v29 = vadd.f32 %v9173_v53, %v5123_v47 }
 0x629   : > { %v4534_v14 = vpop.xlane.xlu1 %4533  ;;  %4609 = vadd.xlane.f32.xlu0 %v9265_v17  ;;  %v3910_v36 = vpop.xlane.xlu0 %3909 }
 0x62a   : > { %3985 = vadd.xlane.f32.xlu2 %v9267_v18  ;;  %v3932_v30 = vsub.f32 %v9108_v56, %v3910_v36  ;;  %v4557_v52 = vsub.f32 %v9111_v57, %v4534_v14 }
 0x62c   : > { %v3957_v4 = vmul.f32 1.442695, %v3932_v30  ;;  %v9273_v51 = vpop.eup %7114  ;;  %v4581_v5 = vmul.f32 1.442695, %v4557_v52 }
 0x62d   : > { %v9276_v19 = vpop.eup %7116 }
 0x62e   : > { %7118 = vpow2.f32 %v3957_v4 }
 0x62f   : > { %4611 = vadd.xlane.f32.xlu1 %v9273_v51  ;;  %v5125_v20 = vpop.f32.mrf.mxu1  ;;  %7120 = vpow2.f32 %v4581_v5 }
 0x630   : > { %v9288_v22 = vadd.f32 %v9173_v53, %v5125_v20 }
 0x631   : > { %v4536_v45 = vpop.xlane.xlu2 %4535  ;;  %v3912_v33 = vpop.xlane.xlu1 %3911  ;;  %3987 = vadd.xlane.f32.xlu0 %v9276_v19 }
 0x632   : > { %v4558_v56 = vsub.f32 %v9120_v0, %v4536_v45  ;;  %5159 = vmax.xlane.f32.xlu2 %v9279_v29  ;;  %v3933_v57 = vsub.f32 %v9117_v41, %v3912_v33 }
 0x634   : > { %v9285_v50 = vpop.eup %7118  ;;  %v4583_v31 = vmul.f32 1.442695, %v4558_v56  ;;  %v3959_v11 = vmul.f32 1.442695, %v3933_v57 }
 0x635   : > { %v9291_v16 = vpop.eup %7120 }
 0x636   : > { %7122 = vpow2.f32 %v4583_v31 }
 0x637   : > { %3989 = vadd.xlane.f32.xlu1 %v9285_v50  ;;  %v5128_v38 = vpop.f32.mrf.mxu1  ;;  %7124 = vpow2.f32 %v3959_v11 }
 0x638   : > { %v9298_v55 = vadd.f32 %v9173_v53, %v5128_v38 }
 0x639   : > { %v3914_v59 = vpop.xlane.xlu2 %3913  ;;  %5161 = vmax.xlane.f32.xlu0 %v9288_v22  ;;  %v4538_v0 = vpop.xlane.xlu0 %4537 }
 0x63a   : > { %v3934_v58 = vsub.f32 %v9126_v1, %v3914_v59  ;;  %4613 = vadd.xlane.f32.xlu2 %v9291_v16  ;;  %v4559_v41 = vsub.f32 %v9129_v6, %v4538_v0 }
 0x63c   : > { %v4585_v3 = vmul.f32 1.442695, %v4559_v41  ;;  %v3961_v61 = vmul.f32 1.442695, %v3934_v58  ;;  %v9301_v47 = vpop.eup %7122 }
 0x63d   : > { %v9303_v14 = vpop.eup %7124 }
 0x63e   : > { %7126 = vpow2.f32 %v4585_v3 }
 0x63f   : > { %5163 = vmax.xlane.f32.xlu1 %v9298_v55  ;;  %v5130_v2 = vpop.f32.mrf.mxu1  ;;  %7128 = vpow2.f32 %v3961_v61 }
 0x640   : > { %v9315_v33 = vadd.f32 %v9173_v53, %v5130_v2 }
 0x641   : > { %v4540_v36 = vpop.xlane.xlu1 %4539  ;;  %4615 = vadd.xlane.f32.xlu0 %v9301_v47  ;;  %v3916_v1 = vpop.xlane.xlu0 %3915 }
 0x642   : > { %3991 = vadd.xlane.f32.xlu2 %v9303_v14  ;;  %v3935_v6 = vsub.f32 %v9135_v49, %v3916_v1  ;;  %v4560_v30 = vsub.f32 %v9138_v25, %v4540_v36 }
 0x644   : > { %v3963_v52 = vmul.f32 1.442695, %v3935_v6  ;;  %v9309_v4 = vpop.eup %7126  ;;  %v4587_v5 = vmul.f32 1.442695, %v4560_v30 }
 0x645   : > { %v9312_v45 = vpop.eup %7128 }
 0x646   : > { %7130 = vpow2.f32 %v3963_v52 }
 0x647   : > { %4617 = vadd.xlane.f32.xlu1 %v9309_v4  ;;  %v5133_v20 = vpop.f32.mrf.mxu1  ;;  %7132 = vpow2.f32 %v4587_v5 }
 0x648   : > { %v9323_v31 = vadd.f32 %v9173_v53, %v5133_v20 }
 0x649   : > { %v4542_v56 = vpop.xlane.xlu2 %4541  ;;  %v3918_v57 = vpop.xlane.xlu1 %3917  ;;  %3993 = vadd.xlane.f32.xlu0 %v9312_v45 }
 0x64a   : > { %5165 = vmax.xlane.f32.xlu2 %v9315_v33  ;;  %v3936_v49 = vsub.f32 %v9144_v54, %v3918_v57  ;;  %v4561_v57 = vsub.f32 %v9147_v9, %v4542_v56 }
 0x64c   : > { %v9320_v25 = vpop.eup %7130  ;;  %v3965_v11 = vmul.f32 1.442695, %v3936_v49 }
 0x64d   : > { %v9326_v59 = vpop.eup %7132 }
 0x64e   : > { %7134 = vpow2.f32 %v3965_v11 }
 0x64f   : > { %3995 = vadd.xlane.f32.xlu1 %v9320_v25  ;;  %v5135_v38 = vpop.f32.mrf.mxu1 }
 0x650   : > { %v9332_v3 = vadd.f32 %v9173_v53, %v5135_v38 }
 0x651   : > { %v3920_v0 = vpop.xlane.xlu2 %3919  ;;  %5167 = vmax.xlane.f32.xlu0 %v9323_v31  ;;  %v4544_v58 = vpop.xlane.xlu0 %4543 }
 0x652   : > { %v3937_v41 = vsub.f32 %v9153_v35, %v3920_v0  ;;  %4619 = vadd.xlane.f32.xlu2 %v9326_v59  ;;  %v4562_v6 = vsub.f32 %v9156_v48, %v4544_v58 }
 0x654   : > { %v3967_v54 = vmul.f32 1.442695, %v3937_v41  ;;  %v9335_v2 = vpop.eup %7134  ;;  %v4591_v5 = vmul.f32 1.442695, %v4562_v6  ;;  %v4589_v41 = vmul.f32 1.442695, %v4561_v57 }
 0x656   : > { %7136 = vpow2.f32 %v3967_v54 }
 0x657   : > { %5169 = vmax.xlane.f32.xlu1 %v9332_v3  ;;  %v5138_v61 = vpop.f32.mrf.mxu1 }
 0x658   : > { %v9346_v49 = vadd.f32 %v9173_v53, %v5138_v61 }
 0x659   : > { %v4546_v36 = vpop.xlane.xlu1 %4545  ;;  %v3922_v1 = vpop.xlane.xlu0 %3921 }
 0x65a   : > { %3997 = vadd.xlane.f32.xlu2 %v9335_v2  ;;  %v3938_v35 = vsub.f32 %v9162_v60, %v3922_v1  ;;  %v4563_v20 = vsub.f32 %v9165_v21, %v4546_v36 }
 0x65c   : > { %v9340_v30 = vpop.eup %7136  ;;  %v3969_v52 = vmul.f32 1.442695, %v3938_v35  ;;  %v4593_v0 = vmul.f32 1.442695, %v4563_v20 }
 0x65d   : > { %3999 = vadd.xlane.f32.xlu0 %v9340_v30 }
 0x65e   : > { %7138 = vpow2.f32 %v3969_v52 }
 0x65f   : > { %v5140_v11 = vpop.f32.mrf.mxu1  ;;  %7140 = vpow2.f32 %v4591_v5 }
 0x660   : > { %v9351_v54 = vadd.f32 %v9173_v53, %v5140_v11 }
 0x661   : > { %v4548_v48 = vpop.xlane.xlu2 %4547  ;;  %v5144_v38 = vpop.xlane.xlu0 %5143 }
 0x662   : > { %v3972_v60 = vpop.xlane.xlu1 %3971  ;;  %5171 = vmax.xlane.f32.xlu2 %v9346_v49  ;;  %v5175_v58 = vsub.f32 %v9177_v37, %v5144_v38  ;;  %v4564_v56 = vsub.f32 %v9180_v43, %v4548_v48 }
 0x663   : > { %7142 = vrcp.f32 %v3972_v60  ;;  %v4014_v57 = vand.u32 2147483648, %v3972_v60  ;;  %v4012_v38 = vand.u32 2147483647, %v3972_v60  ;;  %vm4008_vm1 = vweird.f32 %v3972_v60 }
 0x664   : > { %v9353_v9 = vpop.eup %7138  ;;  %v5191_v21 = vmul.f32 1.442695, %v5175_v58  ;;  %7144 = vpow2.f32 %v4593_v0  ;;  %v4595_v1 = vmul.f32 1.442695, %v4564_v56 }
 0x665   : > { %5173 = vmax.xlane.f32.xlu0 %v9351_v54  ;;  %4001 = vadd.xlane.f32.xlu1 %v9353_v9  ;;  %7146 = vpow2.f32 %v4589_v41  ;;  %v9358_v61 = vpop.eup %7140  ;;  %vm4013_vm3 = vcmp.eq.f32.partialorder %v4012_v38, 8.507059e+37 }
 0x666   : > { %9966 = vst [vmem:[#allocation43_spill] sm:$0xff] %v9358_v61  ;;  %7148 = vpow2.f32 %v5191_v21  ;;  %v4015_v21 = vor.u32 1.1754944e-38, %v4014_v57 }
 0x669   : > { %v7143_v36 = vpop.eup %7142  ;;  %v9360_v37 = vpop.xlane.xlu2 %3973 }
 0x66a   : > { %v9362_v53 = vpop.xlane.xlu0 %4597  ;;  %v4004_v6 = vmul.f32 %v7143_v36, %v3972_v60  ;;  %v5146_v35 = vpop.xlane.xlu1 %5145  ;;  %7150 = vrcp.f32 %v9360_v37  ;;  %4623 = vadd.xlane.f32.xlu2 %v9358_v61  ;;  %vm4009_vm0 = vweird.f32 %v7143_v36  ;;  %vm4023_vm6 = vweird.f32 %v9360_v37 }
 0x66b   : > { %v5176_v43 = vsub.f32 %v9194_v10, %v5146_v35  ;;  %7152 = vrcp.f32 %v9362_v53  ;;  %v9368_v52 = vpop.eup %7144  ;;  %vm4010_vm2 = vmor %vm4008_vm1, %vm4009_vm0  ;;  %vm4634_vm8 = vweird.f32 %v9362_v53 }
 0x66c   : > { %9967 = vst [vmem:[#allocation44_spill] sm:$0xff] %v9368_v52  ;;  %v4005_v5 = vsub.f32 1.0, %v4004_v6  ;;  %v9370_v20 = vpop.eup %7146  ;;  %7154 = vpow2.f32 %v4595_v1 }
 0x66d   : > { %9968 = vst [vmem:[#allocation45_spill] sm:$0xff] %v9370_v20  ;;  %v5193_v11 = vmul.f32 1.442695, %v5176_v43  ;;  %4625 = vadd.xlane.f32.xlu0 %v9368_v52  ;;  %4621 = vadd.xlane.f32.xlu1 %v9370_v20  ;;  %v9374_v0 = vpop.eup %7148 }
 0x66e   : > { %v4006_v48 = vmul.f32 %v7143_v36, %v4005_v5 }
 0x66f   : > { %7156 = vpow2.f32 %v5193_v11 }
 0x670   : > { %v7151_v10 = vpop.eup %7150  ;;  %v4007_v58 = vadd.f32 %v7143_v36, %v4006_v48  ;;  %v4027_v48 = vand.u32 2147483647, %v9360_v37 }
 0x671   : > { %v7153_v41 = vpop.eup %7152  ;;  %v4019_v56 = vmul.f32 %v7151_v10, %v9360_v37  ;;  %v5148_v6 = vpop.xlane.xlu2 %5147  ;;  %vm4024_vm4 = vweird.f32 %v7151_v10 }
 0x672   : > { %v9377_v35 = vpop.xlane.xlu0 %3975  ;;  %v4011_v1 = vsel %vm4010_vm2, %v7143_v36, %v4007_v58  ;;  %v4630_v43 = vmul.f32 %v7153_v41, %v9362_v53  ;;  %v5177_v5 = vsub.f32 %v9203_v32, %v5148_v6  ;;  %v9381_v52 = vpop.xlane.xlu1 %4599  ;;  %5223 = vadd.xlane.f32.xlu2 %v9374_v0  ;;  %v4029_v36 = vand.u32 2147483648, %v9360_v37  ;;  %vm4025_vm7 = vmor %vm4023_vm6, %vm4024_vm4 }
 0x673   : > { %v4016_v11 = vsel %vm4013_vm3, %v4015_v21, %v4011_v1  ;;  %v4020_v60 = vsub.f32 1.0, %v4019_v56  ;;  %7158 = vrcp.f32 %v9381_v52  ;;  %v9386_v57 = vpop.eup %7154  ;;  %v4640_v6 = vand.u32 2147483648, %v9362_v53 }
 0x674   : > { %9969 = vst [vmem:[#allocation46_spill] sm:$0xff] %v9386_v57  ;;  %v4017_v20 = vmul.f32 %v9182_v7, %v4016_v11  ;;  %v4631_v38 = vsub.f32 1.0, %v4630_v43  ;;  %v5195_v58 = vmul.f32 1.442695, %v5177_v5  ;;  %7160 = vrcp.f32 %v9377_v35 }
 0x675   : > { %v9390_v61 = vpop.eup %7156  ;;  %v4021_v32 = vmul.f32 %v7151_v10, %v4020_v60  ;;  %vm4635_vm5 = vweird.f32 %v7153_v41  ;;  %v4638_v56 = vand.u32 2147483647, %v9362_v53  ;;  %4627 = vadd.xlane.f32.xlu1 %v9386_v57  ;;  %v4030_v1 = vor.u32 1.1754944e-38, %v4029_v36 }
 0x676   : > { %9970 = vst [vmem:[#allocation47_spill] sm:$0xff] %v9390_v61  ;;  %v4632_v21 = vmul.f32 %v7153_v41, %v4631_v38  ;;  %7162 = vpow2.f32 %v5195_v58  ;;  %5225 = vadd.xlane.f32.xlu0 %v9390_v61  ;;  %vm4028_vm9 = vcmp.eq.f32.partialorder %v4027_v48, 8.507059e+37  ;;  %vm4636_vm10 = vmor %vm4634_vm8, %vm4635_vm5  ;;  %vm4649_vm13 = vweird.f32 %v9381_v52 }
 0x677   : > { %4243 = vst [vmem:[#allocation24] sm:$0xff] %v4017_v20  ;;  %v4022_v7 = vadd.f32 %v7151_v10, %v4021_v32  ;;  %v4641_v20 = vor.u32 1.1754944e-38, %v4640_v6  ;;  %vm4639_vm11 = vcmp.eq.f32.partialorder %v4638_v56, 8.507059e+37  ;;  %v4042_v56 = vand.u32 2147483647, %v9377_v35 }
 0x678   : > { %v4633_v43 = vadd.f32 %v7153_v41, %v4632_v21  ;;  %v4655_v21 = vand.u32 2147483648, %v9381_v52  ;;  %vm4038_vm1 = vweird.f32 %v9377_v35 }
 0x679   : > { %v7159_v5 = vpop.eup %7158  ;;  %v4026_v11 = vsel %vm4025_vm7, %v7151_v10, %v4022_v7  ;;  %vm4043_vm2 = vcmp.eq.f32.partialorder %v4042_v56, 8.507059e+37 }
 0x67a   : > { %v4031_v60 = vsel %vm4028_vm9, %v4030_v1, %v4026_v11  ;;  %v4637_v38 = vsel %vm4636_vm10, %v7153_v41, %v4633_v43  ;;  %v4645_v58 = vmul.f32 %v7159_v5, %v9381_v52  ;;  %v9400_v61 = vpop.xlane.xlu1 %3977  ;;  %v5150_v32 = vpop.xlane.xlu0 %5149  ;;  %v4653_v41 = vand.u32 2147483647, %v9381_v52 }
 0x67b   : > { %v7161_v57 = vpop.eup %7160  ;;  %v4032_v37 = vmul.f32 %v9191_v13, %v4031_v60  ;;  %v4642_v36 = vsel %vm4639_vm11, %v4641_v20, %v4637_v38  ;;  %7164 = vrcp.f32 %v9400_v61  ;;  %v5178_v7 = vsub.f32 %v9213_v28, %v5150_v32 }
 0x67c   : > { %v9404_v53 = vpop.eup %7162  ;;  %v4643_v10 = vmul.f32 %v9189_v46, %v4642_v36  ;;  %v4646_v48 = vsub.f32 1.0, %v4645_v58  ;;  %v4034_v6 = vmul.f32 %v7161_v57, %v9377_v35  ;;  %vm4650_vm12 = vweird.f32 %v7159_v5 }
 0x67d   : > { %4244 = vst [vmem:[#allocation24 + $0x8] sm:$0xff] %v4032_v37  ;;  %v9412_v13 = vpop.xlane.xlu2 %4601  ;;  %5227 = vadd.xlane.f32.xlu1 %v9404_v53  ;;  %v4044_v46 = vand.u32 2147483648, %v9377_v35  ;;  %v5197_v11 = vmul.f32 1.442695, %v5178_v7  ;;  %vm4039_vm14 = vweird.f32 %v7161_v57  ;;  %vm4651_vm15 = vmor %vm4649_vm13, %vm4650_vm12  ;;  %vm4654_vm0 = vcmp.eq.f32.partialorder %v4653_v41, 8.507059e+37 }
 0x67e   : > { %4869 = vst [vmem:[#allocation25] sm:$0xff] %v4643_v10  ;;  %v4647_v1 = vmul.f32 %v7159_v5, %v4646_v48  ;;  %v4035_v43 = vsub.f32 1.0, %v4034_v6  ;;  %7166 = vrcp.f32 %v9412_v13  ;;  %v4656_v28 = vor.u32 1.1754944e-38, %v4655_v21  ;;  %vm4040_vm3 = vmor %vm4038_vm1, %vm4039_vm14 }
 0x67f   : > { %7168 = vpow2.f32 %v5197_v11  ;;  %v4045_v48 = vor.u32 1.1754944e-38, %v4044_v46  ;;  %v4057_v52 = vand.u32 2147483647, %v9400_v61  ;;  %v4059_v35 = vand.u32 2147483648, %v9400_v61 }
 0x680   : > { %v4648_v20 = vadd.f32 %v7159_v5, %v4647_v1  ;;  %v4036_v60 = vmul.f32 %v7161_v57, %v4035_v43  ;;  %v4668_v11 = vand.u32 2147483647, %v9412_v13  ;;  %vm4053_vm5 = vweird.f32 %v9400_v61 }
 0x681   : > { %v7165_v38 = vpop.eup %7164  ;;  %vm4058_vm8 = vcmp.eq.f32.partialorder %v4057_v52, 8.507059e+37  ;;  %vm4664_vm9 = vweird.f32 %v9412_v13 }
 0x682   : > { %v4652_v58 = vsel %vm4651_vm15, %v7159_v5, %v4648_v20  ;;  %v4037_v32 = vadd.f32 %v7161_v57, %v4036_v60  ;;  %v4049_v37 = vmul.f32 %v7165_v38, %v9400_v61  ;;  %v5152_v36 = vpop.xlane.xlu1 %5151  ;;  %vm4054_vm4 = vweird.f32 %v7165_v38 }
 0x683   : > { %v4657_v10 = vsel %vm4654_vm0, %v4656_v28, %v4652_v58  ;;  %v5179_v6 = vsub.f32 %v9225_v42, %v5152_v36  ;;  %v4670_v28 = vand.u32 2147483648, %v9412_v13  ;;  %vm4055_vm6 = vmor %vm4053_vm5, %vm4054_vm4  ;;  %vm9439_vm10 = vcmp.eq.f32.partialorder %v4668_v11, 8.507059e+37 }
 0x684   : > { %v7167_v7 = vpop.eup %7166  ;;  %v4658_v41 = vmul.f32 %v9200_v12, %v4657_v10  ;;  %v4041_v21 = vsel %vm4040_vm3, %v7161_v57, %v4037_v32  ;;  %v4050_v1 = vsub.f32 1.0, %v4049_v37  ;;  %v9424_v5 = vpop.xlane.xlu0 %4603 }
 0x685   : > { %v4046_v56 = vsel %vm4043_vm2, %v4045_v48, %v4041_v21  ;;  %v4660_v43 = vmul.f32 %v7167_v7, %v9412_v13  ;;  %v5199_v20 = vmul.f32 1.442695, %v5179_v6  ;;  %v9428_v46 = vpop.xlane.xlu2 %3979  ;;  %v9432_v12 = vpop.eup %7168  ;;  %vm4665_vm7 = vweird.f32 %v7167_v7 }
 0x686   : > { %4870 = vst [vmem:[#allocation25 + $0x8] sm:$0xff] %v4658_v41  ;;  %v4047_v42 = vmul.f32 %v9205_v44, %v4046_v56  ;;  %v4051_v60 = vmul.f32 %v7165_v38, %v4050_v1  ;;  %7170 = vrcp.f32 %v9428_v46  ;;  %5229 = vadd.xlane.f32.xlu2 %v9432_v12  ;;  %v4060_v44 = vor.u32 1.1754944e-38, %v4059_v35  ;;  %vm4666_vm11 = vmor %vm4664_vm9, %vm4665_vm7 }
 0x687   : > { %v4661_v57 = vsub.f32 1.0, %v4660_v43  ;;  %7172 = vpow2.f32 %v5199_v20  ;;  %v4671_v6 = vor.u32 1.1754944e-38, %v4670_v28  ;;  %v4074_v52 = vand.u32 2147483648, %v9428_v46 }
 0x688   : > { %4245 = vst [vmem:[#allocation24 + $0x10] sm:$0xff] %v4047_v42  ;;  %v4052_v58 = vadd.f32 %v7165_v38, %v4051_v60  ;;  %7174 = vrcp.f32 %v9424_v5  ;;  %v4683_v13 = vand.u32 2147483647, %v9424_v5  ;;  %v4685_v11 = vand.u32 2147483648, %v9424_v5 }
 0x689   : > { %v4662_v32 = vmul.f32 %v7167_v7, %v4661_v57  ;;  %vm4068_vm12 = vweird.f32 %v9428_v46  ;;  %vm4679_vm13 = vweird.f32 %v9424_v5 }
 0x68a   : > { %v4056_v37 = vsel %vm4055_vm6, %v7165_v38, %v4052_v58  ;;  %v9443_v10 = vpop.xlane.xlu1 %4605  ;;  %v4072_v38 = vand.u32 2147483647, %v9428_v46  ;;  %vm9469_vm15 = vcmp.eq.f32.partialorder %v4683_v13, 8.507059e+37 }
 0x68b   : > { %v4061_v48 = vsel %vm4058_vm8, %v4060_v44, %v4056_v37  ;;  %v4663_v61 = vadd.f32 %v7167_v7, %v4662_v32  ;;  %7176 = vrcp.f32 %v9443_v10  ;;  %v4075_v44 = vor.u32 1.1754944e-38, %v4074_v52 }
 0x68c   : > { %v7171_v41 = vpop.eup %7170  ;;  %v4062_v21 = vmul.f32 %v9215_v39, %v4061_v48  ;;  %v9450_v1 = vpop.xlane.xlu0 %3981  ;;  %vm9465_vm14 = vcmp.eq.f32.partialorder %v4072_v38, 8.507059e+37  ;;  %v4686_v48 = vor.u32 1.1754944e-38, %v4685_v11  ;;  %vm4694_vm3 = vweird.f32 %v9443_v10 }
 0x68d   : > { %v9452_v35 = vpop.eup %7172  ;;  %v4667_v56 = vsel %vm4666_vm11, %v7167_v7, %v4663_v61  ;;  %v4064_v43 = vmul.f32 %v7171_v41, %v9428_v46  ;;  %v5154_v20 = vpop.xlane.xlu2 %5153  ;;  %7178 = vrcp.f32 %v9450_v1  ;;  %vm4069_vm0 = vweird.f32 %v7171_v41 }
 0x68e   : > { %v7175_v39 = vpop.eup %7174  ;;  %4246 = vst [vmem:[#allocation24 + $0x18] sm:$0xff] %v4062_v21  ;;  %v4672_v42 = vsel %vm9439_vm10, %v4671_v6, %v4667_v56  ;;  %v5180_v60 = vsub.f32 %v9243_v26, %v5154_v20  ;;  %5231 = vadd.xlane.f32.xlu0 %v9452_v35  ;;  %v4698_v6 = vand.u32 2147483647, %v9443_v10  ;;  %v4700_v21 = vand.u32 2147483648, %v9443_v10  ;;  %vm4070_vm2 = vmor %vm4068_vm12, %vm4069_vm0 }
 0x68f   : > { %v4673_v7 = vmul.f32 %v9220_v24, %v4672_v42  ;;  %v4065_v57 = vsub.f32 1.0, %v4064_v43  ;;  %v4675_v28 = vmul.f32 %v7175_v39, %v9424_v5  ;;  %vm4680_vm1 = vweird.f32 %v7175_v39 }
 0x690   : > { %v5201_v37 = vmul.f32 1.442695, %v5180_v60  ;;  %v4087_v20 = vand.u32 2147483647, %v9450_v1  ;;  %vm4681_vm5 = vmor %vm4679_vm13, %vm4680_vm1  ;;  %vm9493_vm6 = vcmp.eq.f32.partialorder %v4698_v6, 8.507059e+37  ;;  %vm4083_vm9 = vweird.f32 %v9450_v1 }
 0x691   : > { %v7177_v26 = vpop.eup %7176  ;;  %4871 = vst [vmem:[#allocation25 + $0x10] sm:$0xff] %v4673_v7  ;;  %v4066_v36 = vmul.f32 %v7171_v41, %v4065_v57  ;;  %v4676_v24 = vsub.f32 1.0, %v4675_v28  ;;  %v4089_v57 = vand.u32 2147483648, %v9450_v1 }
 0x692   : > { %v4690_v61 = vmul.f32 %v7177_v26, %v9443_v10  ;;  %7180 = vpow2.f32 %v5201_v37  ;;  %v9476_v38 = vpop.xlane.xlu1 %3983  ;;  %vm4695_vm4 = vweird.f32 %v7177_v26  ;;  %vm9506_vm10 = vcmp.eq.f32.partialorder %v4087_v20, 8.507059e+37 }
 0x693   : > { %v7179_v52 = vpop.eup %7178  ;;  %v4067_v13 = vadd.f32 %v7171_v41, %v4066_v36  ;;  %v4677_v56 = vmul.f32 %v7175_v39, %v4676_v24  ;;  %7182 = vrcp.f32 %v9476_v38  ;;  %vm4696_vm8 = vmor %vm4694_vm3, %vm4695_vm4  ;;  %v4090_v6 = vor.u32 1.1754944e-38, %v4089_v57 }
 0x694   : > { %v4691_v43 = vsub.f32 1.0, %v4690_v61  ;;  %v4079_v11 = vmul.f32 %v7179_v52, %v9450_v1  ;;  %v5156_v42 = vpop.xlane.xlu0 %5155  ;;  %vm4084_vm7 = vweird.f32 %v7179_v52  ;;  %v4102_v1 = vand.u32 2147483647, %v9476_v38 }
 0x695   : > { %v4071_v60 = vsel %vm4070_vm2, %v7171_v41, %v4067_v13  ;;  %v4678_v7 = vadd.f32 %v7175_v39, %v4677_v56  ;;  %v9485_v28 = vpop.xlane.xlu2 %4607  ;;  %v4701_v13 = vor.u32 1.1754944e-38, %v4700_v21  ;;  %vm4085_vm11 = vmor %vm4083_vm9, %vm4084_vm7  ;;  %v4104_v20 = vand.u32 2147483648, %v9476_v38 }
 0x696   : > { %v4076_v37 = vsel %vm9465_vm14, %v4075_v44, %v4071_v60  ;;  %v4692_v46 = vmul.f32 %v7177_v26, %v4691_v43  ;;  %v4080_v36 = vsub.f32 1.0, %v4079_v11  ;;  %7184 = vrcp.f32 %v9485_v28 }
 0x697   : > { %v4077_v24 = vmul.f32 %v9231_v8, %v4076_v37  ;;  %v4682_v61 = vsel %vm4681_vm5, %v7175_v39, %v4678_v7  ;;  %v5181_v39 = vsub.f32 %v9252_v63, %v5156_v42  ;;  %vm4098_vm13 = vweird.f32 %v9476_v38 }
 0x698   : > { %v9497_v56 = vpop.eup %7180  ;;  %v4687_v58 = vsel %vm9469_vm15, %v4686_v48, %v4682_v61  ;;  %v4693_v44 = vadd.f32 %v7177_v26, %v4692_v46  ;;  %v4081_v5 = vmul.f32 %v7179_v52, %v4080_v36  ;;  %vm4103_vm0 = vcmp.eq.f32.partialorder %v4102_v1, 8.507059e+37 }
 0x699   : > { %v7183_v43 = vpop.eup %7182  ;;  %4247 = vst [vmem:[#allocation24 + $0x20] sm:$0xff] %v4077_v24  ;;  %v4688_v11 = vmul.f32 %v9229_v15, %v4687_v58  ;;  %5233 = vadd.xlane.f32.xlu1 %v9497_v56  ;;  %v5203_v60 = vmul.f32 1.442695, %v5181_v39  ;;  %v4715_v58 = vand.u32 2147483648, %v9485_v28  ;;  %vm4709_vm1 = vweird.f32 %v9485_v28 }
 0x69a   : > { %v4697_v32 = vsel %vm4696_vm8, %v7177_v26, %v4693_v44  ;;  %v4082_v48 = vadd.f32 %v7179_v52, %v4081_v5  ;;  %v4094_v21 = vmul.f32 %v7183_v43, %v9476_v38  ;;  %v5158_v15 = vpop.xlane.xlu1 %5157  ;;  %vm4099_vm12 = vweird.f32 %v7183_v43 }
 0x69b   : > { %4872 = vst [vmem:[#allocation25 + $0x18] sm:$0xff] %v4688_v11  ;;  %v4702_v10 = vsel %vm9493_vm6, %v4701_v13, %v4697_v32  ;;  %v5182_v57 = vsub.f32 %v9262_v27, %v5158_v15  ;;  %7186 = vpow2.f32 %v5203_v60  ;;  %v4713_v27 = vand.u32 2147483647, %v9485_v28  ;;  %vm4100_vm14 = vmor %vm4098_vm13, %vm4099_vm12 }
 0x69c   : > { %v7185_v63 = vpop.eup %7184  ;;  %v4703_v42 = vmul.f32 %v9237_v23, %v4702_v10  ;;  %v4086_v26 = vsel %vm4085_vm11, %v7179_v52, %v4082_v48  ;;  %v4095_v7 = vsub.f32 1.0, %v4094_v21  ;;  %v9520_v37 = vpop.xlane.xlu0 %4609  ;;  %v4105_v44 = vor.u32 1.1754944e-38, %v4104_v20 }
 0x69d   : > { %v4091_v46 = vsel %vm9506_vm10, %v4090_v6, %v4086_v26  ;;  %v4705_v36 = vmul.f32 %v7185_v63, %v9485_v28  ;;  %v9525_v24 = vpop.xlane.xlu2 %3985  ;;  %v5205_v23 = vmul.f32 1.442695, %v5182_v57  ;;  %vm4710_vm15 = vweird.f32 %v7185_v63 }
 0x69e   : > { %4873 = vst [vmem:[#allocation25 + $0x20] sm:$0xff] %v4703_v42  ;;  %v4092_v61 = vmul.f32 %v9240_v62, %v4091_v46  ;;  %v4096_v41 = vmul.f32 %v7183_v43, %v4095_v7  ;;  %7188 = vrcp.f32 %v9525_v24  ;;  %vm9539_vm2 = vcmp.eq.f32.partialorder %v4713_v27, 8.507059e+37  ;;  %vm4711_vm3 = vmor %vm4709_vm1, %vm4710_vm15 }
 0x69f   : > { %v4706_v52 = vsub.f32 1.0, %v4705_v36  ;;  %7190 = vpow2.f32 %v5205_v23  ;;  %v4117_v21 = vand.u32 2147483647, %v9525_v24  ;;  %v4119_v28 = vand.u32 2147483648, %v9525_v24 }
 0x6a0   : > { %4248 = vst [vmem:[#allocation24 + $0x28] sm:$0xff] %v4092_v61  ;;  %v4097_v13 = vadd.f32 %v7183_v43, %v4096_v41  ;;  %7192 = vrcp.f32 %v9520_v37  ;;  %v4728_v20 = vand.u32 2147483647, %v9520_v37  ;;  %vm4113_vm4 = vweird.f32 %v9525_v24 }
 0x6a1   : > { %v4707_v5 = vmul.f32 %v7185_v63, %v4706_v52  ;;  %v9537_v8 = vpop.eup %7186  ;;  %vm4724_vm5 = vweird.f32 %v9520_v37  ;;  %v4730_v46 = vand.u32 2147483648, %v9520_v37  ;;  %vm9563_vm6 = vcmp.eq.f32.partialorder %v4117_v21, 8.507059e+37 }
 0x6a2   : > { %v4101_v62 = vsel %vm4100_vm14, %v7183_v43, %v4097_v13  ;;  %v9535_v11 = vpop.xlane.xlu1 %4611  ;;  %v4716_v43 = vor.u32 1.1754944e-38, %v4715_v58  ;;  %5235 = vadd.xlane.f32.xlu2 %v9537_v8  ;;  %v4120_v61 = vor.u32 1.1754944e-38, %v4119_v28  ;;  %vm9568_vm8 = vcmp.eq.f32.partialorder %v4728_v20, 8.507059e+37 }
 0x6a3   : > { %v4106_v39 = vsel %vm4103_vm0, %v4105_v44, %v4101_v62  ;;  %v4708_v38 = vadd.f32 %v7185_v63, %v4707_v5  ;;  %7194 = vrcp.f32 %v9535_v11  ;;  %v4743_v27 = vand.u32 2147483647, %v9535_v11 }
 0x6a4   : > { %v7189_v48 = vpop.eup %7188  ;;  %v4107_v6 = vmul.f32 %v9249_v34, %v4106_v39  ;;  %v9548_v15 = vpop.xlane.xlu0 %3987  ;;  %vm4739_vm9 = vweird.f32 %v9535_v11  ;;  %v4731_v39 = vor.u32 1.1754944e-38, %v4730_v46 }
 0x6a5   : > { %v4712_v10 = vsel %vm4711_vm3, %v7185_v63, %v4708_v38  ;;  %v4109_v1 = vmul.f32 %v7189_v48, %v9525_v24  ;;  %v5160_v60 = vpop.xlane.xlu2 %5159  ;;  %7196 = vrcp.f32 %v9548_v15  ;;  %v9553_v42 = vpop.eup %7190  ;;  %vm4114_vm7 = vweird.f32 %v7189_v48 }
 0x6a6   : > { %4249 = vst [vmem:[#allocation24 + $0x30] sm:$0xff] %v4107_v6  ;;  %v4717_v34 = vsel %vm9539_vm2, %v4716_v43, %v4712_v10  ;;  %v5183_v26 = vsub.f32 %v9279_v29, %v5160_v60  ;;  %v7193_v7 = vpop.eup %7192  ;;  %5237 = vadd.xlane.f32.xlu0 %v9553_v42  ;;  %v4745_v38 = vand.u32 2147483648, %v9535_v11  ;;  %vm4115_vm10 = vmor %vm4113_vm4, %vm4114_vm7  ;;  %vm9582_vm13 = vcmp.eq.f32.partialorder %v4743_v27, 8.507059e+37 }
 0x6a7   : > { %v4718_v63 = vmul.f32 %v9255_v40, %v4717_v34  ;;  %v4110_v57 = vsub.f32 1.0, %v4109_v1  ;;  %v4720_v41 = vmul.f32 %v7193_v7, %v9520_v37  ;;  %vm4725_vm11 = vweird.f32 %v7193_v7 }
 0x6a8   : > { %v5207_v23 = vmul.f32 1.442695, %v5183_v26  ;;  %vm4726_vm14 = vmor %vm4724_vm5, %vm4725_vm11  ;;  %v4746_v37 = vor.u32 1.1754944e-38, %v4745_v38  ;;  %vm4128_vm1 = vweird.f32 %v9548_v15 }
 0x6a9   : > { %v7195_v52 = vpop.eup %7194  ;;  %4874 = vst [vmem:[#allocation25 + $0x28] sm:$0xff] %v4718_v63  ;;  %v4111_v29 = vmul.f32 %v7189_v48, %v4110_v57  ;;  %v4721_v13 = vsub.f32 1.0, %v4720_v41  ;;  %v4134_v57 = vand.u32 2147483648, %v9548_v15 }
 0x6aa   : > { %v4735_v58 = vmul.f32 %v7195_v52, %v9535_v11  ;;  %7198 = vpow2.f32 %v5207_v23  ;;  %v9575_v44 = vpop.xlane.xlu1 %3989  ;;  %vm4740_vm12 = vweird.f32 %v7195_v52 }
 0x6ab   : > { %v7197_v5 = vpop.eup %7196  ;;  %v4112_v62 = vadd.f32 %v7189_v48, %v4111_v29  ;;  %7200 = vrcp.f32 %v9575_v44  ;;  %v4722_v32 = vmul.f32 %v7193_v7, %v4721_v13  ;;  %vm4741_vm0 = vmor %vm4739_vm9, %vm4740_vm12  ;;  %v4135_v11 = vor.u32 1.1754944e-38, %v4134_v57 }
 0x6ac   : > { %v4736_v6 = vsub.f32 1.0, %v4735_v58  ;;  %v4124_v43 = vmul.f32 %v7197_v5, %v9548_v15  ;;  %v5162_v21 = vpop.xlane.xlu0 %5161  ;;  %vm4129_vm15 = vweird.f32 %v7197_v5  ;;  %vm4143_vm5 = vweird.f32 %v9575_v44 }
 0x6ad   : > { %v4116_v28 = vsel %vm4115_vm10, %v7189_v48, %v4112_v62  ;;  %v9586_v1 = vpop.xlane.xlu2 %4613  ;;  %v5184_v20 = vsub.f32 %v9288_v22, %v5162_v21  ;;  %v4723_v60 = vadd.f32 %v7193_v7, %v4722_v32  ;;  %v4132_v48 = vand.u32 2147483647, %v9548_v15  ;;  %vm4130_vm2 = vmor %vm4128_vm1, %vm4129_vm15 }
 0x6ae   : > { %v4121_v24 = vsel %vm9563_vm6, %v4120_v61, %v4116_v28  ;;  %v4737_v34 = vmul.f32 %v7195_v52, %v4736_v6  ;;  %v4125_v26 = vsub.f32 1.0, %v4124_v43  ;;  %7202 = vrcp.f32 %v9586_v1 }
 0x6af   : > { %v4122_v63 = vmul.f32 %v9267_v18, %v4121_v24  ;;  %v4727_v22 = vsel %vm4726_vm14, %v7193_v7, %v4723_v60  ;;  %v5209_v23 = vmul.f32 1.442695, %v5184_v20  ;;  %vm4133_vm3 = vcmp.eq.f32.partialorder %v4132_v48, 8.507059e+37 }
 0x6b0   : > { %v9597_v46 = vpop.eup %7198  ;;  %v4738_v41 = vadd.f32 %v7195_v52, %v4737_v34  ;;  %v4126_v36 = vmul.f32 %v7197_v5, %v4125_v26  ;;  %v4732_v18 = vsel %vm9568_vm8, %v4731_v39, %v4727_v22  ;;  %v4147_v62 = vand.u32 2147483647, %v9575_v44 }
 0x6b1   : > { %v7201_v61 = vpop.eup %7200  ;;  %4250 = vst [vmem:[#allocation24 + $0x38] sm:$0xff] %v4122_v63  ;;  %5239 = vadd.xlane.f32.xlu1 %v9597_v46  ;;  %v4733_v7 = vmul.f32 %v9265_v17, %v4732_v18  ;;  %7204 = vpow2.f32 %v5209_v23  ;;  %v4149_v6 = vand.u32 2147483648, %v9575_v44  ;;  %v4760_v60 = vand.u32 2147483648, %v9586_v1 }
 0x6b2   : > { %v4742_v29 = vsel %vm4741_vm0, %v7195_v52, %v4738_v41  ;;  %v4127_v27 = vadd.f32 %v7197_v5, %v4126_v36  ;;  %v4139_v13 = vmul.f32 %v7201_v61, %v9575_v44  ;;  %v5164_v58 = vpop.xlane.xlu1 %5163  ;;  %vm4144_vm4 = vweird.f32 %v7201_v61 }
 0x6b3   : > { %v4747_v40 = vsel %vm9582_vm13, %v4746_v37, %v4742_v29  ;;  %4875 = vst [vmem:[#allocation25 + $0x30] sm:$0xff] %v4733_v7  ;;  %v5185_v43 = vsub.f32 %v9298_v55, %v5164_v58  ;;  %vm4145_vm6 = vmor %vm4143_vm5, %vm4144_vm4  ;;  %v4150_v34 = vor.u32 1.1754944e-38, %v4149_v6  ;;  %vm4148_vm7 = vcmp.eq.f32.partialorder %v4147_v62, 8.507059e+37 }
 0x6b4   : > { %v4748_v15 = vmul.f32 %v9273_v51, %v4747_v40  ;;  %v4131_v39 = vsel %vm4130_vm2, %v7197_v5, %v4127_v27  ;;  %v4140_v38 = vsub.f32 1.0, %v4139_v13  ;;  %v9613_v17 = vpop.xlane.xlu0 %4615  ;;  %v7203_v52 = vpop.eup %7202  ;;  %v4758_v5 = vand.u32 2147483647, %v9586_v1 }
 0x6b5   : > { %v4136_v32 = vsel %vm4133_vm3, %v4135_v11, %v4131_v39  ;;  %v9617_v21 = vpop.xlane.xlu2 %3991  ;;  %7206 = vrcp.f32 %v9613_v17  ;;  %v4750_v51 = vmul.f32 %v7203_v52, %v9586_v1  ;;  %v5211_v20 = vmul.f32 1.442695, %v5185_v43 }
 0x6b6   : > { %4876 = vst [vmem:[#allocation25 + $0x38] sm:$0xff] %v4748_v15  ;;  %v4137_v28 = vmul.f32 %v9276_v19, %v4136_v32  ;;  %v4141_v10 = vmul.f32 %v7201_v61, %v4140_v38  ;;  %7208 = vrcp.f32 %v9617_v21  ;;  %vm4755_vm8 = vweird.f32 %v7203_v52 }
 0x6b7   : > { %v4751_v55 = vsub.f32 1.0, %v4750_v51  ;;  %7210 = vpow2.f32 %v5211_v20  ;;  %v9626_v19 = vpop.eup %7204  ;;  %vm4754_vm9 = vweird.f32 %v9586_v1  ;;  %vm9631_vm10 = vcmp.eq.f32.partialorder %v4758_v5, 8.507059e+37 }
 0x6b8   : > { %4251 = vst [vmem:[#allocation24 + $0x40] sm:$0xff] %v4137_v28  ;;  %v4142_v24 = vadd.f32 %v7201_v61, %v4141_v10  ;;  %5241 = vadd.xlane.f32.xlu2 %v9626_v19  ;;  %vm4756_vm11 = vmor %vm4754_vm9, %vm4755_vm8  ;;  %v4162_v1 = vand.u32 2147483647, %v9617_v21  ;;  %v4164_v7 = vand.u32 2147483648, %v9617_v21  ;;  %v4773_v29 = vand.u32 2147483647, %v9613_v17 }
 0x6b9   : > { %v4752_v63 = vmul.f32 %v7203_v52, %v4751_v55  ;;  %vm4769_vm12 = vweird.f32 %v9613_v17  ;;  %vm4158_vm13 = vweird.f32 %v9617_v21  ;;  %v4775_v62 = vand.u32 2147483648, %v9613_v17 }
 0x6ba   : > { %v4146_v26 = vsel %vm4145_vm6, %v7201_v61, %v4142_v24  ;;  %v9628_v48 = vpop.xlane.xlu1 %4617  ;;  %v4761_v61 = vor.u32 1.1754944e-38, %v4760_v60  ;;  %vm9656_vm15 = vcmp.eq.f32.partialorder %v4162_v1, 8.507059e+37  ;;  %v4165_v43 = vor.u32 1.1754944e-38, %v4164_v7 }
 0x6bb   : > { %v7207_v57 = vpop.eup %7206  ;;  %v4151_v22 = vsel %vm4148_vm7, %v4150_v34, %v4146_v26  ;;  %7212 = vrcp.f32 %v9628_v48  ;;  %v4753_v36 = vadd.f32 %v7203_v52, %v4752_v63  ;;  %vm9660_vm0 = vcmp.eq.f32.partialorder %v4773_v29, 8.507059e+37 }
 0x6bc   : > { %v4152_v41 = vmul.f32 %v9285_v50, %v4151_v22  ;;  %v4765_v18 = vmul.f32 %v7207_v57, %v9613_v17  ;;  %v9639_v37 = vpop.xlane.xlu0 %3993  ;;  %v7209_v23 = vpop.eup %7208  ;;  %vm4770_vm14 = vweird.f32 %v7207_v57  ;;  %v4776_v24 = vor.u32 1.1754944e-38, %v4775_v62 }
 0x6bd   : > { %v5166_v27 = vpop.xlane.xlu2 %5165  ;;  %7214 = vrcp.f32 %v9639_v37  ;;  %v4757_v13 = vsel %vm4756_vm11, %v7203_v52, %v4753_v36  ;;  %v4154_v50 = vmul.f32 %v7209_v23, %v9617_v21  ;;  %v9647_v40 = vpop.eup %7210  ;;  %vm4159_vm1 = vweird.f32 %v7209_v23  ;;  %vm4771_vm2 = vmor %vm4769_vm12, %vm4770_vm14 }
 0x6be   : > { %4252 = vst [vmem:[#allocation24 + $0x48] sm:$0xff] %v4152_v41  ;;  %v4766_v58 = vsub.f32 1.0, %v4765_v18  ;;  %v4762_v11 = vsel %vm9631_vm10, %v4761_v61, %v4757_v13  ;;  %v5186_v15 = vsub.f32 %v9315_v33, %v5166_v27  ;;  %5243 = vadd.xlane.f32.xlu0 %v9647_v40  ;;  %vm4784_vm3 = vweird.f32 %v9628_v48  ;;  %vm4160_vm4 = vmor %vm4158_vm13, %vm4159_vm1 }
 0x6bf   : > { %v4763_v39 = vmul.f32 %v9291_v16, %v4762_v11  ;;  %v4155_v38 = vsub.f32 1.0, %v4154_v50  ;;  %v4788_v55 = vand.u32 2147483647, %v9628_v48  ;;  %v4790_v17 = vand.u32 2147483648, %v9628_v48 }
 0x6c0   : > { %v4767_v52 = vmul.f32 %v7207_v57, %v4766_v58  ;;  %v5213_v10 = vmul.f32 1.442695, %v5186_v15  ;;  %v4177_v1 = vand.u32 2147483647, %v9639_v37  ;;  %v4179_v7 = vand.u32 2147483648, %v9639_v37 }
 0x6c1   : > { %v7213_v32 = vpop.eup %7212  ;;  %4877 = vst [vmem:[#allocation25 + $0x40] sm:$0xff] %v4763_v39  ;;  %v4156_v33 = vmul.f32 %v7209_v23, %v4155_v38  ;;  %vm4789_vm8 = vcmp.eq.f32.partialorder %v4788_v55, 8.507059e+37  ;;  %vm4173_vm9 = vweird.f32 %v9639_v37 }
 0x6c2   : > { %v4768_v16 = vadd.f32 %v7207_v57, %v4767_v52  ;;  %v4780_v51 = vmul.f32 %v7213_v32, %v9628_v48  ;;  %v9665_v5 = vpop.xlane.xlu1 %3995  ;;  %7216 = vpow2.f32 %v5213_v10  ;;  %vm4785_vm5 = vweird.f32 %v7213_v32 }
 0x6c3   : > { %v7215_v20 = vpop.eup %7214  ;;  %v4157_v60 = vadd.f32 %v7209_v23, %v4156_v33  ;;  %7218 = vrcp.f32 %v9665_v5  ;;  %vm4786_vm7 = vmor %vm4784_vm3, %vm4785_vm5  ;;  %v4180_v39 = vor.u32 1.1754944e-38, %v4179_v7  ;;  %vm4178_vm11 = vcmp.eq.f32.partialorder %v4177_v1, 8.507059e+37 }
 0x6c4   : > { %v4772_v34 = vsel %vm4771_vm2, %v7207_v57, %v4768_v16  ;;  %v4781_v26 = vsub.f32 1.0, %v4780_v51  ;;  %v4169_v63 = vmul.f32 %v7215_v20, %v9639_v37  ;;  %v5168_v18 = vpop.xlane.xlu0 %5167  ;;  %vm4174_vm6 = vweird.f32 %v7215_v20 }
 0x6c5   : > { %v4777_v22 = vsel %vm9660_vm0, %v4776_v24, %v4772_v34  ;;  %v9678_v44 = vpop.xlane.xlu2 %4619  ;;  %v4161_v41 = vsel %vm4160_vm4, %v7209_v23, %v4157_v60  ;;  %v5187_v50 = vsub.f32 %v9323_v31, %v5168_v18  ;;  %vm4175_vm10 = vmor %vm4173_vm9, %vm4174_vm6  ;;  %v4194_v16 = vand.u32 2147483648, %v9665_v5 }
 0x6c6   : > { %v4778_v36 = vmul.f32 %v9301_v47, %v4777_v22  ;;  %v4782_v57 = vmul.f32 %v7213_v32, %v4781_v26  ;;  %v4170_v61 = vsub.f32 1.0, %v4169_v63  ;;  %v4166_v21 = vsel %vm9656_vm15, %v4165_v43, %v4161_v41 }
 0x6c7   : > { %7220 = vrcp.f32 %v9678_v44  ;;  %v4167_v29 = vmul.f32 %v9303_v14, %v4166_v21  ;;  %v4791_v47 = vor.u32 1.1754944e-38, %v4790_v17  ;;  %v5215_v38 = vmul.f32 1.442695, %v5187_v50 }
 0x6c8   : > { %4878 = vst [vmem:[#allocation25 + $0x48] sm:$0xff] %v4778_v36  ;;  %v4783_v27 = vadd.f32 %v7213_v32, %v4782_v57  ;;  %v4171_v13 = vmul.f32 %v7215_v20, %v4170_v61  ;;  %v9687_v23 = vpop.eup %7216  ;;  %vm4188_vm13 = vweird.f32 %v9665_v5  ;;  %v4805_v55 = vand.u32 2147483648, %v9678_v44 }
 0x6c9   : > { %4253 = vst [vmem:[#allocation24 + $0x50] sm:$0xff] %v4167_v29  ;;  %5245 = vadd.xlane.f32.xlu1 %v9687_v23  ;;  %v7219_v62 = vpop.eup %7218  ;;  %7222 = vpow2.f32 %v5215_v38  ;;  %v4195_v63 = vor.u32 1.1754944e-38, %v4194_v16  ;;  %vm4799_vm1 = vweird.f32 %v9678_v44 }
 0x6ca   : > { %v4787_v58 = vsel %vm4786_vm7, %v7213_v32, %v4783_v27  ;;  %v4172_v11 = vadd.f32 %v7215_v20, %v4171_v13  ;;  %v5170_v14 = vpop.xlane.xlu1 %5169  ;;  %v4184_v31 = vmul.f32 %v7219_v62, %v9665_v5  ;;  %vm4189_vm12 = vweird.f32 %v7219_v62 }
 0x6cb   : > { %v4792_v15 = vsel %vm4789_vm8, %v4791_v47, %v4787_v58  ;;  %v5188_v43 = vsub.f32 %v9332_v3, %v5170_v14  ;;  %vm4190_vm15 = vmor %vm4188_vm13, %vm4189_vm12  ;;  %v4806_v36 = vor.u32 1.1754944e-38, %v4805_v55 }
 0x6cc   : > { %v4793_v48 = vmul.f32 %v9309_v4, %v4792_v15  ;;  %v4176_v52 = vsel %vm4175_vm10, %v7215_v20, %v4172_v11  ;;  %v4185_v10 = vsub.f32 1.0, %v4184_v31  ;;  %v4192_v20 = vand.u32 2147483647, %v9665_v5 }
 0x6cd   : > { %v7221_v6 = vpop.eup %7220  ;;  %v4181_v32 = vsel %vm4178_vm11, %v4180_v39, %v4176_v52  ;;  %v9698_v37 = vpop.xlane.xlu2 %3997  ;;  %v5217_v4 = vmul.f32 1.442695, %v5188_v43 }
 0x6ce   : > { %4879 = vst [vmem:[#allocation25 + $0x50] sm:$0xff] %v4793_v48  ;;  %v4182_v28 = vmul.f32 %v9312_v45, %v4181_v32  ;;  %v4795_v33 = vmul.f32 %v7221_v6, %v9678_v44  ;;  %7224 = vrcp.f32 %v9698_v37  ;;  %v4186_v51 = vmul.f32 %v7219_v62, %v4185_v10 }
 0x6cf   : > { %v4803_v45 = vand.u32 2147483647, %v9678_v44  ;;  %7226 = vpow2.f32 %v5217_v4  ;;  %vm4800_vm14 = vweird.f32 %v7221_v6  ;;  %v9711_v26 = vpop.eup %7222  ;;  %vm4193_vm0 = vcmp.eq.f32.partialorder %v4192_v20, 8.507059e+37 }
 0x6d0   : > { %4254 = vst [vmem:[#allocation24 + $0x58] sm:$0xff] %v4182_v28  ;;  %v4796_v24 = vsub.f32 1.0, %v4795_v33  ;;  %v9705_v3 = vpop.xlane.xlu0 %3999  ;;  %v4187_v60 = vadd.f32 %v7219_v62, %v4186_v51  ;;  %5247 = vadd.xlane.f32.xlu2 %v9711_v26  ;;  %vm4801_vm2 = vmor %vm4799_vm1, %vm4800_vm14  ;;  %v4209_v50 = vand.u32 2147483648, %v9698_v37  ;;  %vm4203_vm5 = vweird.f32 %v9698_v37 }
 0x6d1   : > { %7228 = vrcp.f32 %v9705_v3  ;;  %vm4804_vm3 = vcmp.eq.f32.partialorder %v4803_v45, 8.507059e+37  ;;  %v4222_v38 = vand.u32 2147483647, %v9705_v3  ;;  %v4224_v48 = vand.u32 2147483648, %v9705_v3 }
 0x6d2   : > { %v4797_v34 = vmul.f32 %v7221_v6, %v4796_v24  ;;  %v4191_v22 = vsel %vm4190_vm15, %v7219_v62, %v4187_v60  ;;  %v4210_v52 = vor.u32 1.1754944e-38, %v4209_v50  ;;  %vm4218_vm9 = vweird.f32 %v9705_v3 }
 0x6d3   : > { %v4196_v41 = vsel %vm4193_vm0, %v4195_v63, %v4191_v22  ;;  %v4225_v10 = vor.u32 1.1754944e-38, %v4224_v48  ;;  %vm4223_vm11 = vcmp.eq.f32.partialorder %v4222_v38, 8.507059e+37 }
 0x6d4   : > { %v4798_v17 = vadd.f32 %v7221_v6, %v4797_v34  ;;  %v7225_v5 = vpop.eup %7224  ;;  %v4197_v61 = vmul.f32 %v9320_v25, %v4196_v41 }
 0x6d5   : > { %v5172_v57 = vpop.xlane.xlu2 %5171  ;;  %v4199_v21 = vmul.f32 %v7225_v5, %v9698_v37  ;;  %v9717_v1 = vpop.eup %7226  ;;  %vm4204_vm4 = vweird.f32 %v7225_v5 }
 0x6d6   : > { %v4802_v18 = vsel %vm4801_vm2, %v7221_v6, %v4798_v17  ;;  %v5189_v29 = vsub.f32 %v9346_v49, %v5172_v57  ;;  %4255 = vst [vmem:[#allocation24 + $0x60] sm:$0xff] %v4197_v61  ;;  %5249 = vadd.xlane.f32.xlu0 %v9717_v1  ;;  %v4207_v49 = vand.u32 2147483647, %v9698_v37  ;;  %vm4205_vm6 = vmor %vm4203_vm5, %vm4204_vm4 }
 0x6d7   : > { %v4807_v7 = vsel %vm4804_vm3, %v4806_v36, %v4802_v18  ;;  %v7229_v27 = vpop.eup %7228  ;;  %v4200_v13 = vsub.f32 1.0, %v4199_v21 }
 0x6d8   : > { %v4808_v44 = vmul.f32 %v9326_v59, %v4807_v7  ;;  %v5174_v47 = vpop.xlane.xlu0 %5173  ;;  %v4214_v25 = vmul.f32 %v7229_v27, %v9705_v3  ;;  %v5219_v58 = vmul.f32 1.442695, %v5189_v29  ;;  %v9724_v11 = vpop.xlane.xlu1 %4001  ;;  %vm4219_vm7 = vweird.f32 %v7229_v27 }
 0x6d9   : > { %v5190_v14 = vsub.f32 %v9351_v54, %v5174_v47  ;;  %v4201_v62 = vmul.f32 %v7225_v5, %v4200_v13  ;;  %7230 = vrcp.f32 %v9724_v11  ;;  %vm4208_vm8 = vcmp.eq.f32.partialorder %v4207_v49, 8.507059e+37  ;;  %vm4220_vm10 = vmor %vm4218_vm9, %vm4219_vm7 }
 0x6da   : > { %4880 = vst [vmem:[#allocation25 + $0x58] sm:$0xff] %v4808_v44  ;;  %v4215_v59 = vsub.f32 1.0, %v4214_v25  ;;  %7232 = vpow2.f32 %v5219_v58  ;;  %v4237_v45 = vand.u32 2147483647, %v9724_v11  ;;  %v4239_v60 = vand.u32 2147483648, %v9724_v11 }
 0x6db   : > { %v5221_v15 = vmul.f32 1.442695, %v5190_v14  ;;  %v4202_v39 = vadd.f32 %v7225_v5, %v4201_v62  ;;  %vm4233_vm13 = vweird.f32 %v9724_v11 }
 0x6dc   : > { %v4216_v54 = vmul.f32 %v7229_v27, %v4215_v59  ;;  %vm4238_vm14 = vcmp.eq.f32.partialorder %v4237_v45, 8.507059e+37  ;;  %v4240_v57 = vor.u32 1.1754944e-38, %v4239_v60 }
 0x6dd   : > { %7234 = vpow2.f32 %v5221_v15  ;;  %v9732_v31 = vpop.xlane.xlu2 %4623  ;;  %v4206_v6 = vsel %vm4205_vm6, %v7225_v5, %v4202_v39 }
 0x6de   : > { %7236 = vrcp.f32 %v9732_v31  ;;  %v4211_v32 = vsel %vm4208_vm8, %v4210_v52, %v4206_v6  ;;  %v4217_v43 = vadd.f32 %v7229_v27, %v4216_v54  ;;  %v4833_v63 = vand.u32 2147483647, %v9732_v31 }
 0x6df   : > { %v7231_v37 = vpop.eup %7230  ;;  %v4212_v28 = vmul.f32 %v9335_v2, %v4211_v32  ;;  %v4835_v22 = vand.u32 2147483648, %v9732_v31  ;;  %vm4829_vm0 = vweird.f32 %v9732_v31 }
 0x6e0   : > { %v9737_v33 = vpop.xlane.xlu0 %4625  ;;  %v9739_v16 = vpop.eup %7232  ;;  %v4221_v4 = vsel %vm4220_vm10, %v7229_v27, %v4217_v43  ;;  %v4229_v51 = vmul.f32 %v7231_v37, %v9724_v11  ;;  %vm4234_vm12 = vweird.f32 %v7231_v37  ;;  %vm9762_vm1 = vcmp.eq.f32.partialorder %v4833_v63, 8.507059e+37  ;;  %v9999_v43 = vld [vmem:[#allocation43_spill] sm:$0xff] }
 0x6e1   : > { %v9742_v20 = vpop.xlane.xlu1 %4621  ;;  %4256 = vst [vmem:[#allocation24 + $0x68] sm:$0xff] %v4212_v28  ;;  %v4226_v24 = vsel %vm4223_vm11, %v4225_v10, %v4221_v4  ;;  %5251 = vadd.xlane.f32.xlu1 %v9739_v16  ;;  %vm4235_vm15 = vmor %vm4233_vm13, %vm4234_vm12  ;;  %v4836_v7 = vor.u32 1.1754944e-38, %v4835_v22  ;;  %vm4844_vm5 = vweird.f32 %v9737_v33  ;;  %v4848_v39 = vand.u32 2147483647, %v9737_v33 }
 0x6e2   : > { %7238 = vrcp.f32 %v9742_v20  ;;  %v4227_v3 = vmul.f32 %v9340_v30, %v4226_v24  ;;  %v4230_v55 = vsub.f32 1.0, %v4229_v51  ;;  %v4818_v30 = vand.u32 2147483647, %v9742_v20 }
 0x6e3   : > { %v9747_v2 = vpop.eup %7234  ;;  %7240 = vrcp.f32 %v9737_v33  ;;  %vm4814_vm2 = vweird.f32 %v9742_v20  ;;  %v4820_v58 = vand.u32 2147483648, %v9742_v20  ;;  %v4850_v38 = vand.u32 2147483648, %v9737_v33 }
 0x6e4   : > { %v7237_v34 = vpop.eup %7236  ;;  %5253 = vadd.xlane.f32.xlu2 %v9747_v2  ;;  %4257 = vst [vmem:[#allocation24 + $0x70] sm:$0xff] %v4227_v3  ;;  %v4231_v17 = vmul.f32 %v7231_v37, %v4230_v55  ;;  %vm9770_vm4 = vcmp.eq.f32.partialorder %v4818_v30, 8.507059e+37  ;;  %vm9792_vm10 = vcmp.eq.f32.partialorder %v4848_v39, 8.507059e+37 }
 0x6e5   : > { %v4825_v5 = vmul.f32 %v7237_v34, %v9732_v31  ;;  %v9756_v41 = vpop.xlane.xlu2 %5223  ;;  %vm4830_vm3 = vweird.f32 %v7237_v34  ;;  %v4821_v31 = vor.u32 1.1754944e-38, %v4820_v58  ;;  %v4851_v24 = vor.u32 1.1754944e-38, %v4850_v38 }
 0x6e6   : > { %7242 = vrcp.f32 %v9756_v41  ;;  %v4232_v36 = vadd.f32 %v7231_v37, %v4231_v17  ;;  %vm4831_vm6 = vmor %vm4829_vm0, %vm4830_vm3  ;;  %v5266_v45 = vand.u32 2147483648, %v9756_v41  ;;  %v5264_v60 = vand.u32 2147483647, %v9756_v41  ;;  %v10002_v17 = vld [vmem:[#allocation45_spill] sm:$0xff] }
 0x6e7   : > { %v4826_v61 = vsub.f32 1.0, %v4825_v5  ;;  %vm5260_vm13 = vweird.f32 %v9756_v41 }
 0x6e8   : > { %v7239_v18 = vpop.eup %7238  ;;  %v4236_v27 = vsel %vm4235_vm15, %v7231_v37, %v4232_v36  ;;  %vm5265_vm15 = vcmp.eq.f32.partialorder %v5264_v60, 8.507059e+37 }
 0x6e9   : > { %v7241_v29 = vpop.eup %7240  ;;  %v4827_v44 = vmul.f32 %v7237_v34, %v4826_v61  ;;  %v4810_v13 = vmul.f32 %v7239_v18, %v9742_v20  ;;  %v9768_v47 = vpop.xlane.xlu1 %4627  ;;  %v4241_v50 = vsel %vm4238_vm14, %v4240_v57, %v4236_v27  ;;  %vm4815_vm7 = vweird.f32 %v7239_v18  ;;  %v10003_v57 = vld [vmem:[#allocation44_spill] sm:$0xff] }
 0x6ea   : > { %v4840_v11 = vmul.f32 %v7241_v29, %v9737_v33  ;;  %v4242_v14 = vmul.f32 %v9353_v9, %v4241_v50  ;;  %7244 = vrcp.f32 %v9768_v47  ;;  %v9783_v48 = vpop.xlane.xlu0 %5225  ;;  %vm4845_vm8 = vweird.f32 %v7241_v29  ;;  %vm4816_vm9 = vmor %vm4814_vm2, %vm4815_vm7 }
 0x6eb   : > { %v4828_v62 = vadd.f32 %v7237_v34, %v4827_v44  ;;  %v4811_v49 = vsub.f32 1.0, %v4810_v13  ;;  %7246 = vrcp.f32 %v9783_v48  ;;  %vm4846_vm11 = vmor %vm4844_vm5, %vm4845_vm8  ;;  %v4865_v44 = vand.u32 2147483648, %v9768_v47 }
 0x6ec   : > { %v7243_v59 = vpop.eup %7242  ;;  %v4841_v15 = vsub.f32 1.0, %v4840_v11  ;;  %4258 = vst [vmem:[#allocation24 + $0x78] sm:$0xff] %v4242_v14  ;;  %v5281_v58 = vand.u32 2147483648, %v9783_v48  ;;  %v5279_v39 = vand.u32 2147483647, %v9783_v48  ;;  %vm5275_vm5 = vweird.f32 %v9783_v48 }
 0x6ed   : > { %v4832_v52 = vsel %vm4831_vm6, %v7237_v34, %v4828_v62  ;;  %v4812_v9 = vmul.f32 %v7239_v18, %v4811_v49  ;;  %v5256_v54 = vmul.f32 %v7243_v59, %v9756_v41  ;;  %vm5261_vm12 = vweird.f32 %v7243_v59 }
 0x6ee   : > { %v4837_v6 = vsel %vm9762_vm1, %v4836_v7, %v4832_v52  ;;  %v4842_v32 = vmul.f32 %v7241_v29, %v4841_v15  ;;  %vm5262_vm14 = vmor %vm5260_vm13, %vm5261_vm12  ;;  %v4863_v41 = vand.u32 2147483647, %v9768_v47  ;;  %vm4859_vm1 = vweird.f32 %v9768_v47 }
 0x6ef   : > { %v4838_v37 = vmul.f32 %v9999_v43, %v4837_v6  ;;  %v4813_v28 = vadd.f32 %v7239_v18, %v4812_v9  ;;  %v5257_v10 = vsub.f32 1.0, %v5256_v54  ;;  %v5282_v38 = vor.u32 1.1754944e-38, %v5281_v58 }
 0x6f0   : > { %v4843_v4 = vadd.f32 %v7241_v29, %v4842_v32  ;;  %v7245_v20 = vpop.eup %7244  ;;  %vm4864_vm2 = vcmp.eq.f32.partialorder %v4863_v41, 8.507059e+37  ;;  %vm5280_vm8 = vcmp.eq.f32.partialorder %v5279_v39, 8.507059e+37 }
 0x6f1   : > { %4882 = vst [vmem:[#allocation25 + $0x68] sm:$0xff] %v4838_v37  ;;  %v4817_v3 = vsel %vm4816_vm9, %v7239_v18, %v4813_v28  ;;  %v5258_v55 = vmul.f32 %v7243_v59, %v5257_v10  ;;  %v9800_v34 = vpop.xlane.xlu1 %5227  ;;  %v4855_v36 = vmul.f32 %v7245_v20, %v9768_v47  ;;  %v5267_v18 = vor.u32 1.1754944e-38, %v5266_v45  ;;  %v7247_v21 = vpop.eup %7246  ;;  %v10004_v47 = vld [vmem:[#allocation46_spill] sm:$0xff] }
 0x6f2   : > { %v4822_v63 = vsel %vm9770_vm4, %v4821_v31, %v4817_v3  ;;  %v4847_v22 = vsel %vm4846_vm11, %v7241_v29, %v4843_v4  ;;  %7248 = vrcp.f32 %v9800_v34  ;;  %v5271_v13 = vmul.f32 %v7247_v21, %v9783_v48  ;;  %v10005_v4 = vld [vmem:[#allocation47_spill] sm:$0xff] }
 0x6f3   : > { %v4823_v5 = vmul.f32 %v10002_v17, %v4822_v63  ;;  %v4852_v33 = vsel %vm9792_vm10, %v4851_v24, %v4847_v22  ;;  %v5259_v30 = vadd.f32 %v7243_v59, %v5258_v55  ;;  %v4856_v29 = vsub.f32 1.0, %v4855_v36 }
 0x6f4   : > { %v4853_v61 = vmul.f32 %v10003_v57, %v4852_v33  ;;  %vm4860_vm0 = vweird.f32 %v7245_v20  ;;  %v5272_v14 = vsub.f32 1.0, %v5271_v13  ;;  %vm5276_vm4 = vweird.f32 %v7247_v21 }
 0x6f5   : > { %4881 = vst [vmem:[#allocation25 + $0x60] sm:$0xff] %v4823_v5  ;;  %v5263_v7 = vsel %vm5262_vm14, %v7243_v59, %v5259_v30  ;;  %v4857_v25 = vmul.f32 %v7245_v20, %v4856_v29  ;;  %vm4861_vm3 = vmor %vm4859_vm1, %vm4860_vm0  ;;  %v4866_v59 = vor.u32 1.1754944e-38, %v4865_v44  ;;  %v5296_v31 = vand.u32 2147483648, %v9800_v34 }
 0x6f6   : > { %4883 = vst [vmem:[#allocation25 + $0x70] sm:$0xff] %v4853_v61  ;;  %v5268_v27 = vsel %vm5265_vm15, %v5267_v18, %v5263_v7  ;;  %v5273_v15 = vmul.f32 %v7247_v21, %v5272_v14  ;;  %vm5277_vm6 = vmor %vm5275_vm5, %vm5276_vm4  ;;  %v5294_v37 = vand.u32 2147483647, %v9800_v34  ;;  %vm5290_vm9 = vweird.f32 %v9800_v34 }
 0x6f7   : > { %v5269_v50 = vmul.f32 %v9374_v0, %v5268_v27  ;;  %v4858_v62 = vadd.f32 %v7245_v20, %v4857_v25  ;;  %v5297_v24 = vor.u32 1.1754944e-38, %v5296_v31 }
 0x6f8   : > { %v7249_v11 = vpop.eup %7248  ;;  %v5274_v6 = vadd.f32 %v7247_v21, %v5273_v15  ;;  %vm5295_vm11 = vcmp.eq.f32.partialorder %v5294_v37, 8.507059e+37 }
 0x6f9   : > { %5495 = vst [vmem:[#allocation27] sm:$0xff] %v5269_v50  ;;  %v5286_v49 = vmul.f32 %v7249_v11, %v9800_v34  ;;  %v4862_v0 = vsel %vm4861_vm3, %v7245_v20, %v4858_v62  ;;  %v5230_v9 = vpop.xlane.xlu2 %5229  ;;  %vm5291_vm7 = vweird.f32 %v7249_v11 }
 0x6fa   : > { %v4867_v54 = vsel %vm4864_vm2, %v4866_v59, %v4862_v0  ;;  %7250 = vrcp.f32 %v5230_v9  ;;  %v5278_v28 = vsel %vm5277_vm6, %v7247_v21, %v5274_v6  ;;  %vm5292_vm10 = vmor %vm5290_vm9, %vm5291_vm7  ;;  %v5311_v17 = vand.u32 2147483648, %v5230_v9 }
 0x6fb   : > { %v5287_v52 = vsub.f32 1.0, %v5286_v49  ;;  %v4868_v32 = vmul.f32 %v10004_v47, %v4867_v54  ;;  %v5283_v10 = vsel %vm5280_vm8, %v5282_v38, %v5278_v28  ;;  %v5309_v34 = vand.u32 2147483647, %v5230_v9 }
 0x6fc   : > { %v5284_v51 = vmul.f32 %v10005_v4, %v5283_v10  ;;  %vm5305_vm13 = vweird.f32 %v5230_v9  ;;  %v5312_v57 = vor.u32 1.1754944e-38, %v5311_v17 }
 0x6fd   : > { %v5288_v43 = vmul.f32 %v7249_v11, %v5287_v52  ;;  %4884 = vst [vmem:[#allocation25 + $0x78] sm:$0xff] %v4868_v32  ;;  %vm5310_vm15 = vcmp.eq.f32.partialorder %v5309_v34, 8.507059e+37 }
 0x6fe   : > { %5496 = vst [vmem:[#allocation27 + $0x8] sm:$0xff] %v5284_v51 }
 0x6ff   : > { %v5289_v48 = vadd.f32 %v7249_v11, %v5288_v43 }
 0x700   : > { %v7251_v55 = vpop.eup %7250 }
 0x701   : > { %v5293_v45 = vsel %vm5292_vm10, %v7249_v11, %v5289_v48  ;;  %v5232_v3 = vpop.xlane.xlu0 %5231  ;;  %v5301_v63 = vmul.f32 %v7251_v55, %v5230_v9  ;;  %vm5306_vm12 = vweird.f32 %v7251_v55 }
 0x702   : > { %v5298_v60 = vsel %vm5295_vm11, %v5297_v24, %v5293_v45  ;;  %7252 = vrcp.f32 %v5232_v3  ;;  %vm5307_vm14 = vmor %vm5305_vm13, %vm5306_vm12  ;;  %v5324_v7 = vand.u32 2147483647, %v5232_v3  ;;  %v5326_v29 = vand.u32 2147483648, %v5232_v3 }
 0x703   : > { %v5299_v20 = vmul.f32 %v9404_v53, %v5298_v60  ;;  %v5302_v22 = vsub.f32 1.0, %v5301_v63  ;;  %vm5320_vm1 = vweird.f32 %v5232_v3 }
 0x704   : > { %v5327_v13 = vor.u32 1.1754944e-38, %v5326_v29  ;;  %vm5325_vm3 = vcmp.eq.f32.partialorder %v5324_v7, 8.507059e+37 }
 0x705   : > { %5497 = vst [vmem:[#allocation27 + $0x10] sm:$0xff] %v5299_v20  ;;  %v5303_v5 = vmul.f32 %v7251_v55, %v5302_v22 }
 0x707   : > { %v5304_v30 = vadd.f32 %v7251_v55, %v5303_v5 }
 0x708   : > { %v7253_v33 = vpop.eup %7252 }
 0x709   : > { %v5316_v36 = vmul.f32 %v7253_v33, %v5232_v3  ;;  %v5308_v61 = vsel %vm5307_vm14, %v7251_v55, %v5304_v30  ;;  %vm5321_vm0 = vweird.f32 %v7253_v33 }
 0x70a   : > { %v5313_v21 = vsel %vm5310_vm15, %v5312_v57, %v5308_v61  ;;  %vm5322_vm2 = vmor %vm5320_vm1, %vm5321_vm0 }
 0x70b   : > { %v5317_v18 = vsub.f32 1.0, %v5316_v36  ;;  %v5314_v41 = vmul.f32 %v9432_v12, %v5313_v21 }
 0x70c   : > { %v5234_v53 = vpop.xlane.xlu1 %5233 }
 0x70d   : > { %v5318_v27 = vmul.f32 %v7253_v33, %v5317_v18  ;;  %7254 = vrcp.f32 %v5234_v53  ;;  %5498 = vst [vmem:[#allocation27 + $0x18] sm:$0xff] %v5314_v41  ;;  %v5341_v49 = vand.u32 2147483648, %v5234_v53  ;;  %v5339_v15 = vand.u32 2147483647, %v5234_v53 }
 0x70e   : > { %vm5335_vm5 = vweird.f32 %v5234_v53 }
 0x70f   : > { %v5319_v44 = vadd.f32 %v7253_v33, %v5318_v27  ;;  %v5342_v38 = vor.u32 1.1754944e-38, %v5341_v49  ;;  %vm5340_vm7 = vcmp.eq.f32.partialorder %v5339_v15, 8.507059e+37 }
 0x711   : > { %v5323_v50 = vsel %vm5322_vm2, %v7253_v33, %v5319_v44 }
 0x712   : > { %v5328_v25 = vsel %vm5325_vm3, %v5327_v13, %v5323_v50 }
 0x713   : > { %v7255_v58 = vpop.eup %7254  ;;  %v5329_v11 = vmul.f32 %v9452_v35, %v5328_v25 }
 0x714   : > { %v5331_v14 = vmul.f32 %v7255_v58, %v5234_v53  ;;  %vm5336_vm4 = vweird.f32 %v7255_v58 }
 0x715   : > { %5499 = vst [vmem:[#allocation27 + $0x20] sm:$0xff] %v5329_v11  ;;  %v5236_v59 = vpop.xlane.xlu2 %5235  ;;  %vm5337_vm6 = vmor %vm5335_vm5, %vm5336_vm4 }
 0x716   : > { %v5332_v62 = vsub.f32 1.0, %v5331_v14  ;;  %7256 = vrcp.f32 %v5236_v59  ;;  %v5356_v32 = vand.u32 2147483648, %v5236_v59  ;;  %v5354_v28 = vand.u32 2147483647, %v5236_v59 }
 0x717   : > { %vm5350_vm9 = vweird.f32 %v5236_v59 }
 0x718   : > { %v5333_v12 = vmul.f32 %v7255_v58, %v5332_v62  ;;  %v5357_v24 = vor.u32 1.1754944e-38, %v5356_v32  ;;  %vm5355_vm12 = vcmp.eq.f32.partialorder %v5354_v28, 8.507059e+37 }
 0x719   : > { %v5238_v0 = vpop.xlane.xlu0 %5237 }
 0x71a   : > { %v5334_v39 = vadd.f32 %v7255_v58, %v5333_v12  ;;  %7258 = vrcp.f32 %v5238_v0  ;;  %v5371_v51 = vand.u32 2147483648, %v5238_v0  ;;  %vm5365_vm13 = vweird.f32 %v5238_v0 }
 0x71c   : > { %v5338_v52 = vsel %vm5337_vm6, %v7255_v58, %v5334_v39  ;;  %v7257_v54 = vpop.eup %7256  ;;  %v5372_v63 = vor.u32 1.1754944e-38, %v5371_v51 }
 0x71d   : > { %v5343_v9 = vsel %vm5340_vm7, %v5342_v38, %v5338_v52  ;;  %v5346_v6 = vmul.f32 %v7257_v54, %v5236_v59  ;;  %vm5351_vm8 = vweird.f32 %v7257_v54 }
 0x71e   : > { %v5344_v35 = vmul.f32 %v9497_v56, %v5343_v9  ;;  %vm5352_vm10 = vmor %vm5350_vm9, %vm5351_vm8  ;;  %v5369_v56 = vand.u32 2147483647, %v5238_v0 }
 0x71f   : > { %v5347_v47 = vsub.f32 1.0, %v5346_v6 }
 0x720   : > { %5500 = vst [vmem:[#allocation27 + $0x28] sm:$0xff] %v5344_v35  ;;  %v7259_v31 = vpop.eup %7258  ;;  %vm5370_vm15 = vcmp.eq.f32.partialorder %v5369_v56, 8.507059e+37 }
 0x721   : > { %v5361_v43 = vmul.f32 %v7259_v31, %v5238_v0  ;;  %v5348_v37 = vmul.f32 %v7257_v54, %v5347_v47  ;;  %vm5366_vm11 = vweird.f32 %v7259_v31 }
 0x722   : > { %vm5367_vm14 = vmor %vm5365_vm13, %vm5366_vm11 }
 0x723   : > { %v5362_v10 = vsub.f32 1.0, %v5361_v43  ;;  %v5349_v4 = vadd.f32 %v7257_v54, %v5348_v37 }
 0x724   : > { %v5240_v48 = vpop.xlane.xlu1 %5239 }
 0x725   : > { %7260 = vrcp.f32 %v5240_v48  ;;  %v5363_v45 = vmul.f32 %v7259_v31, %v5362_v10  ;;  %v5353_v3 = vsel %vm5352_vm10, %v7257_v54, %v5349_v4  ;;  %v5386_v57 = vand.u32 2147483648, %v5240_v48 }
 0x726   : > { %v5358_v55 = vsel %vm5355_vm12, %v5357_v24, %v5353_v3  ;;  %v5384_v18 = vand.u32 2147483647, %v5240_v48  ;;  %vm5380_vm1 = vweird.f32 %v5240_v48 }
 0x727   : > { %v5364_v60 = vadd.f32 %v7259_v31, %v5363_v45  ;;  %v5359_v20 = vmul.f32 %v9537_v8, %v5358_v55  ;;  %v5387_v8 = vor.u32 1.1754944e-38, %v5386_v57 }
 0x728   : > { %vm5385_vm3 = vcmp.eq.f32.partialorder %v5384_v18, 8.507059e+37 }
 0x729   : > { %v5368_v22 = vsel %vm5367_vm14, %v7259_v31, %v5364_v60  ;;  %5501 = vst [vmem:[#allocation27 + $0x30] sm:$0xff] %v5359_v20 }
 0x72a   : > { %v5373_v5 = vsel %vm5370_vm15, %v5372_v63, %v5368_v22 }
 0x72b   : > { %v7261_v17 = vpop.eup %7260  ;;  %v5374_v34 = vmul.f32 %v9553_v42, %v5373_v5  ;;  %v5242_v36 = vpop.xlane.xlu2 %5241 }
 0x72c   : > { %v5376_v33 = vmul.f32 %v7261_v17, %v5240_v48  ;;  %7262 = vrcp.f32 %v5242_v36  ;;  %vm5381_vm0 = vweird.f32 %v7261_v17  ;;  %v5401_v13 = vand.u32 2147483648, %v5242_v36 }
 0x72d   : > { %5502 = vst [vmem:[#allocation27 + $0x38] sm:$0xff] %v5374_v34  ;;  %vm5382_vm2 = vmor %vm5380_vm1, %vm5381_vm0  ;;  %v5399_v58 = vand.u32 2147483647, %v5242_v36  ;;  %vm5395_vm5 = vweird.f32 %v5242_v36 }
 0x72e   : > { %v5377_v30 = vsub.f32 1.0, %v5376_v33  ;;  %v5402_v62 = vor.u32 1.1754944e-38, %v5401_v13 }
 0x72f   : > { %vm5400_vm7 = vcmp.eq.f32.partialorder %v5399_v58, 8.507059e+37 }
 0x730   : > { %v5378_v61 = vmul.f32 %v7261_v17, %v5377_v30 }
 0x731   : > { %v5244_v7 = vpop.xlane.xlu0 %5243 }
 0x732   : > { %v5379_v21 = vadd.f32 %v7261_v17, %v5378_v61  ;;  %7264 = vrcp.f32 %v5244_v7  ;;  %v7263_v53 = vpop.eup %7262  ;;  %v5416_v15 = vand.u32 2147483648, %v5244_v7  ;;  %v5414_v0 = vand.u32 2147483647, %v5244_v7 }
 0x733   : > { %v5391_v27 = vmul.f32 %v7263_v53, %v5242_v36  ;;  %vm5396_vm4 = vweird.f32 %v7263_v53  ;;  %vm5410_vm9 = vweird.f32 %v5244_v7 }
 0x734   : > { %v5383_v29 = vsel %vm5382_vm2, %v7261_v17, %v5379_v21  ;;  %vm5397_vm6 = vmor %vm5395_vm5, %vm5396_vm4  ;;  %v5417_v9 = vor.u32 1.1754944e-38, %v5416_v15  ;;  %vm5415_vm11 = vcmp.eq.f32.partialorder %v5414_v0, 8.507059e+37 }
 0x735   : > { %v5388_v41 = vsel %vm5385_vm3, %v5387_v8, %v5383_v29  ;;  %v5392_v44 = vsub.f32 1.0, %v5391_v27 }
 0x736   : > { %v5389_v42 = vmul.f32 %v9597_v46, %v5388_v41 }
 0x737   : > { %v5393_v25 = vmul.f32 %v7263_v53, %v5392_v44 }
 0x738   : > { %5503 = vst [vmem:[#allocation27 + $0x40] sm:$0xff] %v5389_v42  ;;  %v7265_v50 = vpop.eup %7264 }
 0x739   : > { %v5406_v11 = vmul.f32 %v7265_v50, %v5244_v7  ;;  %v5394_v14 = vadd.f32 %v7263_v53, %v5393_v25  ;;  %vm5411_vm8 = vweird.f32 %v7265_v50 }
 0x73a   : > { %vm5412_vm10 = vmor %vm5410_vm9, %vm5411_vm8 }
 0x73b   : > { %v5407_v49 = vsub.f32 1.0, %v5406_v11  ;;  %v5398_v12 = vsel %vm5397_vm6, %v7263_v53, %v5394_v14 }
 0x73c   : > { %v5246_v59 = vpop.xlane.xlu1 %5245  ;;  %v5403_v46 = vsel %vm5400_vm7, %v5402_v62, %v5398_v12 }
 0x73d   : > { %7266 = vrcp.f32 %v5246_v59  ;;  %v5408_v39 = vmul.f32 %v7265_v50, %v5407_v49  ;;  %v5404_v38 = vmul.f32 %v9626_v19, %v5403_v46  ;;  %v5431_v37 = vand.u32 2147483648, %v5246_v59 }
 0x73e   : > { %v5429_v19 = vand.u32 2147483647, %v5246_v59  ;;  %vm5425_vm13 = vweird.f32 %v5246_v59 }
 0x73f   : > { %v5409_v52 = vadd.f32 %v7265_v50, %v5408_v39  ;;  %5504 = vst [vmem:[#allocation27 + $0x48] sm:$0xff] %v5404_v38  ;;  %v5432_v4 = vor.u32 1.1754944e-38, %v5431_v37 }
 0x740   : > { %vm5430_vm15 = vcmp.eq.f32.partialorder %v5429_v19, 8.507059e+37 }
 0x741   : > { %v5413_v54 = vsel %vm5412_vm10, %v7265_v50, %v5409_v52 }
 0x742   : > { %v5418_v6 = vsel %vm5415_vm11, %v5417_v9, %v5413_v54 }
 0x743   : > { %v7267_v35 = vpop.eup %7266  ;;  %v5419_v31 = vmul.f32 %v9647_v40, %v5418_v6  ;;  %v5248_v43 = vpop.xlane.xlu2 %5247 }
 0x744   : > { %v5421_v47 = vmul.f32 %v7267_v35, %v5246_v59  ;;  %7268 = vrcp.f32 %v5248_v43  ;;  %vm5426_vm12 = vweird.f32 %v7267_v35  ;;  %v5444_v60 = vand.u32 2147483647, %v5248_v43 }
 0x745   : > { %5505 = vst [vmem:[#allocation27 + $0x50] sm:$0xff] %v5419_v31  ;;  %vm5427_vm14 = vmor %vm5425_vm13, %vm5426_vm12  ;;  %v5446_v20 = vand.u32 2147483648, %v5248_v43  ;;  %vm5440_vm1 = vweird.f32 %v5248_v43 }
 0x746   : > { %v5422_v32 = vsub.f32 1.0, %v5421_v47  ;;  %vm5445_vm3 = vcmp.eq.f32.partialorder %v5444_v60, 8.507059e+37 }
 0x747   : > { %v5447_v33 = vor.u32 1.1754944e-38, %v5446_v20 }
 0x748   : > { %v5423_v28 = vmul.f32 %v7267_v35, %v5422_v32 }
 0x749   : > { %v5250_v48 = vpop.xlane.xlu0 %5249 }
 0x74a   : > { %v5424_v10 = vadd.f32 %v7267_v35, %v5423_v28  ;;  %7270 = vrcp.f32 %v5250_v48  ;;  %v7269_v24 = vpop.eup %7268  ;;  %v5461_v30 = vand.u32 2147483648, %v5250_v48  ;;  %v5459_v57 = vand.u32 2147483647, %v5250_v48 }
 0x74b   : > { %v5436_v56 = vmul.f32 %v7269_v24, %v5248_v43  ;;  %vm5441_vm0 = vweird.f32 %v7269_v24  ;;  %vm5455_vm5 = vweird.f32 %v5250_v48 }
 0x74c   : > { %v5428_v51 = vsel %vm5427_vm14, %v7267_v35, %v5424_v10  ;;  %vm5442_vm2 = vmor %vm5440_vm1, %vm5441_vm0  ;;  %v5462_v7 = vor.u32 1.1754944e-38, %v5461_v30  ;;  %vm5460_vm7 = vcmp.eq.f32.partialorder %v5459_v57, 8.507059e+37 }
 0x74d   : > { %v5433_v45 = vsel %vm5430_vm15, %v5432_v4, %v5428_v51  ;;  %v5437_v3 = vsub.f32 1.0, %v5436_v56 }
 0x74e   : > { %v5434_v40 = vmul.f32 %v9687_v23, %v5433_v45 }
 0x74f   : > { %v5438_v63 = vmul.f32 %v7269_v24, %v5437_v3 }
 0x750   : > { %5506 = vst [vmem:[#allocation27 + $0x58] sm:$0xff] %v5434_v40  ;;  %v7271_v55 = vpop.eup %7270 }
 0x751   : > { %v5451_v22 = vmul.f32 %v7271_v55, %v5250_v48  ;;  %v5439_v17 = vadd.f32 %v7269_v24, %v5438_v63  ;;  %vm5456_vm4 = vweird.f32 %v7271_v55 }
 0x752   : > { %vm5457_vm6 = vmor %vm5455_vm5, %vm5456_vm4 }
 0x753   : > { %v5452_v5 = vsub.f32 1.0, %v5451_v22  ;;  %v5443_v36 = vsel %vm5442_vm2, %v7269_v24, %v5439_v17 }
 0x754   : > { %v5252_v34 = vpop.xlane.xlu1 %5251  ;;  %v5448_v18 = vsel %vm5445_vm3, %v5447_v33, %v5443_v36 }
 0x755   : > { %7272 = vrcp.f32 %v5252_v34  ;;  %v5453_v23 = vmul.f32 %v7271_v55, %v5452_v5  ;;  %v5449_v21 = vmul.f32 %v9711_v26, %v5448_v18  ;;  %v5476_v25 = vand.u32 2147483648, %v5252_v34 }
 0x756   : > { %v5474_v26 = vand.u32 2147483647, %v5252_v34  ;;  %vm5470_vm9 = vweird.f32 %v5252_v34 }
 0x757   : > { %v5254_v61 = vpop.xlane.xlu2 %5253  ;;  %v5454_v8 = vadd.f32 %v7271_v55, %v5453_v23  ;;  %5507 = vst [vmem:[#allocation27 + $0x60] sm:$0xff] %v5449_v21  ;;  %v5477_v12 = vor.u32 1.1754944e-38, %v5476_v25 }
 0x758   : > { %7274 = vrcp.f32 %v5254_v61  ;;  %v5491_v14 = vand.u32 2147483648, %v5254_v61  ;;  %v5489_v59 = vand.u32 2147483647, %v5254_v61  ;;  %vm5475_vm12 = vcmp.eq.f32.partialorder %v5474_v26, 8.507059e+37 }
 0x759   : > { %v5458_v29 = vsel %vm5457_vm6, %v7271_v55, %v5454_v8  ;;  %vm5485_vm13 = vweird.f32 %v5254_v61 }
 0x75a   : > { %v5463_v41 = vsel %vm5460_vm7, %v5462_v7, %v5458_v29  ;;  %v5492_v39 = vor.u32 1.1754944e-38, %v5491_v14  ;;  %vm5490_vm15 = vcmp.eq.f32.partialorder %v5489_v59, 8.507059e+37 }
 0x75b   : > { %v7273_v53 = vpop.eup %7272  ;;  %v5464_v42 = vmul.f32 %v9717_v1, %v5463_v41 }
 0x75c   : > { %v5466_v27 = vmul.f32 %v7273_v53, %v5252_v34  ;;  %vm5471_vm8 = vweird.f32 %v7273_v53 }
 0x75d   : > { %5508 = vst [vmem:[#allocation27 + $0x68] sm:$0xff] %v5464_v42  ;;  %vm5472_vm11 = vmor %vm5470_vm9, %vm5471_vm8 }
 0x75e   : > { %v7275_v44 = vpop.eup %7274  ;;  %v5467_v13 = vsub.f32 1.0, %v5466_v27 }
 0x75f   : > { %v5481_v50 = vmul.f32 %v7275_v44, %v5254_v61  ;;  %vm5486_vm10 = vweird.f32 %v7275_v44 }
 0x760   : > { %v5468_v58 = vmul.f32 %v7273_v53, %v5467_v13  ;;  %vm5487_vm14 = vmor %vm5485_vm13, %vm5486_vm10 }
 0x761   : > { %v5482_v11 = vsub.f32 1.0, %v5481_v50 }
 0x762   : > { %v5469_v62 = vadd.f32 %v7273_v53, %v5468_v58 }
 0x763   : > { %v5483_v49 = vmul.f32 %v7275_v44, %v5482_v11 }
 0x764   : > { %v5473_v15 = vsel %vm5472_vm11, %v7273_v53, %v5469_v62 }
 0x765   : > { %v5484_v1 = vadd.f32 %v7275_v44, %v5483_v49  ;;  %v5478_v46 = vsel %vm5475_vm12, %v5477_v12, %v5473_v15 }
 0x766   : > { %v5479_v0 = vmul.f32 %v9739_v16, %v5478_v46 }
 0x767   : > { %v5488_v38 = vsel %vm5487_vm14, %v7275_v44, %v5484_v1 }
 0x768   : > { %v5493_v52 = vsel %vm5490_vm15, %v5492_v39, %v5488_v38  ;;  %5509 = vst [vmem:[#allocation27 + $0x70] sm:$0xff] %v5479_v0 }
 0x769   : > { %v5494_v9 = vmul.f32 %v9747_v2, %v5493_v52 }
 0x76b   : > { %5510 = vst [vmem:[#allocation27 + $0x78] sm:$0xff] %v5494_v9 }
 0x76c PF: > { %p6999_p3 = scmp.eq.s32.totalorder %s7990_s29, 1  ;;  %s7829_s0 = smov [#allocation25]  }
 0x76d   : > { %s5536_s21 = sshll.u32 %s7829_s0, 4  ;;  %s10006_s24 = sld [smem:[#allocation69_spill]]  ;;  %s5537_s21 = int_to_ptr.vmem [resolvable:$true] %s5536_s21 }
 0x76e   : > { %s7830_s5 = smov 128   ;;  %s7831_s22 = smov 8  }
 0x76f   : > { %s7832_s1 = smov [#allocation24]   ;;  %s10007_s23 = sld [smem:[#allocation68_spill]] }
 0x770   : > { %s5519_s8 = sshll.u32 %s7832_s1, 4  ;;  %s10008_s16 = sld [smem:[#allocation70_spill]]  ;;  %s5520_s8 = int_to_ptr.vmem [resolvable:$true] %s5519_s8 }
 0x771   : > { %s7833_s20 = smov [#allocation27]  }
 0x772   : > { %s5553_s27 = sshll.u32 %s7833_s20, 4  ;;  %s5554_s27 = int_to_ptr.vmem [resolvable:$true] %s5553_s27 }
 0x773   : > { %s5538_s3 = sshll.u32 %s10006_s24, 4  ;;  %s5539_s3 = int_to_ptr.hbm [resolvable:$true] %s5538_s3 }
 0x774   : > { %6933 = dma.vmem_to_hbm [thread:$0]  (%p6999_p3), %s5537_s21, 2048, %s5539_s3, [#allocation26], %s7830_s5, %s7830_s5, %s7831_s22  }
 0x775   : > { %s5521_s4 = sshll.u32 %s10007_s23, 4  ;;  %s5522_s4 = int_to_ptr.hbm [resolvable:$true] %s5521_s4 }
 0x776   : > { %6931 = dma.vmem_to_hbm [thread:$0]  (%p6999_p3), %s5520_s8, 2048, %s5522_s4, [#allocation6], %s7830_s5, %s7830_s5, %s7831_s22  }
 0x777   : > { %s5555_s18 = sshll.u32 %s10008_s16, 4  ;;  %s5556_s18 = int_to_ptr.hbm [resolvable:$true] %s5555_s18 }
 0x778   : > { %6935 = dma.vmem_to_hbm [thread:$0]  (%p6999_p3), %s5554_s27, 2048, %s5556_s18, [#allocation26], %s7830_s5, %s7830_s5, %s7831_s22  }
 0x779   : > { %7781 = dma.done.wait (%p6999_p3), [#allocation6], 2048  }
 0x77a   : > { %7783 = vsyncadd (%p6999_p3), [#allocation6], 4294965248 }
 0x77b   : > { %7785 = dma.done.wait (%p6999_p3), [#allocation26], 4096  }
 0x77c   : > { %7787 = vsyncadd (%p6999_p3), [#allocation26], 4294963200 }
 0x77d PF: > { %s10009_s2 = sld [smem:[#allocation40_spill]]  ;;  %s10013_s5 = smov %s7794_s26 }
 0x77e   : > { %s10010_s7 = sld [smem:[#allocation39_spill]]  ;;  %s10015_s28 = smov %s7806_s6 }
 0x77f   : > { %s10011_s27 = sld [smem:[#allocation42_spill]] }
 0x780   : > { %s10012_s25 = sld [smem:[#allocation41_spill]] }
 0x783   : > { %s50_s2 = sadd.s32 1, %s10009_s2  }
 0x784   : > { %p47_p4 = scmp.ge.s32.totalorder %s50_s2, 4   ;;  %s10014_s26 = smov %s10010_s7 }
 0x786   : > { %s10016_s6 = smov %s10012_s25  ;;  %49 = sbr.rel (!%p47_p4) target bundleno = 38 (0x26), region = 234 }
 0x78b   :  { %5582 = vsyncpa [#allocation5], 1 }
 0x78c   :  { %5584 = vsyncpa [#allocation5 + $0x1], 1 }
 0x78d   :  { %5585 = vsyncpa [#allocation8], 1 }
 0x78e   :  { %5587 = vsyncpa [#allocation8 + $0x1], 1 }
 0x78f   :  { %5588 = vsyncpa [#allocation11], 1 }
 0x790   :  { %5590 = vsyncpa [#allocation11 + $0x1], 1 }
 0x791   :  { %5591 = vsyncpa [#allocation14], 1 }
 0x792   :  { %5592 = vsyncpa [#allocation17], 1 }
 0x793   :  { %5593 = vsyncpa [#allocation20], 1 }
 0x794   :  { %5594 = vsyncpa [#allocation23], 1 }
 0x795   :  { %5595 = vsyncpa [#allocation6], 1 }
 0x796   :  { %5597 = vsyncpa [#allocation6 + $0x1], 1 }
 0x797   :  { %5598 = vsyncpa [#allocation26], 1 }

</bundles_post_ra>
